<compile_context>
chip_gen: v7x
topology: tpu7x:2x2x1
jax: 0.10.0
libtpu: 0.0.40
codegen_flags: <defaults>
</compile_context>

<pallas_src>
import functools
import math

import jax
import jax.numpy as jnp
from jax.experimental import pallas as pl
from jax.experimental.pallas import tpu as pltpu

LEAKY_SLOPE = 0.01                      # nn.LeakyReLU default
_VMEM_BUDGET = 24 * 1024 * 1024         # per-kernel estimated VMEM budget
_KSPLIT_LIMIT = 12 * 1024 * 1024        # double-buffered bf16 weight-block cap
_VMEM_LIMIT_BYTES = 40 * 1024 * 1024    # < 48 MiB headroom advised for v7x


def _round_up(x, m):
    return (x + m - 1) // m * m


def _apply_act(y, act):
    if act == "leaky":
        return jnp.where(y >= 0, y, LEAKY_SLOPE * y)
    if act == "relu":
        return jnp.maximum(y, 0.0)
    if act == "tanh":
        return jnp.tanh(y)
    return y


# -----------------------------------------------------------------------------
# Fused matmul + bias (+ residual) + activation Pallas kernels
# -----------------------------------------------------------------------------
def _mm_kernel(a_ref, b_ref, bias_ref, o_ref, acc_ref, *, act, nk):
    @pl.when(pl.program_id(1) == 0)
    def _():
        acc_ref[...] = jnp.zeros_like(acc_ref)

    acc_ref[...] += jnp.dot(a_ref[...], b_ref[...],
                            preferred_element_type=jnp.float32)

    @pl.when(pl.program_id(1) == nk - 1)
    def _():
        y = acc_ref[...] + bias_ref[...]
        o_ref[...] = _apply_act(y, act).astype(o_ref.dtype)


def _mm_res_kernel(a_ref, b_ref, bias_ref, r_ref, o_ref, acc_ref, *, act, nk):
    @pl.when(pl.program_id(1) == 0)
    def _():
        acc_ref[...] = jnp.zeros_like(acc_ref)

    acc_ref[...] += jnp.dot(a_ref[...], b_ref[...],
                            preferred_element_type=jnp.float32)

    @pl.when(pl.program_id(1) == nk - 1)
    def _():
        # residual skip-add fused before the activation (ResidualBlock tail)
        y = acc_ref[...] + bias_ref[...] + r_ref[...].astype(jnp.float32)
        o_ref[...] = _apply_act(y, act).astype(o_ref.dtype)


def _pick_tiles(M, K, N, out_bytes, has_res):
    """Layer-adaptive (tm, tk) under a VMEM budget (lane-rounded estimate)."""
    Nl = _round_up(N, 128)
    # Split K only when the full weight slab would not fit (fc1, reconstruct16)
    tk = K
    if 2 * _round_up(K, 128) * Nl * 2 > _KSPLIT_LIMIT:
        cap = max(128, (_KSPLIT_LIMIT // (2 * Nl * 2)) // 128 * 128)
        tk = 0
        for cand in range(cap, 0, -128):
            if K % cand == 0:
                tk = cand
                break
        if tk == 0:
            tk = cap          # fallback: pad K up to a multiple of cap
    Kl = _round_up(tk, 128)
    # >= 2 blocks along the parallel (M) axis when possible -> both v7x cores
    tm_cap = 1024
    if M >= 32:
        tm_cap = min(tm_cap, max(16, M // 2))
    else:
        tm_cap = 16
    tm = 16
    for cand in (1024, 512, 256, 128, 64, 32, 16):
        if cand > tm_cap:
            continue
        v = (2 * cand * Kl * 2        # A, double buffered, bf16
             + 2 * Kl * Nl * 2        # B, double buffered, bf16
             + 2 * Nl * 4             # bias
             + 2 * cand * Nl * out_bytes
             + cand * Nl * 4)         # f32 accumulator scratch
        if has_res:
            v += 2 * cand * Nl * 2
        if v <= _VMEM_BUDGET:
            tm = cand
            break
    return tm, tk


def fused_matmul(a, b, bias, act="none", residual=None, out_dtype=jnp.bfloat16):
    """out = act((a @ b) + bias [+ residual]); bf16 operands, f32 accumulate."""
    M, K = a.shape
    K2, N = b.shape
    assert K == K2, (K, K2)
    out_bytes = jnp.dtype(out_dtype).itemsize
    tm, tk = _pick_tiles(M, K, N, out_bytes, residual is not None)
    Mp = _round_up(M, tm)
    Kp = _round_up(K, tk)

    a = a.astype(jnp.bfloat16)
    b = b.astype(jnp.bfloat16)
    if Mp != M or Kp != K:
        a = jnp.pad(a, ((0, Mp - M), (0, Kp - K)))
    if Kp != K:
        b = jnp.pad(b, ((0, Kp - K), (0, 0)))
    bias2d = bias.astype(jnp.float32).reshape(1, N)

    grid = (Mp // tm, Kp // tk)
    nk = grid[1]

    in_specs = [
        pl.BlockSpec((tm, tk), lambda i, k: (i, k)),
        pl.BlockSpec((tk, N), lambda i, k: (k, 0)),
        pl.BlockSpec((1, N), lambda i, k: (0, 0)),
    ]
    inputs = [a, b, bias2d]
    if residual is not None:
        r = residual.astype(jnp.bfloat16)
        if Mp != M:
            r = jnp.pad(r, ((0, Mp - M), (0, 0)))
        in_specs.append(pl.BlockSpec((tm, N), lambda i, k: (i, 0)))
        inputs.append(r)
        kernel = functools.partial(_mm_res_kernel, act=act, nk=nk)
    else:
        kernel = functools.partial(_mm_kernel, act=act, nk=nk)

    out = pl.pallas_call(
        kernel,
        out_shape=jax.ShapeDtypeStruct((Mp, N), out_dtype),
        grid_spec=pltpu.PrefetchScalarGridSpec(
            num_scalar_prefetch=0,
            grid=grid,
            in_specs=in_specs,
            out_specs=pl.BlockSpec((tm, N), lambda i, k: (i, 0)),
            scratch_shapes=[pltpu.VMEM((tm, N), jnp.float32)],
        ),
        compiler_params=pltpu.CompilerParams(
            dimension_semantics=("parallel", "arbitrary"),
            vmem_limit_bytes=_VMEM_LIMIT_BYTES),
    )(*inputs)
    if Mp != M:
        out = out[:M]
    return out


# -----------------------------------------------------------------------------
# Conv / deconv lowering (glue + fused Pallas matmul hot path)
# -----------------------------------------------------------------------------
def _im2col(x, k, stride, pads):
    pt, pb, pleft, pright = pads
    if pt or pb or pleft or pright:
        x = jnp.pad(x, ((0, 0), (pt, pb), (pleft, pright), (0, 0)))
    N, Hp, Wp, C = x.shape
    Ho = (Hp - k) // stride + 1
    Wo = (Wp - k) // stride + 1
    if k == 1 and stride == 1:
        return x.reshape(N * Ho * Wo, C), (N, Ho, Wo)
    cols = []
    for i in range(k):
        for j in range(k):
            cols.append(x[:, i:i + stride * (Ho - 1) + 1:stride,
                          j:j + stride * (Wo - 1) + 1:stride, :])
    patches = jnp.concatenate(cols, axis=-1)
    return patches.reshape(N * Ho * Wo, k * k * C), (N, Ho, Wo)


def conv2d(x, wmat, bias, k, stride, pad, act, residual=None,
           out_dtype=jnp.bfloat16):
    pads = (pad, pad, pad, pad) if isinstance(pad, int) else pad
    patches, (N, Ho, Wo) = _im2col(x, k, stride, pads)
    res = None
    if residual is not None:
        res = residual.reshape(N * Ho * Wo, residual.shape[-1])
    cout = wmat.shape[1]
    y = fused_matmul(patches, wmat, bias, act, residual=res,
                     out_dtype=out_dtype)
    return y.reshape(N, Ho, Wo, cout)


def deconv2d(x, w_hwio, bias, stride, pad, out_pad, act,
             out_dtype=jnp.bfloat16):
    """ConvTranspose2d via sub-pixel decomposition (w is the equivalent
    forward-conv HWIO weight)."""
    N, H, W, cin = x.shape
    k = w_hwio.shape[0]
    cout = w_hwio.shape[3]
    t = k - 1 - pad
    if stride == 1:
        wmat = w_hwio.reshape(k * k * cin, cout)
        return conv2d(x, wmat, bias, k, 1, (t, t + out_pad, t, t + out_pad),
                      act, out_dtype=out_dtype)

    Hout = (H - 1) * stride - 2 * pad + k + out_pad
    Wout = (W - 1) * stride - 2 * pad + k + out_pad
    out = jnp.zeros((N, Hout, Wout, cout), out_dtype)
    for ay in range(stride):
        qy = len(range(ay, Hout, stride))
        taps_y = [(di, (ay + di - t) // stride)
                  for di in range(k) if (ay + di - t) % stride == 0]
        for ax in range(stride):
            qx = len(range(ax, Wout, stride))
            taps_x = [(dj, (ax + dj - t) // stride)
                      for dj in range(k) if (ax + dj - t) % stride == 0]
            if not taps_y or not taps_x:
                # this output phase receives no input taps -> act(bias)
                phase = jnp.broadcast_to(
                    _apply_act(bias.astype(jnp.float32), act).astype(out_dtype),
                    (N, qy, qx, cout))
            else:
                mys = [m for _, m in taps_y]
                mxs = [m for _, m in taps_x]
                ptp = max(0, -min(mys))
                pbt = max(0, max(mys) + qy - 1 - (H - 1))
                plt = max(0, -min(mxs))
                prt = max(0, max(mxs) + qx - 1 - (W - 1))
                xp = jnp.pad(x, ((0, 0), (ptp, pbt), (plt, prt), (0, 0)))
                cols, wrows = [], []
                for di, my in taps_y:
                    for dj, mx in taps_x:
                        cols.append(xp[:, my + ptp:my + ptp + qy,
                                       mx + plt:mx + plt + qx, :])
                        wrows.append(w_hwio[di, dj])
                patches = jnp.concatenate(cols, axis=-1).reshape(
                    N * qy * qx, len(cols) * cin)
                wmat = jnp.concatenate(wrows, axis=0)
                y = fused_matmul(patches, wmat, bias, act, out_dtype=out_dtype)
                phase = y.reshape(N, qy, qx, cout)
            out = out.at[:, ay::stride, ax::stride, :].set(phase)
    return out


# -----------------------------------------------------------------------------
# Deterministic parameter construction (weights pre-folded / reshaped / bf16)
# -----------------------------------------------------------------------------
class ParamGen:
    def __init__(self, seed=0):
        self.key = jax.random.PRNGKey(seed)

    def take(self, shape, scale):
        self.key, sub = jax.random.split(self.key)
        return jax.random.normal(sub, shape, jnp.float32) * scale


def _fold_bn(pg, w, b, cout, use_bn):
    if use_bn:
        gamma = 1.0 + pg.take((cout,), 0.01)
        beta = pg.take((cout,), 0.01)
        scale = gamma / jnp.sqrt(1.0 + 1e-5)   # eval mode: running_var = 1
        w = w * scale                          # fold scale into weight columns
        bias = beta + b * scale                # running_mean = 0
    else:
        bias = b
    return w, bias


def conv_p(pg, cin, cout, k, use_bn=True):
    w = pg.take((k, k, cin, cout), 1.0 / math.sqrt(k * k * cin))
    b = pg.take((cout,), 0.01)
    w, bias = _fold_bn(pg, w, b, cout, use_bn)
    return {"w": w.reshape(k * k * cin, cout).astype(jnp.bfloat16),
            "b": bias.astype(jnp.float32), "k": k}


def deconv_p(pg, cin, cout, k, stride, pad, out_pad, use_bn=True):
    w = pg.take((k, k, cin, cout), 1.0 / math.sqrt(k * k * cin))
    b = pg.take((cout,), 0.01)
    w, bias = _fold_bn(pg, w, b, cout, use_bn)
    return {"w": w.astype(jnp.bfloat16), "b": bias.astype(jnp.float32),
            "k": k, "stride": stride, "pad": pad, "out_pad": out_pad}


def res_p(pg, c, k):
    return (conv_p(pg, c, c, k), conv_p(pg, c, c, k))


def conv_block(p, x, stride, pad, act, out_dtype=jnp.bfloat16):
    return conv2d(x, p["w"], p["b"], p["k"], stride, pad, act,
                  out_dtype=out_dtype)


def deconv_block(p, x, act):
    return deconv2d(x, p["w"], p["b"], p["stride"], p["pad"], p["out_pad"], act)


def res_block(p, x, act="leaky"):
    # assumed: act( x + BN(conv(act(BN(conv(x))))) ); skip-add fused in-kernel
    p1, p2 = p
    k = p1["k"]
    h = conv2d(x, p1["w"], p1["b"], k, 1, k // 2, act)
    return conv2d(h, p2["w"], p2["b"], k, 1, k // 2, act, residual=x)


def init_params(seed=0, noise_dim=64, local_features_dim=64):
    pg = ParamGen(seed)
    ce = [64, 64, 128, 256, 512]
    cdf = [64, 32, 16, 8]
    cd = [512, 256, 128, 64]
    cdc = [64, 32]
    P = {}
    P["conv0"] = (conv_p(pg, 3, ce[0], 7), res_p(pg, ce[0], 7))
    P["conv1"] = (conv_p(pg, ce[0], ce[1], 5), res_p(pg, ce[1], 5))
    P["conv2"] = (conv_p(pg, ce[1], ce[2], 3), res_p(pg, ce[2], 3))
    P["conv3"] = (conv_p(pg, ce[2], ce[3], 3), res_p(pg, ce[3], 3))
    P["conv4"] = (conv_p(pg, ce[3], ce[4], 3),
                  tuple(res_p(pg, ce[4], 3) for _ in range(4)))
    P["fc1_w"] = pg.take((ce[4] * 8 * 8, 512),
                         1.0 / math.sqrt(ce[4] * 8 * 8)).astype(jnp.bfloat16)
    P["fc1_b"] = pg.take((512,), 0.01)
    P["feat8"] = deconv_p(pg, ce[4] // 2 + noise_dim, cdf[0], 8, 1, 0, 0)
    P["decode8"] = res_p(pg, cdf[0] + ce[4], 3)
    P["reconstruct8"] = tuple(res_p(pg, cdf[0] + ce[4], 3) for _ in range(2))
    P["deconv16"] = deconv_p(pg, cdf[0] + ce[4], cd[0], 3, 2, 1, 1)
    P["decode16"] = res_p(pg, ce[3], 3)
    P["reconstruct16"] = tuple(res_p(pg, cd[0] + ce[3], 3) for _ in range(2))
    P["feat32"] = deconv_p(pg, cdf[0], cdf[1], 3, 4, 0, 1)
    P["deconv32"] = deconv_p(pg, cd[0] + ce[3], cd[1], 3, 2, 1, 1)
    P["decode32"] = res_p(pg, cdf[1] + ce[2] + 3, 3)
    rec32_c = cdf[1] + ce[2] + 3 + cd[1]
    P["reconstruct32"] = tuple(res_p(pg, rec32_c, 3) for _ in range(2))
    P["output32"] = conv_p(pg, rec32_c, 3, 3, use_bn=False)
    P["feat64"] = deconv_p(pg, cdf[1], cdf[2], 3, 2, 1, 1)
    P["deconv64"] = deconv_p(pg, rec32_c, cd[2], 3, 2, 1, 1)
    P["decode64"] = res_p(pg, cdf[2] + ce[1] + 3, 5)
    rec64_c = cdf[2] + ce[1] + 3 + cd[2] + 3
    P["reconstruct64"] = tuple(res_p(pg, rec64_c, 3) for _ in range(2))
    P["output64"] = conv_p(pg, rec64_c, 3, 3, use_bn=False)
    P["feat128"] = deconv_p(pg, cdf[2], cdf[3], 3, 2, 1, 1)
    P["deconv128"] = deconv_p(pg, rec64_c, cd[3], 3, 2, 1, 1)
    P["decode128"] = res_p(pg, cdf[3] + ce[0] + 3, 7)
    rec128_c = cdf[3] + ce[0] + 3 + cd[3] + 3 + local_features_dim + 3
    P["reconstruct128"] = res_p(pg, rec128_c, 5)
    P["decode_conv0"] = (conv_p(pg, rec128_c, cdc[0], 5), res_p(pg, cdc[0], 3))
    P["decode_conv1"] = conv_p(pg, cdc[0], cdc[1], 3)
    P["output128"] = conv_p(pg, cdc[1], 3, 3, use_bn=False)
    return P


# -----------------------------------------------------------------------------
# GlobalPathway forward (NHWC, bf16 activations)
# -----------------------------------------------------------------------------
def global_pathway(P, img128, img64, img32, local_predict, local_feature,
                   noise):
    bf = jnp.bfloat16
    img128 = img128.astype(bf)
    img64 = img64.astype(bf)
    img32 = img32.astype(bf)
    local_predict = local_predict.astype(bf)
    local_feature = local_feature.astype(bf)
    B = img128.shape[0]

    x = conv_block(P["conv0"][0], img128, 1, 3, "leaky")
    conv0 = res_block(P["conv0"][1], x)
    x = conv_block(P["conv1"][0], conv0, 2, 2, "leaky")
    conv1 = res_block(P["conv1"][1], x)
    x = conv_block(P["conv2"][0], conv1, 2, 1, "leaky")
    conv2 = res_block(P["conv2"][1], x)
    x = conv_block(P["conv3"][0], conv2, 2, 1, "leaky")
    conv3 = res_block(P["conv3"][1], x)
    x = conv_block(P["conv4"][0], conv3, 2, 1, "leaky")
    for rp in P["conv4"][1]:
        x = res_block(rp, x)
    conv4 = x

    # fc1 (Linear, GEMV-shaped) + fc2 (MaxPool1d(2,2) over channel pairs)
    flat = jnp.transpose(conv4, (0, 3, 1, 2)).reshape(B, -1)  # NCHW flatten
    fc1 = fused_matmul(flat, P["fc1_w"], P["fc1_b"], "none",
                       out_dtype=jnp.float32)
    fc2 = jnp.maximum(fc1[:, 0::2], fc1[:, 1::2])              # (B, 256)

    z = jnp.concatenate([fc2, noise], axis=1).astype(bf)[:, None, None, :]
    feat8 = deconv_block(P["feat8"], z, "relu")
    decode8 = res_block(P["decode8"], jnp.concatenate([feat8, conv4], -1))
    r8 = decode8
    for rp in P["reconstruct8"]:
        r8 = res_block(rp, r8)
    assert r8.shape[1] == 8

    deconv16 = deconv_block(P["deconv16"], r8, "relu")
    decode16 = res_block(P["decode16"], conv3)
    r16 = jnp.concatenate([deconv16, decode16], -1)
    for rp in P["reconstruct16"]:
        r16 = res_block(rp, r16)
    assert r16.shape[1] == 16

    feat32 = deconv_block(P["feat32"], feat8, "relu")
    deconv32 = deconv_block(P["deconv32"], r16, "relu")
    decode32 = res_block(P["decode32"],
                         jnp.concatenate([feat32, conv2, img32], -1))
    r32 = jnp.concatenate([deconv32, decode32], -1)
    for rp in P["reconstruct32"]:
        r32 = res_block(rp, r32)
    output32 = conv_block(P["output32"], r32, 1, 1, "tanh",
                          out_dtype=jnp.float32)
    assert output32.shape[1] == 32

    feat64 = deconv_block(P["feat64"], feat32, "relu")
    deconv64 = deconv_block(P["deconv64"], r32, "relu")
    decode64 = res_block(P["decode64"],
                         jnp.concatenate([feat64, conv1, img64], -1))
    up32 = jax.image.resize(output32, (B, 64, 64, 3),
                            method="bilinear").astype(bf)
    r64 = jnp.concatenate([deconv64, decode64, up32], -1)
    for rp in P["reconstruct64"]:
        r64 = res_block(rp, r64)
    output64 = conv_block(P["output64"], r64, 1, 1, "tanh",
                          out_dtype=jnp.float32)
    assert output64.shape[1] == 64

    feat128 = deconv_block(P["feat128"], feat64, "relu")
    deconv128 = deconv_block(P["deconv128"], r64, "relu")
    decode128 = res_block(P["decode128"],
                          jnp.concatenate([feat128, conv0, img128], -1))
    up64 = jax.image.resize(output64, (B, 128, 128, 3),
                            method="bilinear").astype(bf)
    r128 = res_block(
        P["reconstruct128"],
        jnp.concatenate(
            [deconv128, decode128, up64, local_feature, local_predict], -1))
    x = conv_block(P["decode_conv0"][0], r128, 1, 2, "leaky")
    dconv0 = res_block(P["decode_conv0"][1], x)
    dconv1 = conv_block(P["decode_conv1"], dconv0, 1, 1, "leaky")
    output128 = conv_block(P["output128"], dconv1, 1, 1, "tanh",
                           out_dtype=jnp.float32)
    return output128, output64, output32, fc2


# -----------------------------------------------------------------------------
if __name__ == "__main__":
    B = 1  # spatial sizes are fixed by the architecture (fc1 expects 512*8*8)
    key = jax.random.PRNGKey(0)
    k = jax.random.split(key, 6)
    # PyTorch-style NCHW inputs
    img128_nchw = jax.random.normal(k[0], (B, 3, 128, 128), jnp.float32) * 0.5
    img64_nchw = jax.random.normal(k[1], (B, 3, 64, 64), jnp.float32) * 0.5
    img32_nchw = jax.random.normal(k[2], (B, 3, 32, 32), jnp.float32) * 0.5
    local_predict_nchw = jax.random.normal(k[3], (B, 3, 128, 128),
                                           jnp.float32) * 0.5
    local_feature_nchw = jax.random.normal(k[4], (B, 64, 128, 128),
                                           jnp.float32) * 0.5
    noise = jax.random.normal(k[5], (B, 64), jnp.float32)

    to_nhwc = lambda t: jnp.transpose(t, (0, 2, 3, 1))
    P = init_params(seed=0)

    out128, out64, out32, fc2 = global_pathway(
        P,
        to_nhwc(img128_nchw), to_nhwc(img64_nchw), to_nhwc(img32_nchw),
        to_nhwc(local_predict_nchw), to_nhwc(local_feature_nchw), noise)

    out128 = jax.block_until_ready(out128)
    out64 = jax.block_until_ready(out64)
    out32 = jax.block_until_ready(out32)
    fc2 = jax.block_until_ready(fc2)

    assert out128.shape == (B, 128, 128, 3)
    assert out64.shape == (B, 64, 64, 3)
    assert out32.shape == (B, 32, 32, 3)
    assert fc2.shape == (B, 256)
    assert bool(jnp.all(jnp.isfinite(out128)))
    assert bool(jnp.all(jnp.isfinite(out64)))
    assert bool(jnp.all(jnp.isfinite(out32)))
    print("KERNEL_OK")
</pallas_src>

<mosaic_0001>
module attributes {stable_mosaic.version = 11 : i64} {
  func.func @_mm_kernel(%arg0: i32, %arg1: i32, %arg2: memref<1024x147xbf16, #tpu.memory_space<vmem>>, %arg3: memref<147x64xbf16, #tpu.memory_space<vmem>>, %arg4: memref<1x64xf32, #tpu.memory_space<vmem>>, %arg5: memref<1024x64xbf16, #tpu.memory_space<vmem>>, %arg6: memref<1024x64xf32, #tpu.memory_space<vmem>>) attributes {dimension_semantics = [#tpu.dimension_semantics<parallel>, #tpu.dimension_semantics<arbitrary>], iteration_bounds = array<i64: 16, 1>, scalar_prefetch = 0 : i64, scratch_operands = 1 : i64, tpu.core_type = #tpu.core_type<tc>, window_params = [{transform_indices = @transform_0, window_bounds = array<i64: 1024, 147>}, {transform_indices = @transform_1, window_bounds = array<i64: 147, 64>}, {pipeline_mode = #tpu.pipeline_mode<synchronous>, transform_indices = @transform_2, window_bounds = array<i64: 1, 64>}, {transform_indices = @transform_3, window_bounds = array<i64: 1024, 64>}]} {
    %c0_i32 = arith.constant 0 : i32
    %0 = arith.cmpi eq, %arg1, %c0_i32 : i32
    %1 = arith.extui %0 : i1 to i32
    %c0_i32_0 = arith.constant 0 : i32
    %2 = arith.cmpi ne, %1, %c0_i32_0 : i32
    scf.if %2 {
      %cst_10 = arith.constant 0.000000e+00 : f32
      %12 = vector.broadcast %cst_10 : f32 to vector<1024x64xf32>
      %c0_11 = arith.constant 0 : index
      %c0_12 = arith.constant 0 : index
      %13 = vector.load %arg6[%c0_11, %c0_12] : memref<1024x64xf32, #tpu.memory_space<vmem>>, vector<1024x64xf32>
      tpu.vector_store %arg6[%c0_11, %c0_12], %12 {strides = array<i32>} : memref<1024x64xf32, #tpu.memory_space<vmem>>, vector<1024x64xf32>,
    } else {
    }
    %c0 = arith.constant 0 : index
    %c0_1 = arith.constant 0 : index
    %3 = vector.load %arg6[%c0, %c0_1] : memref<1024x64xf32, #tpu.memory_space<vmem>>, vector<1024x64xf32>
    %c0_2 = arith.constant 0 : index
    %c0_3 = arith.constant 0 : index
    %4 = vector.load %arg2[%c0_2, %c0_3] : memref<1024x147xbf16, #tpu.memory_space<vmem>>, vector<1024x147xbf16>
    %c0_4 = arith.constant 0 : index
    %c0_5 = arith.constant 0 : index
    %5 = vector.load %arg3[%c0_4, %c0_5] : memref<147x64xbf16, #tpu.memory_space<vmem>>, vector<147x64xbf16>
    %cst = arith.constant dense<0.000000e+00> : vector<1024x64xf32>
    %6 = tpu.matmul %4, %5, %cst {dimension_numbers = #tpu.dot_dimension_numbers<[1], [0], [0], [1], [0, 0, 1, 1], [], []>} : vector<1024x147xbf16>, vector<147x64xbf16>, vector<1024x64xf32> -> vector<1024x64xf32>
    %7 = arith.addf %3, %6 : vector<1024x64xf32>
    %c0_6 = arith.constant 0 : index
    %c0_7 = arith.constant 0 : index
    %8 = vector.load %arg6[%c0_6, %c0_7] : memref<1024x64xf32, #tpu.memory_space<vmem>>, vector<1024x64xf32>
    tpu.vector_store %arg6[%c0_6, %c0_7], %7 {strides = array<i32>} : memref<1024x64xf32, #tpu.memory_space<vmem>>, vector<1024x64xf32>,
    %c0_i32_8 = arith.constant 0 : i32
    %9 = arith.cmpi eq, %arg1, %c0_i32_8 : i32
    %10 = arith.extui %9 : i1 to i32
    %c0_i32_9 = arith.constant 0 : i32
    %11 = arith.cmpi ne, %10, %c0_i32_9 : i32
    scf.if %11 {
      %c0_10 = arith.constant 0 : index
      %c0_11 = arith.constant 0 : index
      %12 = vector.load %arg6[%c0_10, %c0_11] : memref<1024x64xf32, #tpu.memory_space<vmem>>, vector<1024x64xf32>
      %c0_12 = arith.constant 0 : index
      %c0_13 = arith.constant 0 : index
      %13 = vector.load %arg4[%c0_12, %c0_13] : memref<1x64xf32, #tpu.memory_space<vmem>>, vector<1x64xf32>
      %14 = vector.broadcast %13 : vector<1x64xf32> to vector<1024x64xf32>
      %15 = arith.addf %12, %14 : vector<1024x64xf32>
      %cst_14 = arith.constant 0.000000e+00 : f32
      %16 = vector.broadcast %cst_14 : f32 to vector<1024x64xf32>
      %17 = arith.cmpf oge, %15, %16 : vector<1024x64xf32>
      %cst_15 = arith.constant 0.00999999977 : f32
      %18 = vector.broadcast %cst_15 : f32 to vector<1024x64xf32>
      %19 = arith.mulf %18, %15 : vector<1024x64xf32>
      %20 = arith.select %17, %15, %19 : vector<1024x64xi1>, vector<1024x64xf32>
      %21 = arith.truncf %20 : vector<1024x64xf32> to vector<1024x64xbf16>
      %c0_16 = arith.constant 0 : index
      %c0_17 = arith.constant 0 : index
      %22 = vector.load %arg5[%c0_16, %c0_17] : memref<1024x64xbf16, #tpu.memory_space<vmem>>, vector<1024x64xbf16>
      tpu.vector_store %arg5[%c0_16, %c0_17], %21 {strides = array<i32>} : memref<1024x64xbf16, #tpu.memory_space<vmem>>, vector<1024x64xbf16>,
    } else {
    }
    return
  }
  func.func @transform_0(%arg0: i32, %arg1: i32) -> (i32, i32) {
    %c0_i32 = arith.constant 0 : i32
    return %arg0, %arg1 : i32, i32
  }
  func.func @transform_1(%arg0: i32, %arg1: i32) -> (i32, i32) {
    %c0_i32 = arith.constant 0 : i32
    %c0_i32_0 = arith.constant 0 : i32
    return %arg1, %c0_i32 : i32, i32
  }
  func.func @transform_2(%arg0: i32, %arg1: i32) -> (i32, i32) {
    %c0_i32 = arith.constant 0 : i32
    %c0_i32_0 = arith.constant 0 : i32
    %c0_i32_1 = arith.constant 0 : i32
    return %c0_i32, %c0_i32_0 : i32, i32
  }
  func.func @transform_3(%arg0: i32, %arg1: i32) -> (i32, i32) {
    %c0_i32 = arith.constant 0 : i32
    %c0_i32_0 = arith.constant 0 : i32
    return %arg0, %c0_i32 : i32, i32
  }
}

</mosaic_0001>

<bundles_post_ra>
// kernel: tpu_custom_call.1
= control target key start
LH: loop header
LB: loop body
LE: loop exit
PB: predicated region body
PF: predicated region fallthrough
CT: control target
= control target key end

     0   :  { %s4419_s12 = smov 0   ;;  %s4421_s13 = smov 0   ;;  %s5485_s0 = inlined_call_operand.vmem [shape: bf16[16384,147], index: 0, kind: input, shape index: {}]   ;;  %s5486_s1 = inlined_call_operand.vmem [shape: bf16[147,64], index: 1, kind: input, shape index: {}]   ;;  %s5487_s2 = inlined_call_operand.vmem [shape: f32[1,64], index: 2, kind: input, shape index: {}]   ;;  %s5488_s3 = inlined_call_operand.vmem [shape: bf16[16384,64], index: 3, kind: output, shape index: {}]  }
   0x1   :  { %s4423_s14 = smov 0  }
   0x2 LB: > { %s25_s15 = sadd.s32 1, %s4390_s13  ;;  %p3653_p0 = scmp.ge.s32.totalorder %s4394_s14, 1  ;;  %s4394_s14 = sphi %s4423_s14, %s13_s14   ;;  %s4390_s13 = sphi %s4421_s13, %s5490_s13   ;;  %s4386_s12 = sphi %s4419_s12, %s5489_s12  }
   0x3   : > { %p27_p1 = scmp.ge.s32.totalorder %s25_s15, 16  ;;  %p169_p2 = scmp.lt.s32.totalorder %s4394_s14, 17 }
   0x5   : > { %s5492_s15 = smov (%p27_p1, %s25_s15), 0  ;;  %p170_p3 = pnand %p3653_p0, %p169_p2 }
   0x6   : > { %v4168_v0 = vld [vmem:[%s5486_s1] sm:$0xff] (!%p170_p3)   ;;  %v4396_v1 = vmov (!%p170_p3), 0   ;;  %v4169_v2 = vld [vmem:[%s5486_s1 + $0x8] sm:$0xff] (!%p170_p3)   ;;  %v4170_v3 = vld [vmem:[%s5486_s1 + $0x10] sm:$0xff] (!%p170_p3)   ;;  %s3654_s22 = sshll.u32 (!%p170_p3), %s4386_s12, 7  ;;  %vm1269_vm0 = vcmask (!%p170_p3), 154624  }
   0x7   : > { %173 = sbr.rel (%p170_p3) target bundleno = 531 (0x213), region = 32  ;;  %1469 = vmatprep.subr.bf16.mxu0 (!%p170_p3), %v4396_v1  ;;  %4121 = vmatprep.subr.bf16.mxu1 (!%p170_p3), %v4396_v1  ;;  %p205_p4 = scmp.lt.s32.totalorder (!%p170_p3), %s3654_s22, 2047  ;;  %v4171_v4 = vld [vmem:[%s5486_s1 + $0x18] sm:$0xff] (!%p170_p3)   ;;  %v4172_v5 = vld [vmem:[%s5486_s1 + $0x20] sm:$0xff] (!%p170_p3)   ;;  %v4173_v8 = vld [vmem:[%s5486_s1 + $0x28] sm:$0xff] (!%p170_p3)   ;;  %vm1462_vm1 = vcmask (!%p170_p3), 1040384  }
   0x8   : > { %1470 = vmatpush1.bf16.msra.mxu0 (!%p170_p3), %v4168_v0  ;;  %4131 = vmatpush1.bf16.msra.mxu1 (!%p170_p3), %v4168_v0  ;;  %v4174_v9 = vld [vmem:[%s5486_s1 + $0x30] sm:$0xff] (!%p170_p3)   ;;  %v4175_v10 = vld [vmem:[%s5486_s1 + $0x38] sm:$0xff] (!%p170_p3)   ;;  %vm1463_vm2 = vcmask (!%p170_p3), 1041408   ;;  %v4397_v11 = vmov (!%p170_p3), 65535   ;;  %v4176_v13 = vld [vmem:[%s5486_s1 + $0x40] sm:$0xff] (!%p170_p3)   ;;  %vm232_vm3 = vcmask (!%p170_p3), 523264  }
   0x9   : > { %1471 = vmatprep.subr.bf16.mxu0 (!%p170_p3), %v4396_v1  ;;  %4122 = vmatprep.subr.bf16.mxu1 (!%p170_p3), %v4396_v1  ;;  %v1464_v12 = vsel (!%p170_p3), %vm1462_vm1, 4294967295, %v4397_v11  ;;  %v4177_v14 = vld [vmem:[%s5486_s1 + $0x48] ss:$0 sps:$4 sm:$0x33] (!%p170_p3)   ;;  %v4398_v59 = vmov (!%p170_p3), 0.0   ;;  %vm3433_vm6 = vcmask (!%p170_p3), 519168  }
   0xa   : > { %v1465_v15 = vsel (!%p170_p3), %vm1463_vm2, %v1464_v12, 0  ;;  %233 = vst.msk [vmem:[#allocation2] sm:$0xff] (!%p170_p3), %vm232_vm3, %v4398_v59  ;;  %234 = vst.msk [vmem:[#allocation2 + $0x8] sm:$0xff] (!%p170_p3), %vm232_vm3, %v4398_v59 }
   0xb   : > { %v1467_v16 = vand.u32 (!%p170_p3), %v4177_v14, %v1465_v15  ;;  %235 = vst.msk [vmem:[#allocation2 + $0x10] sm:$0xff] (!%p170_p3), %vm232_vm3, %v4398_v59  ;;  %236 = vst.msk [vmem:[#allocation2 + $0x18] sm:$0xff] (!%p170_p3), %vm232_vm3, %v4398_v59 }
   0xc   : > { %1472 = vmatpush1.bf16.msra.mxu0 (!%p170_p3), %v4169_v2  ;;  %4132 = vmatpush1.bf16.msra.mxu1 (!%p170_p3), %v4169_v2  ;;  %237 = vst.msk [vmem:[#allocation2 + $0x20] sm:$0xff] (!%p170_p3), %vm232_vm3, %v4398_v59  ;;  %238 = vst.msk [vmem:[#allocation2 + $0x28] sm:$0xff] (!%p170_p3), %vm232_vm3, %v4398_v59 }
   0xd   : > { %1473 = vmatprep.subr.bf16.mxu0 (!%p170_p3), %v4396_v1  ;;  %4123 = vmatprep.subr.bf16.mxu1 (!%p170_p3), %v4396_v1  ;;  %239 = vst.msk [vmem:[#allocation2 + $0x30] sm:$0xff] (!%p170_p3), %vm232_vm3, %v4398_v59  ;;  %240 = vst.msk [vmem:[#allocation2 + $0x38] sm:$0xff] (!%p170_p3), %vm232_vm3, %v4398_v59 }
   0xe   : > { %s5494_s22 = smov (!%p205_p4, %s3654_s22), 2047  ;;  %241 = vst.msk [vmem:[#allocation2 + $0x40] sm:$0xff] %vm232_vm3, %v4398_v59  ;;  %242 = vst.msk [vmem:[#allocation2 + $0x48] sm:$0xff] %vm232_vm3, %v4398_v59 }
   0xf   : > { %s3992_s25 = sshll.u32 %s5494_s22, 3  ;;  %243 = vst.msk [vmem:[#allocation2 + $0x50] sm:$0xff] %vm232_vm3, %v4398_v59  ;;  %244 = vst.msk [vmem:[#allocation2 + $0x58] sm:$0xff] %vm232_vm3, %v4398_v59  ;;  %s3658_s19 = sshll.u32 %s5494_s22, 2 }
  0x10   : > { %1474 = vmatpush1.bf16.msra.mxu0 %v4170_v3  ;;  %4133 = vmatpush1.bf16.msra.mxu1 %v4170_v3  ;;  %s4455_s28 = scalar_lea.vmem %s5485_s0, %s3992_s25  ;;  %245 = vst.msk [vmem:[#allocation2 + $0x60] sm:$0xff] %vm232_vm3, %v4398_v59  ;;  %246 = vst.msk [vmem:[#allocation2 + $0x68] sm:$0xff] %vm232_vm3, %v4398_v59  ;;  %s4936_s22 = scalar_lea.vmem %s5488_s3, %s3658_s19 }
  0x11   : > { %1475 = vmatprep.subr.bf16.mxu0 %v4396_v1  ;;  %4124 = vmatprep.subr.bf16.mxu1 %v4396_v1  ;;  %v4180_v6 = vld [vmem:[%s4455_s28 + $0x4] ss:$8 sps:$4 sm:$0xff]   ;;  %v4178_v17 = vld [vmem:[%s4455_s28] ss:$8 sps:$4 sm:$0xff]   ;;  %v4184_v19 = vld [vmem:[%s4455_s28 + $0x14] ss:$8 sps:$4 sm:$0xff]  }
  0x12   : > { %v4183_v7 = vld [vmem:[%s4455_s28 + $0x204] ss:$8 sps:$4 sm:$0xff]   ;;  %3797 = vmatprep.mubr.msk.bf16.mxu0 %vm1269_vm0, %v4180_v6  ;;  %v4181_v18 = vld [vmem:[%s4455_s28 + $0x200] ss:$8 sps:$4 sm:$0xff]   ;;  %v4186_v20 = vld [vmem:[%s4455_s28 + $0x214] ss:$8 sps:$4 sm:$0xff]  }
  0x13   : > { %3829 = vmatprep.mubr.msk.bf16.mxu1 %vm1269_vm0, %v4183_v7  ;;  %v4188_v21 = vld [vmem:[%s4455_s28 + $0x10] ss:$8 sps:$4 sm:$0xff]   ;;  %v4190_v23 = vld [vmem:[%s4455_s28 + $0x24] ss:$8 sps:$4 sm:$0xff]   ;;  %v4194_v25 = vld [vmem:[%s4455_s28 + $0x20] ss:$8 sps:$4 sm:$0xff]  }
  0x14   : > { %1476 = vmatpush1.bf16.msra.mxu0 %v4171_v4  ;;  %4134 = vmatpush1.bf16.msra.mxu1 %v4171_v4  ;;  %v4189_v22 = vld [vmem:[%s4455_s28 + $0x210] ss:$8 sps:$4 sm:$0xff]   ;;  %v4192_v24 = vld [vmem:[%s4455_s28 + $0x224] ss:$8 sps:$4 sm:$0xff]   ;;  %v4195_v26 = vld [vmem:[%s4455_s28 + $0x220] ss:$8 sps:$4 sm:$0xff]  }
  0x15   : > { %1477 = vmatprep.subr.bf16.mxu0 %v4396_v1  ;;  %4125 = vmatprep.subr.bf16.mxu1 %v4396_v1  ;;  %v4196_v27 = vld [vmem:[%s4455_s28 + $0x34] ss:$8 sps:$4 sm:$0xff]   ;;  %v4200_v29 = vld [vmem:[%s4455_s28 + $0x30] ss:$8 sps:$4 sm:$0xff]   ;;  %v4202_v31 = vld [vmem:[%s4455_s28 + $0x44] ss:$8 sps:$4 sm:$0xff]  }
  0x16   : > { %v4198_v28 = vld [vmem:[%s4455_s28 + $0x234] ss:$8 sps:$4 sm:$0xff]   ;;  %v4201_v30 = vld [vmem:[%s4455_s28 + $0x230] ss:$8 sps:$4 sm:$0xff]   ;;  %v4204_v32 = vld [vmem:[%s4455_s28 + $0x244] ss:$8 sps:$4 sm:$0xff]  }
  0x17   : > { %v4206_v33 = vld [vmem:[%s4455_s28 + $0x40] ss:$8 sps:$4 sm:$0xff]   ;;  %v4208_v35 = vld [vmem:[%s4455_s28 + $0x54] ss:$8 sps:$4 sm:$0xff]   ;;  %v4212_v37 = vld [vmem:[%s4455_s28 + $0x50] ss:$8 sps:$4 sm:$0xff]  }
  0x18   : > { %1478 = vmatpush1.bf16.msra.mxu0 %v4172_v5  ;;  %4135 = vmatpush1.bf16.msra.mxu1 %v4172_v5  ;;  %v4207_v34 = vld [vmem:[%s4455_s28 + $0x240] ss:$8 sps:$4 sm:$0xff]   ;;  %v4210_v36 = vld [vmem:[%s4455_s28 + $0x254] ss:$8 sps:$4 sm:$0xff]   ;;  %v4213_v38 = vld [vmem:[%s4455_s28 + $0x250] ss:$8 sps:$4 sm:$0xff]  }
  0x19   : > { %1479 = vmatprep.subr.bf16.mxu0 %v4396_v1  ;;  %4126 = vmatprep.subr.bf16.mxu1 %v4396_v1  ;;  %v4214_v39 = vld [vmem:[%s4455_s28 + $0x64] ss:$8 sps:$4 sm:$0xff]   ;;  %v4218_v41 = vld [vmem:[%s4455_s28 + $0x60] ss:$8 sps:$4 sm:$0xff]   ;;  %v4220_v43 = vld [vmem:[%s4455_s28 + $0x74] ss:$8 sps:$4 sm:$0xff]  }
  0x1a   : > { %v4216_v40 = vld [vmem:[%s4455_s28 + $0x264] ss:$8 sps:$4 sm:$0xff]   ;;  %v4219_v42 = vld [vmem:[%s4455_s28 + $0x260] ss:$8 sps:$4 sm:$0xff]   ;;  %v4222_v44 = vld [vmem:[%s4455_s28 + $0x274] ss:$8 sps:$4 sm:$0xff]  }
  0x1b   : > { %v4224_v45 = vld [vmem:[%s4455_s28 + $0x70] ss:$8 sps:$4 sm:$0xff]   ;;  %v4226_v47 = vld [vmem:[%s4455_s28 + $0x84] ss:$8 sps:$4 sm:$0xff]   ;;  %v4230_v49 = vld [vmem:[%s4455_s28 + $0x80] ss:$8 sps:$4 sm:$0xff]  }
  0x1c   : > { %1480 = vmatpush1.bf16.msra.mxu0 %v4173_v8  ;;  %4136 = vmatpush1.bf16.msra.mxu1 %v4173_v8  ;;  %v4225_v46 = vld [vmem:[%s4455_s28 + $0x270] ss:$8 sps:$4 sm:$0xff]   ;;  %v4228_v48 = vld [vmem:[%s4455_s28 + $0x284] ss:$8 sps:$4 sm:$0xff]   ;;  %v4231_v50 = vld [vmem:[%s4455_s28 + $0x280] ss:$8 sps:$4 sm:$0xff]  }
  0x1d   : > { %1481 = vmatprep.subr.bf16.mxu0 %v4396_v1  ;;  %4127 = vmatprep.subr.bf16.mxu1 %v4396_v1  ;;  %v4232_v51 = vld [vmem:[%s4455_s28 + $0x94] ss:$8 sps:$4 sm:$0xff]   ;;  %v4236_v53 = vld [vmem:[%s4455_s28 + $0x90] ss:$8 sps:$4 sm:$0xff]   ;;  %v4238_v55 = vld [vmem:[%s4455_s28 + $0xa4] ss:$8 sps:$4 sm:$0xff]  }
  0x1e   : > { %v4234_v52 = vld [vmem:[%s4455_s28 + $0x294] ss:$8 sps:$4 sm:$0xff]   ;;  %v4237_v54 = vld [vmem:[%s4455_s28 + $0x290] ss:$8 sps:$4 sm:$0xff]   ;;  %v4240_v56 = vld [vmem:[%s4455_s28 + $0x2a4] ss:$8 sps:$4 sm:$0xff]  }
  0x1f   : > { %v4540_v57 = vld [vmem:[%s4455_s28 + $0xa0] ss:$8 sps:$4 sm:$0xff]   ;;  %247 = vst.msk [vmem:[#allocation2 + $0x70] sm:$0xff] %vm232_vm3, %v4398_v59  ;;  %248 = vst.msk [vmem:[#allocation2 + $0x78] sm:$0xff] %vm232_vm3, %v4398_v59  ;;  %v4244_v60 = vld [vmem:[%s4455_s28 + $0xb4] ss:$8 sps:$4 sm:$0xff]  }
  0x20   : > { %1482 = vmatpush1.bf16.msra.mxu0 %v4174_v9  ;;  %4137 = vmatpush1.bf16.msra.mxu1 %v4174_v9  ;;  %v4543_v58 = vld [vmem:[%s4455_s28 + $0x2a0] ss:$8 sps:$4 sm:$0xff]   ;;  %249 = vst.msk [vmem:[#allocation2 + $0x80] sm:$0xff] %vm232_vm3, %v4398_v59  ;;  %250 = vst.msk [vmem:[#allocation2 + $0x88] sm:$0xff] %vm232_vm3, %v4398_v59  ;;  %v4246_v61 = vld [vmem:[%s4455_s28 + $0x2b4] ss:$8 sps:$4 sm:$0xff]  }
  0x21   : > { %1483 = vmatprep.subr.bf16.mxu0 %v4396_v1  ;;  %4128 = vmatprep.subr.bf16.mxu1 %v4396_v1  ;;  %251 = vst.msk [vmem:[#allocation2 + $0x90] sm:$0xff] %vm232_vm3, %v4398_v59  ;;  %252 = vst.msk [vmem:[#allocation2 + $0x98] sm:$0xff] %vm232_vm3, %v4398_v59  ;;  %v4248_v62 = vld [vmem:[%s4455_s28 + $0xb0] ss:$8 sps:$4 sm:$0xff]   ;;  %v4250_v0 = vld [vmem:[%s4455_s28 + $0xc4] ss:$8 sps:$4 sm:$0xff]  }
  0x22   : > { %253 = vst.msk [vmem:[#allocation2 + $0xa0] sm:$0xff] %vm232_vm3, %v4398_v59  ;;  %254 = vst.msk [vmem:[#allocation2 + $0xa8] sm:$0xff] %vm232_vm3, %v4398_v59  ;;  %v4249_v63 = vld [vmem:[%s4455_s28 + $0x2b0] ss:$8 sps:$4 sm:$0xff]   ;;  %v4254_v2 = vld [vmem:[%s4455_s28 + $0xc0] ss:$8 sps:$4 sm:$0xff]  }
  0x23   : > { %255 = vst.msk [vmem:[#allocation2 + $0xb0] sm:$0xff] %vm232_vm3, %v4398_v59  ;;  %256 = vst.msk [vmem:[#allocation2 + $0xb8] sm:$0xff] %vm232_vm3, %v4398_v59  ;;  %v4255_v3 = vld [vmem:[%s4455_s28 + $0x2c0] ss:$8 sps:$4 sm:$0xff]   ;;  %v4256_v4 = vld [vmem:[%s4455_s28 + $0xd4] ss:$8 sps:$4 sm:$0xff]  }
  0x24   : > { %1484 = vmatpush1.bf16.msra.mxu0 %v4175_v10  ;;  %4138 = vmatpush1.bf16.msra.mxu1 %v4175_v10  ;;  %257 = vst.msk [vmem:[#allocation2 + $0xc0] sm:$0xff] %vm232_vm3, %v4398_v59  ;;  %258 = vst.msk [vmem:[#allocation2 + $0xc8] sm:$0xff] %vm232_vm3, %v4398_v59  ;;  %v4258_v5 = vld [vmem:[%s4455_s28 + $0x2d4] ss:$8 sps:$4 sm:$0xff]   ;;  %v4260_v6 = vld [vmem:[%s4455_s28 + $0xd0] ss:$8 sps:$4 sm:$0xff]  }
  0x25   : > { %1485 = vmatprep.subr.bf16.mxu0 %v4396_v1  ;;  %4129 = vmatprep.subr.bf16.mxu1 %v4396_v1  ;;  %259 = vst.msk [vmem:[#allocation2 + $0xd0] sm:$0xff] %vm232_vm3, %v4398_v59  ;;  %260 = vst.msk [vmem:[#allocation2 + $0xd8] sm:$0xff] %vm232_vm3, %v4398_v59  ;;  %v4261_v7 = vld [vmem:[%s4455_s28 + $0x2d0] ss:$8 sps:$4 sm:$0xff]   ;;  %v4262_v8 = vld [vmem:[%s4455_s28 + $0xe4] ss:$8 sps:$4 sm:$0xff]  }
  0x26   : > { %261 = vst.msk [vmem:[#allocation2 + $0xe0] sm:$0xff] %vm232_vm3, %v4398_v59  ;;  %262 = vst.msk [vmem:[#allocation2 + $0xe8] sm:$0xff] %vm232_vm3, %v4398_v59  ;;  %v4264_v9 = vld [vmem:[%s4455_s28 + $0x2e4] ss:$8 sps:$4 sm:$0xff]   ;;  %v4266_v10 = vld [vmem:[%s4455_s28 + $0xe0] ss:$8 sps:$4 sm:$0xff]  }
  0x27   : > { %263 = vst.msk [vmem:[#allocation2 + $0xf0] sm:$0xff] %vm232_vm3, %v4398_v59  ;;  %264 = vst.msk [vmem:[#allocation2 + $0xf8] sm:$0xff] %vm232_vm3, %v4398_v59  ;;  %v4267_v11 = vld [vmem:[%s4455_s28 + $0x2e0] ss:$8 sps:$4 sm:$0xff]   ;;  %v4268_v12 = vld [vmem:[%s4455_s28 + $0xf4] ss:$8 sps:$4 sm:$0xff]  }
  0x28   : > { %1486 = vmatpush1.bf16.msra.mxu0 %v4176_v13  ;;  %4139 = vmatpush1.bf16.msra.mxu1 %v4176_v13  ;;  %265 = vst.msk [vmem:[#allocation2 + $0x100] sm:$0xff] %vm232_vm3, %v4398_v59  ;;  %266 = vst.msk [vmem:[#allocation2 + $0x108] sm:$0xff] %vm232_vm3, %v4398_v59  ;;  %v4270_v13 = vld [vmem:[%s4455_s28 + $0x2f4] ss:$8 sps:$4 sm:$0xff]   ;;  %v4272_v14 = vld [vmem:[%s4455_s28 + $0xf0] ss:$8 sps:$4 sm:$0xff]  }
  0x29   : > { %1487 = vmatprep.subr.bf16.mxu0 %v4396_v1  ;;  %4130 = vmatprep.subr.bf16.mxu1 %v4396_v1  ;;  %267 = vst.msk [vmem:[#allocation2 + $0x110] sm:$0xff] %vm232_vm3, %v4398_v59  ;;  %268 = vst.msk [vmem:[#allocation2 + $0x118] sm:$0xff] %vm232_vm3, %v4398_v59  ;;  %v4252_v1 = vld [vmem:[%s4455_s28 + $0x2c4] ss:$8 sps:$4 sm:$0xff]   ;;  %v4273_v15 = vld [vmem:[%s4455_s28 + $0x2f0] ss:$8 sps:$4 sm:$0xff]  }
  0x2a   : > { %269 = vst.msk [vmem:[#allocation2 + $0x120] sm:$0xff] %vm232_vm3, %v4398_v59  ;;  %270 = vst.msk [vmem:[#allocation2 + $0x128] sm:$0xff] %vm232_vm3, %v4398_v59 }
  0x2b   : > { %271 = vst.msk [vmem:[#allocation2 + $0x130] sm:$0xff] %vm232_vm3, %v4398_v59  ;;  %272 = vst.msk [vmem:[#allocation2 + $0x138] sm:$0xff] %vm232_vm3, %v4398_v59 }
  0x2c   : > { %1488 = vmatpush1.bf16.msra.mxu0 %v1467_v16  ;;  %4140 = vmatpush1.bf16.msra.mxu1 %v1467_v16  ;;  %273 = vst.msk [vmem:[#allocation2 + $0x140] sm:$0xff] %vm232_vm3, %v4398_v59  ;;  %274 = vst.msk [vmem:[#allocation2 + $0x148] sm:$0xff] %vm232_vm3, %v4398_v59  ;;  %v4274_v16 = vld [vmem:[%s4455_s28 + $0x104] ss:$8 sps:$4 sm:$0xff]  }
  0x2d   : > { %275 = vst.msk [vmem:[#allocation2 + $0x150] sm:$0xff] %vm232_vm3, %v4398_v59  ;;  %276 = vst.msk [vmem:[#allocation2 + $0x158] sm:$0xff] %vm232_vm3, %v4398_v59 }
  0x2e   : > { %277 = vst.msk [vmem:[#allocation2 + $0x160] sm:$0xff] %vm232_vm3, %v4398_v59  ;;  %278 = vst.msk [vmem:[#allocation2 + $0x168] sm:$0xff] %vm232_vm3, %v4398_v59 }
  0x2f   : > { %1502 = vmatmul.mubr.bf16.vlgmr.msra.gmra.mrb[0].mxu0 %v4178_v17  ;;  %1758 = vmatmul.mubr.bf16.vlgmr.msra.gmra.mrb[0].mxu1 %v4181_v18  ;;  %279 = vst.msk [vmem:[#allocation2 + $0x170] sm:$0xff] %vm232_vm3, %v4398_v59  ;;  %280 = vst.msk [vmem:[#allocation2 + $0x178] sm:$0xff] %vm232_vm3, %v4398_v59  ;;  %v4276_v17 = vld [vmem:[%s4455_s28 + $0x304] ss:$8 sps:$4 sm:$0xff]   ;;  %v4278_v18 = vld [vmem:[%s4455_s28 + $0x100] ss:$8 sps:$4 sm:$0xff]  }
  0x30   : > { %3798 = vmatprep.mubr.msk.bf16.mxu0 %vm1269_vm0, %v4184_v19  ;;  %3830 = vmatprep.mubr.msk.bf16.mxu1 %vm1269_vm0, %v4186_v20  ;;  %281 = vst.msk [vmem:[#allocation2 + $0x180] sm:$0xff] %vm232_vm3, %v4398_v59  ;;  %282 = vst.msk [vmem:[#allocation2 + $0x188] sm:$0xff] %vm232_vm3, %v4398_v59  ;;  %v4279_v19 = vld [vmem:[%s4455_s28 + $0x300] ss:$8 sps:$4 sm:$0xff]   ;;  %v4280_v20 = vld [vmem:[%s4455_s28 + $0x114] ss:$8 sps:$4 sm:$0xff]  }
  0x31   : > { %283 = vst.msk [vmem:[#allocation2 + $0x190] sm:$0xff] %vm232_vm3, %v4398_v59  ;;  %284 = vst.msk [vmem:[#allocation2 + $0x198] sm:$0xff] %vm232_vm3, %v4398_v59 }
  0x32   : > { %285 = vst.msk [vmem:[#allocation2 + $0x1a0] sm:$0xff] %vm232_vm3, %v4398_v59  ;;  %286 = vst.msk [vmem:[#allocation2 + $0x1a8] sm:$0xff] %vm232_vm3, %v4398_v59 }
  0x33   : > { %287 = vst.msk [vmem:[#allocation2 + $0x1b0] sm:$0xff] %vm232_vm3, %v4398_v59  ;;  %288 = vst.msk [vmem:[#allocation2 + $0x1b8] sm:$0xff] %vm232_vm3, %v4398_v59 }
  0x34   : > { %289 = vst.msk [vmem:[#allocation2 + $0x1c0] sm:$0xff] %vm232_vm3, %v4398_v59  ;;  %290 = vst.msk [vmem:[#allocation2 + $0x1c8] sm:$0xff] %vm232_vm3, %v4398_v59 }
  0x35   : > { %291 = vst.msk [vmem:[#allocation2 + $0x1d0] sm:$0xff] %vm232_vm3, %v4398_v59  ;;  %292 = vst.msk [vmem:[#allocation2 + $0x1d8] sm:$0xff] %vm232_vm3, %v4398_v59 }
  0x36   : > { %293 = vst.msk [vmem:[#allocation2 + $0x1e0] sm:$0xff] %vm232_vm3, %v4398_v59  ;;  %294 = vst.msk [vmem:[#allocation2 + $0x1e8] sm:$0xff] %vm232_vm3, %v4398_v59 }
  0x37   : > { %1510 = vmatmul.mubr.bf16.gmra.mrb[4].mxu0 %v4188_v21  ;;  %1766 = vmatmul.mubr.bf16.gmra.mrb[4].mxu1 %v4189_v22  ;;  %295 = vst.msk [vmem:[#allocation2 + $0x1f0] sm:$0xff] %vm232_vm3, %v4398_v59  ;;  %296 = vst.msk [vmem:[#allocation2 + $0x1f8] sm:$0xff] %vm232_vm3, %v4398_v59  ;;  %v4282_v21 = vld [vmem:[%s4455_s28 + $0x314] ss:$8 sps:$4 sm:$0xff]   ;;  %v4284_v22 = vld [vmem:[%s4455_s28 + $0x110] ss:$8 sps:$4 sm:$0xff]  }
  0x38   : > { %3799 = vmatprep.mubr.msk.bf16.mxu0 %vm1269_vm0, %v4190_v23  ;;  %3831 = vmatprep.mubr.msk.bf16.mxu1 %vm1269_vm0, %v4192_v24  ;;  %297 = vst.msk [vmem:[#allocation2 + $0x200] sm:$0xff] %vm232_vm3, %v4398_v59  ;;  %298 = vst.msk [vmem:[#allocation2 + $0x208] sm:$0xff] %vm232_vm3, %v4398_v59  ;;  %v4285_v23 = vld [vmem:[%s4455_s28 + $0x310] ss:$8 sps:$4 sm:$0xff]   ;;  %v4286_v24 = vld [vmem:[%s4455_s28 + $0x124] ss:$8 sps:$4 sm:$0xff]  }
  0x39   : > { %299 = vst.msk [vmem:[#allocation2 + $0x210] sm:$0xff] %vm232_vm3, %v4398_v59  ;;  %300 = vst.msk [vmem:[#allocation2 + $0x218] sm:$0xff] %vm232_vm3, %v4398_v59 }
  0x3a   : > { %301 = vst.msk [vmem:[#allocation2 + $0x220] sm:$0xff] %vm232_vm3, %v4398_v59  ;;  %302 = vst.msk [vmem:[#allocation2 + $0x228] sm:$0xff] %vm232_vm3, %v4398_v59 }
  0x3b   : > { %303 = vst.msk [vmem:[#allocation2 + $0x230] sm:$0xff] %vm232_vm3, %v4398_v59  ;;  %304 = vst.msk [vmem:[#allocation2 + $0x238] sm:$0xff] %vm232_vm3, %v4398_v59 }
  0x3c   : > { %305 = vst.msk [vmem:[#allocation2 + $0x240] sm:$0xff] %vm232_vm3, %v4398_v59  ;;  %306 = vst.msk [vmem:[#allocation2 + $0x248] sm:$0xff] %vm232_vm3, %v4398_v59 }
  0x3d   : > { %307 = vst.msk [vmem:[#allocation2 + $0x250] sm:$0xff] %vm232_vm3, %v4398_v59  ;;  %308 = vst.msk [vmem:[#allocation2 + $0x258] sm:$0xff] %vm232_vm3, %v4398_v59 }
  0x3e   : > { %309 = vst.msk [vmem:[#allocation2 + $0x260] sm:$0xff] %vm232_vm3, %v4398_v59  ;;  %310 = vst.msk [vmem:[#allocation2 + $0x268] sm:$0xff] %vm232_vm3, %v4398_v59 }
  0x3f   : > { %1518 = vmatmul.mubr.bf16.gmra.mrb[8].mxu0 %v4194_v25  ;;  %1774 = vmatmul.mubr.bf16.gmra.mrb[8].mxu1 %v4195_v26  ;;  %311 = vst.msk [vmem:[#allocation2 + $0x270] sm:$0xff] %vm232_vm3, %v4398_v59  ;;  %312 = vst.msk [vmem:[#allocation2 + $0x278] sm:$0xff] %vm232_vm3, %v4398_v59  ;;  %v4288_v25 = vld [vmem:[%s4455_s28 + $0x324] ss:$8 sps:$4 sm:$0xff]   ;;  %v4290_v26 = vld [vmem:[%s4455_s28 + $0x120] ss:$8 sps:$4 sm:$0xff]  }
  0x40   : > { %3800 = vmatprep.mubr.msk.bf16.mxu0 %vm1269_vm0, %v4196_v27  ;;  %3832 = vmatprep.mubr.msk.bf16.mxu1 %vm1269_vm0, %v4198_v28  ;;  %313 = vst.msk [vmem:[#allocation2 + $0x280] sm:$0xff] %vm232_vm3, %v4398_v59  ;;  %314 = vst.msk [vmem:[#allocation2 + $0x288] sm:$0xff] %vm232_vm3, %v4398_v59  ;;  %v4291_v27 = vld [vmem:[%s4455_s28 + $0x320] ss:$8 sps:$4 sm:$0xff]   ;;  %v4292_v28 = vld [vmem:[%s4455_s28 + $0x134] ss:$8 sps:$4 sm:$0xff]  }
  0x41   : > { %315 = vst.msk [vmem:[#allocation2 + $0x290] sm:$0xff] %vm232_vm3, %v4398_v59  ;;  %316 = vst.msk [vmem:[#allocation2 + $0x298] sm:$0xff] %vm232_vm3, %v4398_v59 }
  0x42   : > { %317 = vst.msk [vmem:[#allocation2 + $0x2a0] sm:$0xff] %vm232_vm3, %v4398_v59  ;;  %318 = vst.msk [vmem:[#allocation2 + $0x2a8] sm:$0xff] %vm232_vm3, %v4398_v59 }
  0x43   : > { %319 = vst.msk [vmem:[#allocation2 + $0x2b0] sm:$0xff] %vm232_vm3, %v4398_v59  ;;  %320 = vst.msk [vmem:[#allocation2 + $0x2b8] sm:$0xff] %vm232_vm3, %v4398_v59 }
  0x44   : > { %321 = vst.msk [vmem:[#allocation2 + $0x2c0] sm:$0xff] %vm232_vm3, %v4398_v59  ;;  %322 = vst.msk [vmem:[#allocation2 + $0x2c8] sm:$0xff] %vm232_vm3, %v4398_v59 }
  0x45   : > { %323 = vst.msk [vmem:[#allocation2 + $0x2d0] sm:$0xff] %vm232_vm3, %v4398_v59  ;;  %324 = vst.msk [vmem:[#allocation2 + $0x2d8] sm:$0xff] %vm232_vm3, %v4398_v59 }
  0x46   : > { %325 = vst.msk [vmem:[#allocation2 + $0x2e0] sm:$0xff] %vm232_vm3, %v4398_v59  ;;  %326 = vst.msk [vmem:[#allocation2 + $0x2e8] sm:$0xff] %vm232_vm3, %v4398_v59 }
  0x47   : > { %1526 = vmatmul.mubr.bf16.gmra.mrb[12].mxu0 %v4200_v29  ;;  %1782 = vmatmul.mubr.bf16.gmra.mrb[12].mxu1 %v4201_v30  ;;  %327 = vst.msk [vmem:[#allocation2 + $0x2f0] sm:$0xff] %vm232_vm3, %v4398_v59  ;;  %328 = vst.msk [vmem:[#allocation2 + $0x2f8] sm:$0xff] %vm232_vm3, %v4398_v59  ;;  %v4294_v29 = vld [vmem:[%s4455_s28 + $0x334] ss:$8 sps:$4 sm:$0xff]   ;;  %v4296_v30 = vld [vmem:[%s4455_s28 + $0x130] ss:$8 sps:$4 sm:$0xff]  }
  0x48   : > { %3801 = vmatprep.mubr.msk.bf16.mxu0 %vm1269_vm0, %v4202_v31  ;;  %3833 = vmatprep.mubr.msk.bf16.mxu1 %vm1269_vm0, %v4204_v32  ;;  %329 = vst.msk [vmem:[#allocation2 + $0x300] sm:$0xff] %vm232_vm3, %v4398_v59  ;;  %330 = vst.msk [vmem:[#allocation2 + $0x308] sm:$0xff] %vm232_vm3, %v4398_v59  ;;  %v4297_v31 = vld [vmem:[%s4455_s28 + $0x330] ss:$8 sps:$4 sm:$0xff]   ;;  %v4298_v32 = vld [vmem:[%s4455_s28 + $0x144] ss:$8 sps:$4 sm:$0xff]  }
  0x49   : > { %331 = vst.msk [vmem:[#allocation2 + $0x310] sm:$0xff] %vm232_vm3, %v4398_v59  ;;  %332 = vst.msk [vmem:[#allocation2 + $0x318] sm:$0xff] %vm232_vm3, %v4398_v59 }
  0x4a   : > { %333 = vst.msk [vmem:[#allocation2 + $0x320] sm:$0xff] %vm232_vm3, %v4398_v59  ;;  %334 = vst.msk [vmem:[#allocation2 + $0x328] sm:$0xff] %vm232_vm3, %v4398_v59 }
  0x4b   : > { %335 = vst.msk [vmem:[#allocation2 + $0x330] sm:$0xff] %vm232_vm3, %v4398_v59  ;;  %336 = vst.msk [vmem:[#allocation2 + $0x338] sm:$0xff] %vm232_vm3, %v4398_v59 }
  0x4c   : > { %337 = vst.msk [vmem:[#allocation2 + $0x340] sm:$0xff] %vm232_vm3, %v4398_v59  ;;  %338 = vst.msk [vmem:[#allocation2 + $0x348] sm:$0xff] %vm232_vm3, %v4398_v59 }
  0x4d   : > { %339 = vst.msk [vmem:[#allocation2 + $0x350] sm:$0xff] %vm232_vm3, %v4398_v59  ;;  %340 = vst.msk [vmem:[#allocation2 + $0x358] sm:$0xff] %vm232_vm3, %v4398_v59 }
  0x4e   : > { %341 = vst.msk [vmem:[#allocation2 + $0x360] sm:$0xff] %vm232_vm3, %v4398_v59  ;;  %342 = vst.msk [vmem:[#allocation2 + $0x368] sm:$0xff] %vm232_vm3, %v4398_v59 }
  0x4f   : > { %1534 = vmatmul.mubr.bf16.gmra.mrb[16].mxu0 %v4206_v33  ;;  %1790 = vmatmul.mubr.bf16.gmra.mrb[16].mxu1 %v4207_v34  ;;  %343 = vst.msk [vmem:[#allocation2 + $0x370] sm:$0xff] %vm232_vm3, %v4398_v59  ;;  %344 = vst.msk [vmem:[#allocation2 + $0x378] sm:$0xff] %vm232_vm3, %v4398_v59  ;;  %v4300_v33 = vld [vmem:[%s4455_s28 + $0x344] ss:$8 sps:$4 sm:$0xff]   ;;  %v4302_v34 = vld [vmem:[%s4455_s28 + $0x140] ss:$8 sps:$4 sm:$0xff]  }
  0x50   : > { %3802 = vmatprep.mubr.msk.bf16.mxu0 %vm1269_vm0, %v4208_v35  ;;  %3834 = vmatprep.mubr.msk.bf16.mxu1 %vm1269_vm0, %v4210_v36  ;;  %345 = vst.msk [vmem:[#allocation2 + $0x380] sm:$0xff] %vm232_vm3, %v4398_v59  ;;  %346 = vst.msk [vmem:[#allocation2 + $0x388] sm:$0xff] %vm232_vm3, %v4398_v59  ;;  %v4303_v35 = vld [vmem:[%s4455_s28 + $0x340] ss:$8 sps:$4 sm:$0xff]   ;;  %v4304_v36 = vld [vmem:[%s4455_s28 + $0x154] ss:$8 sps:$4 sm:$0xff]  }
  0x51   : > { %347 = vst.msk [vmem:[#allocation2 + $0x390] sm:$0xff] %vm232_vm3, %v4398_v59  ;;  %348 = vst.msk [vmem:[#allocation2 + $0x398] sm:$0xff] %vm232_vm3, %v4398_v59 }
  0x52   : > { %349 = vst.msk [vmem:[#allocation2 + $0x3a0] sm:$0xff] %vm232_vm3, %v4398_v59  ;;  %350 = vst.msk [vmem:[#allocation2 + $0x3a8] sm:$0xff] %vm232_vm3, %v4398_v59 }
  0x53   : > { %351 = vst.msk [vmem:[#allocation2 + $0x3b0] sm:$0xff] %vm232_vm3, %v4398_v59  ;;  %352 = vst.msk [vmem:[#allocation2 + $0x3b8] sm:$0xff] %vm232_vm3, %v4398_v59 }
  0x54   : > { %353 = vst.msk [vmem:[#allocation2 + $0x3c0] sm:$0xff] %vm232_vm3, %v4398_v59  ;;  %354 = vst.msk [vmem:[#allocation2 + $0x3c8] sm:$0xff] %vm232_vm3, %v4398_v59 }
  0x55   : > { %355 = vst.msk [vmem:[#allocation2 + $0x3d0] sm:$0xff] %vm232_vm3, %v4398_v59  ;;  %356 = vst.msk [vmem:[#allocation2 + $0x3d8] sm:$0xff] %vm232_vm3, %v4398_v59 }
  0x56   : > { %357 = vst.msk [vmem:[#allocation2 + $0x3e0] sm:$0xff] %vm232_vm3, %v4398_v59  ;;  %358 = vst.msk [vmem:[#allocation2 + $0x3e8] sm:$0xff] %vm232_vm3, %v4398_v59 }
  0x57   : > { %1542 = vmatmul.mubr.bf16.gmra.mrb[20].mxu0 %v4212_v37  ;;  %1798 = vmatmul.mubr.bf16.gmra.mrb[20].mxu1 %v4213_v38  ;;  %359 = vst.msk [vmem:[#allocation2 + $0x3f0] sm:$0xff] %vm232_vm3, %v4398_v59  ;;  %360 = vst.msk [vmem:[#allocation2 + $0x3f8] sm:$0xff] %vm232_vm3, %v4398_v59  ;;  %v4306_v37 = vld [vmem:[%s4455_s28 + $0x354] ss:$8 sps:$4 sm:$0xff]   ;;  %v4308_v38 = vld [vmem:[%s4455_s28 + $0x150] ss:$8 sps:$4 sm:$0xff]  }
  0x58   : > { %3803 = vmatprep.mubr.msk.bf16.mxu0 %vm1269_vm0, %v4214_v39  ;;  %3835 = vmatprep.mubr.msk.bf16.mxu1 %vm1269_vm0, %v4216_v40  ;;  %v4309_v39 = vld [vmem:[%s4455_s28 + $0x350] ss:$8 sps:$4 sm:$0xff]   ;;  %v4310_v40 = vld [vmem:[%s4455_s28 + $0x164] ss:$8 sps:$4 sm:$0xff]   ;;  %v4339_v59 = vld [vmem:[%s4455_s28 + $0x3a0] ss:$8 sps:$4 sm:$0xff]  }
  0x5f   : > { %1550 = vmatmul.mubr.bf16.gmra.mrb[24].mxu0 %v4218_v41  ;;  %1806 = vmatmul.mubr.bf16.gmra.mrb[24].mxu1 %v4219_v42  ;;  %v4312_v41 = vld [vmem:[%s4455_s28 + $0x364] ss:$8 sps:$4 sm:$0xff]   ;;  %v4314_v42 = vld [vmem:[%s4455_s28 + $0x160] ss:$8 sps:$4 sm:$0xff]  }
  0x60   : > { %3804 = vmatprep.mubr.msk.bf16.mxu0 %vm1269_vm0, %v4220_v43  ;;  %3836 = vmatprep.mubr.msk.bf16.mxu1 %vm1269_vm0, %v4222_v44  ;;  %v4315_v43 = vld [vmem:[%s4455_s28 + $0x360] ss:$8 sps:$4 sm:$0xff]   ;;  %v4316_v44 = vld [vmem:[%s4455_s28 + $0x174] ss:$8 sps:$4 sm:$0xff]  }
  0x67   : > { %1558 = vmatmul.mubr.bf16.gmra.mrb[28].mxu0 %v4224_v45  ;;  %1814 = vmatmul.mubr.bf16.gmra.mrb[28].mxu1 %v4225_v46  ;;  %v4318_v45 = vld [vmem:[%s4455_s28 + $0x374] ss:$8 sps:$4 sm:$0xff]   ;;  %v4320_v46 = vld [vmem:[%s4455_s28 + $0x170] ss:$8 sps:$4 sm:$0xff]  }
  0x68   : > { %3805 = vmatprep.mubr.msk.bf16.mxu0 %vm1269_vm0, %v4226_v47  ;;  %3837 = vmatprep.mubr.msk.bf16.mxu1 %vm1269_vm0, %v4228_v48  ;;  %v4321_v47 = vld [vmem:[%s4455_s28 + $0x370] ss:$8 sps:$4 sm:$0xff]   ;;  %v4322_v48 = vld [vmem:[%s4455_s28 + $0x184] ss:$8 sps:$4 sm:$0xff]  }
  0x6f   : > { %1566 = vmatmul.mubr.bf16.gmra.mrb[32].mxu0 %v4230_v49  ;;  %1822 = vmatmul.mubr.bf16.gmra.mrb[32].mxu1 %v4231_v50  ;;  %v4324_v49 = vld [vmem:[%s4455_s28 + $0x384] ss:$8 sps:$4 sm:$0xff]   ;;  %v4326_v50 = vld [vmem:[%s4455_s28 + $0x180] ss:$8 sps:$4 sm:$0xff]  }
  0x70   : > { %3806 = vmatprep.mubr.msk.bf16.mxu0 %vm1269_vm0, %v4232_v51  ;;  %3838 = vmatprep.mubr.msk.bf16.mxu1 %vm1269_vm0, %v4234_v52  ;;  %v4327_v51 = vld [vmem:[%s4455_s28 + $0x380] ss:$8 sps:$4 sm:$0xff]   ;;  %v4328_v52 = vld [vmem:[%s4455_s28 + $0x194] ss:$8 sps:$4 sm:$0xff]  }
  0x77   : > { %1574 = vmatmul.mubr.bf16.gmra.mrb[36].mxu0 %v4236_v53  ;;  %1830 = vmatmul.mubr.bf16.gmra.mrb[36].mxu1 %v4237_v54  ;;  %v4330_v53 = vld [vmem:[%s4455_s28 + $0x394] ss:$8 sps:$4 sm:$0xff]   ;;  %v4332_v54 = vld [vmem:[%s4455_s28 + $0x190] ss:$8 sps:$4 sm:$0xff]  }
  0x78   : > { %3807 = vmatprep.mubr.msk.bf16.mxu0 %vm1269_vm0, %v4238_v55  ;;  %3839 = vmatprep.mubr.msk.bf16.mxu1 %vm1269_vm0, %v4240_v56  ;;  %v4333_v55 = vld [vmem:[%s4455_s28 + $0x390] ss:$8 sps:$4 sm:$0xff]   ;;  %v4334_v56 = vld [vmem:[%s4455_s28 + $0x1a4] ss:$8 sps:$4 sm:$0xff]  }
  0x7f   : > { %1582 = vmatmul.mubr.bf16.gmra.mrb[40].mxu0 %v4540_v57  ;;  %1838 = vmatmul.mubr.bf16.gmra.mrb[40].mxu1 %v4543_v58  ;;  %v4336_v57 = vld [vmem:[%s4455_s28 + $0x3a4] ss:$8 sps:$4 sm:$0xff]   ;;  %v4338_v58 = vld [vmem:[%s4455_s28 + $0x1a0] ss:$8 sps:$4 sm:$0xff]  }
  0x80   : > { %3808 = vmatprep.mubr.msk.bf16.mxu0 %vm1269_vm0, %v4244_v60  ;;  %3840 = vmatprep.mubr.msk.bf16.mxu1 %vm1269_vm0, %v4246_v61  ;;  %v4340_v60 = vld [vmem:[%s4455_s28 + $0x1b4] ss:$8 sps:$4 sm:$0xff]  }
  0x81   : > { %v4342_v61 = vld [vmem:[%s4455_s28 + $0x3b4] ss:$8 sps:$4 sm:$0xff]  }
  0x87   : > { %1590 = vmatmul.mubr.bf16.gmra.mrb[44].mxu0 %v4248_v62  ;;  %1846 = vmatmul.mubr.bf16.gmra.mrb[44].mxu1 %v4249_v63  ;;  %v361_v62 = vld [vmem:[#allocation2] sm:$0xff] }
  0x88   : > { %3809 = vmatprep.mubr.msk.bf16.mxu0 %vm1269_vm0, %v4250_v0  ;;  %3841 = vmatprep.mubr.msk.bf16.mxu1 %vm1269_vm0, %v4252_v1  ;;  %v425_v63 = vld [vmem:[#allocation2 + $0x200] sm:$0xff] }
  0x8f   : > { %1598 = vmatmul.mubr.bf16.gmra.mrb[48].mxu0 %v4254_v2  ;;  %1854 = vmatmul.mubr.bf16.gmra.mrb[48].mxu1 %v4255_v3  ;;  %v362_v2 = vld [vmem:[#allocation2 + $0x8] sm:$0xff] }
  0x90   : > { %3810 = vmatprep.mubr.msk.bf16.mxu0 %vm1269_vm0, %v4256_v4  ;;  %3842 = vmatprep.mubr.msk.bf16.mxu1 %vm1269_vm0, %v4258_v5  ;;  %v426_v3 = vld [vmem:[#allocation2 + $0x208] sm:$0xff] }
  0x97   : > { %1606 = vmatmul.mubr.bf16.gmra.mrb[52].mxu0 %v4260_v6  ;;  %1862 = vmatmul.mubr.bf16.gmra.mrb[52].mxu1 %v4261_v7 }
  0x98   : > { %3811 = vmatprep.mubr.msk.bf16.mxu0 %vm1269_vm0, %v4262_v8  ;;  %3843 = vmatprep.mubr.msk.bf16.mxu1 %vm1269_vm0, %v4264_v9  ;;  %v4344_v8 = vld [vmem:[%s4455_s28 + $0x1b0] ss:$8 sps:$4 sm:$0xff]  }
  0x99   : > { %v4345_v9 = vld [vmem:[%s4455_s28 + $0x3b0] ss:$8 sps:$4 sm:$0xff]  }
  0x9f   : > { %1614 = vmatmul.mubr.bf16.gmra.mrb[56].mxu0 %v4266_v10  ;;  %1870 = vmatmul.mubr.bf16.gmra.mrb[56].mxu1 %v4267_v11 }
  0xa0   : > { %3812 = vmatprep.mubr.msk.bf16.mxu0 %vm1269_vm0, %v4268_v12  ;;  %3844 = vmatprep.mubr.msk.bf16.mxu1 %vm1269_vm0, %v4270_v13  ;;  %v4346_v12 = vld [vmem:[%s4455_s28 + $0x1c4] ss:$8 sps:$4 sm:$0xff]  }
  0xa1   : > { %v4348_v13 = vld [vmem:[%s4455_s28 + $0x3c4] ss:$8 sps:$4 sm:$0xff]  }
  0xa7   : > { %1622 = vmatmul.mubr.bf16.gmra.mrb[60].mxu0 %v4272_v14  ;;  %1878 = vmatmul.mubr.bf16.gmra.mrb[60].mxu1 %v4273_v15 }
  0xa8   : > { %3813 = vmatprep.mubr.msk.bf16.mxu0 %vm1269_vm0, %v4274_v16  ;;  %3845 = vmatprep.mubr.msk.bf16.mxu1 %vm1269_vm0, %v4276_v17 }
  0xaf   : > { %1630 = vmatmul.mubr.bf16.gmra.mrb[64].mxu0 %v4278_v18  ;;  %1886 = vmatmul.mubr.bf16.gmra.mrb[64].mxu1 %v4279_v19  ;;  %v363_v18 = vld [vmem:[#allocation2 + $0x10] sm:$0xff] }
  0xb0   : > { %3814 = vmatprep.mubr.msk.bf16.mxu0 %vm1269_vm0, %v4280_v20  ;;  %3846 = vmatprep.mubr.msk.bf16.mxu1 %vm1269_vm0, %v4282_v21  ;;  %v427_v19 = vld [vmem:[#allocation2 + $0x210] sm:$0xff]  ;;  %v4916_v20 = vld [vmem:[%s5487_s2] ss:$0 sm:$0xff] }
  0xb7   : > { %1638 = vmatmul.mubr.bf16.gmra.mrb[68].mxu0 %v4284_v22  ;;  %1894 = vmatmul.mubr.bf16.gmra.mrb[68].mxu1 %v4285_v23  ;;  %v364_v23 = vld [vmem:[#allocation2 + $0x18] sm:$0xff] }
  0xb8   : > { %3815 = vmatprep.mubr.msk.bf16.mxu0 %vm1269_vm0, %v4286_v24  ;;  %3847 = vmatprep.mubr.msk.bf16.mxu1 %vm1269_vm0, %v4288_v25  ;;  %v428_v24 = vld [vmem:[#allocation2 + $0x218] sm:$0xff]  ;;  %v4350_v25 = vld [vmem:[%s4455_s28 + $0x1c0] ss:$8 sps:$4 sm:$0xff]  }
  0xbf   : > { %1646 = vmatmul.mubr.bf16.gmra.mrb[72].mxu0 %v4290_v26  ;;  %1902 = vmatmul.mubr.bf16.gmra.mrb[72].mxu1 %v4291_v27 }
  0xc0   : > { %3816 = vmatprep.mubr.msk.bf16.mxu0 %vm1269_vm0, %v4292_v28  ;;  %3848 = vmatprep.mubr.msk.bf16.mxu1 %vm1269_vm0, %v4294_v29 }
  0xc7   : > { %1654 = vmatmul.mubr.bf16.gmra.mrb[76].mxu0 %v4296_v30  ;;  %1910 = vmatmul.mubr.bf16.gmra.mrb[76].mxu1 %v4297_v31  ;;  %v4351_v30 = vld [vmem:[%s4455_s28 + $0x3c0] ss:$8 sps:$4 sm:$0xff]   ;;  %v4352_v31 = vld [vmem:[%s4455_s28 + $0x1d4] ss:$8 sps:$4 sm:$0xff]  }
  0xc8   : > { %3817 = vmatprep.mubr.msk.bf16.mxu0 %vm1269_vm0, %v4298_v32  ;;  %3849 = vmatprep.mubr.msk.bf16.mxu1 %vm1269_vm0, %v4300_v33 }
  0xcf   : > { %1662 = vmatmul.mubr.bf16.gmra.mrb[80].mxu0 %v4302_v34  ;;  %1918 = vmatmul.mubr.bf16.gmra.mrb[80].mxu1 %v4303_v35 }
  0xd0   : > { %3818 = vmatprep.mubr.msk.bf16.mxu0 %vm1269_vm0, %v4304_v36  ;;  %3850 = vmatprep.mubr.msk.bf16.mxu1 %vm1269_vm0, %v4306_v37  ;;  %v4354_v36 = vld [vmem:[%s4455_s28 + $0x3d4] ss:$8 sps:$4 sm:$0xff]  }
  0xd7   : > { %1670 = vmatmul.mubr.bf16.gmra.mrb[84].mxu0 %v4308_v38  ;;  %1926 = vmatmul.mubr.bf16.gmra.mrb[84].mxu1 %v4309_v39 }
  0xd8   : > { %3819 = vmatprep.mubr.msk.bf16.mxu0 %vm1269_vm0, %v4310_v40  ;;  %3851 = vmatprep.mubr.msk.bf16.mxu1 %vm1269_vm0, %v4312_v41 }
  0xdf   : > { %1678 = vmatmul.mubr.bf16.gmra.mrb[88].mxu0 %v4314_v42  ;;  %1934 = vmatmul.mubr.bf16.gmra.mrb[88].mxu1 %v4315_v43 }
  0xe0   : > { %3820 = vmatprep.mubr.msk.bf16.mxu0 %vm1269_vm0, %v4316_v44  ;;  %3852 = vmatprep.mubr.msk.bf16.mxu1 %vm1269_vm0, %v4318_v45 }
  0xe7   : > { %1686 = vmatmul.mubr.bf16.gmra.mrb[92].mxu0 %v4320_v46  ;;  %1942 = vmatmul.mubr.bf16.gmra.mrb[92].mxu1 %v4321_v47 }
  0xe8   : > { %3821 = vmatprep.mubr.msk.bf16.mxu0 %vm1269_vm0, %v4322_v48  ;;  %3853 = vmatprep.mubr.msk.bf16.mxu1 %vm1269_vm0, %v4324_v49  ;;  %v365_v49 = vld [vmem:[#allocation2 + $0x20] sm:$0xff] }
  0xef   : > { %1694 = vmatmul.mubr.bf16.gmra.mrb[96].mxu0 %v4326_v50  ;;  %1950 = vmatmul.mubr.bf16.gmra.mrb[96].mxu1 %v4327_v51  ;;  %v429_v50 = vld [vmem:[#allocation2 + $0x220] sm:$0xff] }
  0xf0   : > { %3822 = vmatprep.mubr.msk.bf16.mxu0 %vm1269_vm0, %v4328_v52  ;;  %3854 = vmatprep.mubr.msk.bf16.mxu1 %vm1269_vm0, %v4330_v53  ;;  %v4356_v53 = vld [vmem:[%s4455_s28 + $0x1d0] ss:$8 sps:$4 sm:$0xff]  }
  0xf7   : > { %1702 = vmatmul.mubr.bf16.gmra.mrb[100].mxu0 %v4332_v54  ;;  %1958 = vmatmul.mubr.bf16.gmra.mrb[100].mxu1 %v4333_v55  ;;  %v4357_v54 = vld [vmem:[%s4455_s28 + $0x3d0] ss:$8 sps:$4 sm:$0xff]  }
  0xf8   : > { %3823 = vmatprep.mubr.msk.bf16.mxu0 %vm1269_vm0, %v4334_v56  ;;  %3855 = vmatprep.mubr.msk.bf16.mxu1 %vm1269_vm0, %v4336_v57 }
  0xff   : > { %1710 = vmatmul.mubr.bf16.gmra.mrb[104].mxu0 %v4338_v58  ;;  %1966 = vmatmul.mubr.bf16.gmra.mrb[104].mxu1 %v4339_v59 }
 0x100   : > { %3824 = vmatprep.mubr.msk.bf16.mxu0 %vm1269_vm0, %v4340_v60  ;;  %3856 = vmatprep.mubr.msk.bf16.mxu1 %vm1269_vm0, %v4342_v61  ;;  %v366_v60 = vld [vmem:[#allocation2 + $0x28] sm:$0xff] }
 0x101   : > { %v4358_v61 = vld [vmem:[%s4455_s28 + $0x1e4] ss:$8 sps:$4 sm:$0xff]  }
 0x102   : > { %v1503_v0 = vpop.f32.mrb[0].mxu0  ;;  %v1759_v1 = vpop.f32.mrb[0].mxu1 }
 0x103   : > { %v2014_v4 = vadd.f32 %v1503_v0, %v361_v62  ;;  %v2078_v5 = vadd.f32 %v1759_v1, %v425_v63  ;;  %v1505_v6 = vpop.f32.mrb[1].mxu0  ;;  %v1761_v7 = vpop.f32.mrb[1].mxu1 }
 0x104   : > { %v1506_v10 = vpop.f32.mrb[2].mxu0  ;;  %v1762_v11 = vpop.f32.mrb[2].mxu1 }
 0x105   : > { %2143 = vst.msk [vmem:[#allocation2] sm:$0xff] %vm232_vm3, %v2014_v4  ;;  %2207 = vst.msk [vmem:[#allocation2 + $0x200] sm:$0xff] %vm232_vm3, %v2078_v5  ;;  %v2015_v14 = vadd.f32 %v1506_v10, %v362_v2  ;;  %v2079_v15 = vadd.f32 %v1762_v11, %v426_v3  ;;  %v1508_v16 = vpop.f32.mrb[3].mxu0  ;;  %v1764_v17 = vpop.f32.mrb[3].mxu1  ;;  %v430_v3 = vld [vmem:[#allocation2 + $0x228] sm:$0xff] }
 0x107   : > { %2144 = vst.msk [vmem:[#allocation2 + $0x8] sm:$0xff] %vm232_vm3, %v2015_v14  ;;  %2208 = vst.msk [vmem:[#allocation2 + $0x208] sm:$0xff] %vm232_vm3, %v2079_v15  ;;  %1718 = vmatmul.mubr.bf16.gmra.mrb[108].mxu0 %v4344_v8  ;;  %1974 = vmatmul.mubr.bf16.gmra.mrb[108].mxu1 %v4345_v9  ;;  %v4360_v9 = vld [vmem:[%s4455_s28 + $0x3e4] ss:$8 sps:$4 sm:$0xff]  }
 0x108   : > { %3825 = vmatprep.mubr.msk.bf16.mxu0 %vm1269_vm0, %v4346_v12  ;;  %3857 = vmatprep.mubr.msk.bf16.mxu1 %vm1269_vm0, %v4348_v13 }
 0x10a   : > { %v1511_v21 = vpop.f32.mrb[4].mxu0  ;;  %v1767_v22 = vpop.f32.mrb[4].mxu1 }
 0x10b   : > { %v2016_v26 = vadd.f32 %v1511_v21, %v363_v18  ;;  %v2080_v27 = vadd.f32 %v1767_v22, %v427_v19  ;;  %v1513_v28 = vpop.f32.mrb[5].mxu0  ;;  %v1769_v29 = vpop.f32.mrb[5].mxu1 }
 0x10c   : > { %v2274_v32 = vld [vmem:[#allocation2] sm:$0xff]  ;;  %v1514_v34 = vpop.f32.mrb[6].mxu0  ;;  %v1770_v35 = vpop.f32.mrb[6].mxu1 }
 0x10d   : > { %v2338_v33 = vld [vmem:[#allocation2 + $0x200] sm:$0xff]  ;;  %v2409_v37 = vadd.f32 %v4916_v20, %v2274_v32  ;;  %2145 = vst.msk [vmem:[#allocation2 + $0x10] sm:$0xff] %vm232_vm3, %v2016_v26  ;;  %2209 = vst.msk [vmem:[#allocation2 + $0x210] sm:$0xff] %vm232_vm3, %v2080_v27  ;;  %v2017_v39 = vadd.f32 %v1514_v34, %v364_v23  ;;  %v2081_v40 = vadd.f32 %v1770_v35, %v428_v24  ;;  %v1516_v41 = vpop.f32.mrb[7].mxu0  ;;  %v1772_v42 = vpop.f32.mrb[7].mxu1  ;;  %v367_v26 = vld [vmem:[#allocation2 + $0x30] sm:$0xff] }
 0x10e   : > { %v2473_v38 = vadd.f32 %v4916_v20, %v2338_v33  ;;  %v2275_v43 = vld [vmem:[#allocation2 + $0x8] sm:$0xff]  ;;  %v431_v27 = vld [vmem:[#allocation2 + $0x230] sm:$0xff] }
 0x10f   : > { %v2339_v44 = vld [vmem:[#allocation2 + $0x208] sm:$0xff]  ;;  %vm2537_vm4 = vcmp.ge.f32.partialorder %v2409_v37, 0.0  ;;  %v2665_v45 = vmul.f32 0.01, %v2409_v37  ;;  %2146 = vst.msk [vmem:[#allocation2 + $0x18] sm:$0xff] %vm232_vm3, %v2017_v39  ;;  %2210 = vst.msk [vmem:[#allocation2 + $0x218] sm:$0xff] %vm232_vm3, %v2081_v40  ;;  %1726 = vmatmul.mubr.bf16.gmra.mrb[112].mxu0 %v4350_v25  ;;  %1982 = vmatmul.mubr.bf16.gmra.mrb[112].mxu1 %v4351_v30  ;;  %v2410_v47 = vadd.f32 %v4916_v20, %v2275_v43 }
 0x110   : > { %vm2601_vm5 = vcmp.ge.f32.partialorder %v2473_v38, 0.0  ;;  %v2729_v46 = vmul.f32 0.01, %v2473_v38  ;;  %v2474_v48 = vadd.f32 %v4916_v20, %v2339_v44  ;;  %3826 = vmatprep.mubr.msk.bf16.mxu0 %vm1269_vm0, %v4352_v31  ;;  %3858 = vmatprep.mubr.msk.bf16.mxu1 %vm1269_vm0, %v4354_v36  ;;  %v4362_v30 = vld [vmem:[%s4455_s28 + $0x1e0] ss:$8 sps:$4 sm:$0xff]   ;;  %v432_v44 = vld [vmem:[#allocation2 + $0x238] sm:$0xff] }
 0x111   : > { %v2793_v51 = vsel %vm2537_vm4, %v2409_v37, %v2665_v45  ;;  %vm2538_vm7 = vcmp.ge.f32.partialorder %v2410_v47, 0.0  ;;  %v2666_v57 = vmul.f32 0.01, %v2410_v47  ;;  %v4363_v31 = vld [vmem:[%s4455_s28 + $0x3e0] ss:$8 sps:$4 sm:$0xff]   ;;  %v368_v37 = vld [vmem:[#allocation2 + $0x38] sm:$0xff] }
 0x112   : > { %v2857_v52 = vsel %vm2601_vm5, %v2473_v38, %v2729_v46  ;;  %v3993_v55 = vpack.c.bf16 %v2793_v51, %v2793_v51  ;;  %v1519_v58 = vpop.f32.mrb[8].mxu0  ;;  %v1775_v59 = vpop.f32.mrb[8].mxu1  ;;  %vm2602_vm8 = vcmp.ge.f32.partialorder %v2474_v48, 0.0  ;;  %v2730_v62 = vmul.f32 0.01, %v2474_v48 }
 0x113   : > { %v4057_v56 = vpack.c.bf16 %v2857_v52, %v2857_v52  ;;  %v2018_v63 = vadd.f32 %v1519_v58, %v365_v49  ;;  %v2082_v0 = vadd.f32 %v1775_v59, %v429_v50  ;;  %v1521_v1 = vpop.f32.mrb[9].mxu0  ;;  %v1777_v2 = vpop.f32.mrb[9].mxu1  ;;  %v2794_v4 = vsel %vm2538_vm7, %v2410_v47, %v2666_v57  ;;  %v4364_v38 = vld [vmem:[%s4455_s28 + $0x1f4] ss:$8 sps:$4 sm:$0xff]  }
 0x114   : > { %3434 = vst.msk [vmem:[%s4936_s22] sm:$0xf] %vm3433_vm6, %v3993_v55  ;;  %v2276_v5 = vld [vmem:[#allocation2 + $0x10] sm:$0xff]  ;;  %v1522_v7 = vpop.f32.mrb[10].mxu0  ;;  %v1778_v8 = vpop.f32.mrb[10].mxu1  ;;  %v3994_v10 = vpack.c.bf16 %v2794_v4, %v2794_v4  ;;  %v2858_v11 = vsel %vm2602_vm8, %v2474_v48, %v2730_v62 }
 0x115   : > { %3498 = vst.msk [vmem:[%s4936_s22 + $0x100] sm:$0xf] %vm3433_vm6, %v4057_v56  ;;  %v2340_v6 = vld [vmem:[#allocation2 + $0x210] sm:$0xff]  ;;  %v2411_v12 = vadd.f32 %v4916_v20, %v2276_v5  ;;  %v1524_v14 = vpop.f32.mrb[11].mxu0  ;;  %v1780_v15 = vpop.f32.mrb[11].mxu1  ;;  %v4058_v16 = vpack.c.bf16 %v2858_v11, %v2858_v11  ;;  %v2019_v19 = vadd.f32 %v1522_v7, %v366_v60  ;;  %v2083_v21 = vadd.f32 %v1778_v8, %v430_v3  ;;  %v433_v5 = vld [vmem:[#allocation2 + $0x240] sm:$0xff] }
 0x116   : > { %v2475_v13 = vadd.f32 %v4916_v20, %v2340_v6  ;;  %2147 = vst.msk [vmem:[#allocation2 + $0x20] sm:$0xff] %vm232_vm3, %v2018_v63  ;;  %2211 = vst.msk [vmem:[#allocation2 + $0x220] sm:$0xff] %vm232_vm3, %v2082_v0  ;;  %v2277_v17 = vld [vmem:[#allocation2 + $0x18] sm:$0xff]  ;;  %v369_v0 = vld [vmem:[#allocation2 + $0x40] sm:$0xff] }
 0x117   : > { %v2341_v18 = vld [vmem:[#allocation2 + $0x218] sm:$0xff]  ;;  %3435 = vst.msk [vmem:[%s4936_s22 + $0x4] sm:$0xf] %vm3433_vm6, %v3994_v10  ;;  %vm2539_vm9 = vcmp.ge.f32.partialorder %v2411_v12, 0.0  ;;  %v2667_v22 = vmul.f32 0.01, %v2411_v12  ;;  %1734 = vmatmul.mubr.bf16.gmra.mrb[116].mxu0 %v4356_v53  ;;  %1990 = vmatmul.mubr.bf16.gmra.mrb[116].mxu1 %v4357_v54  ;;  %v2412_v24 = vadd.f32 %v4916_v20, %v2277_v17 }
 0x118   : > { %vm2603_vm10 = vcmp.ge.f32.partialorder %v2475_v13, 0.0  ;;  %v2731_v23 = vmul.f32 0.01, %v2475_v13  ;;  %3499 = vst.msk [vmem:[%s4936_s22 + $0x104] sm:$0xf] %vm3433_vm6, %v4058_v16  ;;  %v2476_v25 = vadd.f32 %v4916_v20, %v2341_v18  ;;  %3827 = vmatprep.mubr.msk.bf16.mxu0 %vm1269_vm0, %v4358_v61  ;;  %3859 = vmatprep.mubr.msk.bf16.mxu1 %vm1269_vm0, %v4360_v9  ;;  %v370_v6 = vld [vmem:[#allocation2 + $0x48] sm:$0xff] }
 0x119   : > { %2148 = vst.msk [vmem:[#allocation2 + $0x28] sm:$0xff] %vm232_vm3, %v2019_v19  ;;  %2212 = vst.msk [vmem:[#allocation2 + $0x228] sm:$0xff] %vm232_vm3, %v2083_v21  ;;  %v2795_v28 = vsel %vm2539_vm9, %v2411_v12, %v2667_v22  ;;  %vm2540_vm11 = vcmp.ge.f32.partialorder %v2412_v24, 0.0  ;;  %v2668_v34 = vmul.f32 0.01, %v2412_v24  ;;  %v434_v7 = vld [vmem:[#allocation2 + $0x248] sm:$0xff] }
 0x11a   : > { %v2859_v29 = vsel %vm2603_vm10, %v2475_v13, %v2731_v23  ;;  %v3995_v32 = vpack.c.bf16 %v2795_v28, %v2795_v28  ;;  %v1527_v35 = vpop.f32.mrb[12].mxu0  ;;  %v1783_v36 = vpop.f32.mrb[12].mxu1  ;;  %vm2604_vm12 = vcmp.ge.f32.partialorder %v2476_v25, 0.0  ;;  %v2732_v39 = vmul.f32 0.01, %v2476_v25 }
 0x11b   : > { %v4059_v33 = vpack.c.bf16 %v2859_v29, %v2859_v29  ;;  %v2020_v40 = vadd.f32 %v1527_v35, %v367_v26  ;;  %v2084_v41 = vadd.f32 %v1783_v36, %v431_v27  ;;  %v1529_v42 = vpop.f32.mrb[13].mxu0  ;;  %v1785_v43 = vpop.f32.mrb[13].mxu1  ;;  %v2796_v45 = vsel %vm2540_vm11, %v2412_v24, %v2668_v34  ;;  %v4366_v50 = vld [vmem:[%s4455_s28 + $0x3f4] ss:$8 sps:$4 sm:$0xff]   ;;  %v4368_v12 = vld [vmem:[%s4455_s28 + $0x1f0] ss:$8 sps:$4 sm:$0xff]  }
 0x11c   : > { %3436 = vst.msk [vmem:[%s4936_s22 + $0x8] sm:$0xf] %vm3433_vm6, %v3995_v32  ;;  %v1530_v48 = vpop.f32.mrb[14].mxu0  ;;  %v1786_v49 = vpop.f32.mrb[14].mxu1  ;;  %v3996_v51 = vpack.c.bf16 %v2796_v45, %v2796_v45  ;;  %v2860_v52 = vsel %vm2604_vm12, %v2476_v25, %v2732_v39  ;;  %v4369_v13 = vld [vmem:[%s4455_s28 + $0x3f0] ss:$8 sps:$4 sm:$0xff]  }
 0x11d   : > { %3500 = vst.msk [vmem:[%s4936_s22 + $0x108] sm:$0xf] %vm3433_vm6, %v4059_v33  ;;  %v2278_v46 = vld [vmem:[#allocation2 + $0x20] sm:$0xff]  ;;  %v1532_v55 = vpop.f32.mrb[15].mxu0  ;;  %v1788_v56 = vpop.f32.mrb[15].mxu1  ;;  %v4060_v57 = vpack.c.bf16 %v2860_v52, %v2860_v52  ;;  %v2021_v58 = vadd.f32 %v1530_v48, %v368_v37  ;;  %v2085_v59 = vadd.f32 %v1786_v49, %v432_v44  ;;  %v371_v43 = vld [vmem:[#allocation2 + $0x50] sm:$0xff] }
 0x11e   : > { %v2342_v47 = vld [vmem:[#allocation2 + $0x220] sm:$0xff]  ;;  %v2413_v53 = vadd.f32 %v4916_v20, %v2278_v46  ;;  %2149 = vst.msk [vmem:[#allocation2 + $0x30] sm:$0xff] %vm232_vm3, %v2020_v40  ;;  %2213 = vst.msk [vmem:[#allocation2 + $0x230] sm:$0xff] %vm232_vm3, %v2084_v41  ;;  %v435_v44 = vld [vmem:[#allocation2 + $0x250] sm:$0xff] }
 0x11f   : > { %v2477_v54 = vadd.f32 %v4916_v20, %v2342_v47  ;;  %3437 = vst.msk [vmem:[%s4936_s22 + $0xc] sm:$0xf] %vm3433_vm6, %v3996_v51  ;;  %1742 = vmatmul.mubr.bf16.gmra.mrb[120].mxu0 %v4362_v30  ;;  %1998 = vmatmul.mubr.bf16.gmra.mrb[120].mxu1 %v4363_v31  ;;  %3501 = vst.msk [vmem:[%s4936_s22 + $0x10c] sm:$0xf] %vm3433_vm6, %v4060_v57  ;;  %v372_v55 = vld [vmem:[#allocation2 + $0x58] sm:$0xff] }
 0x120   : > { %vm2541_vm13 = vcmp.ge.f32.partialorder %v2413_v53, 0.0  ;;  %v2669_v60 = vmul.f32 0.01, %v2413_v53  ;;  %v2279_v62 = vld [vmem:[#allocation2 + $0x28] sm:$0xff]  ;;  %2150 = vst.msk [vmem:[#allocation2 + $0x38] sm:$0xff] %vm232_vm3, %v2021_v58  ;;  %2214 = vst.msk [vmem:[#allocation2 + $0x238] sm:$0xff] %vm232_vm3, %v2085_v59  ;;  %3828 = vmatprep.mubr.msk.bf16.mxu0 %vm1269_vm0, %v4364_v38  ;;  %3860 = vmatprep.mubr.msk.bf16.mxu1 %vm1269_vm0, %v4366_v50 }
 0x121   : > { %vm2605_vm14 = vcmp.ge.f32.partialorder %v2477_v54, 0.0  ;;  %v2733_v61 = vmul.f32 0.01, %v2477_v54  ;;  %v2343_v63 = vld [vmem:[#allocation2 + $0x228] sm:$0xff]  ;;  %v2414_v3 = vadd.f32 %v4916_v20, %v2279_v62  ;;  %v436_v56 = vld [vmem:[#allocation2 + $0x258] sm:$0xff] }
 0x122   : > { %v2797_v1 = vsel %vm2541_vm13, %v2413_v53, %v2669_v60  ;;  %v2478_v4 = vadd.f32 %v4916_v20, %v2343_v63  ;;  %v1535_v10 = vpop.f32.mrb[16].mxu0  ;;  %v1791_v11 = vpop.f32.mrb[16].mxu1 }
 0x123   : > { %v2861_v2 = vsel %vm2605_vm14, %v2477_v54, %v2733_v61  ;;  %v3997_v8 = vpack.c.bf16 %v2797_v1, %v2797_v1  ;;  %vm2542_vm15 = vcmp.ge.f32.partialorder %v2414_v3, 0.0  ;;  %v2670_v14 = vmul.f32 0.01, %v2414_v3  ;;  %v1537_v21 = vpop.f32.mrb[17].mxu0  ;;  %v1793_v22 = vpop.f32.mrb[17].mxu1 }
 0x124   : > { %v4061_v9 = vpack.c.bf16 %v2861_v2, %v2861_v2  ;;  %vm2606_vm0 = vcmp.ge.f32.partialorder %v2478_v4, 0.0  ;;  %v2734_v15 = vmul.f32 0.01, %v2478_v4  ;;  %v2022_v18 = vadd.f32 %v1535_v10, %v369_v0  ;;  %v1538_v27 = vpop.f32.mrb[18].mxu0  ;;  %v1794_v28 = vpop.f32.mrb[18].mxu1  ;;  %v438_v21 = vld [vmem:[#allocation2 + $0x268] sm:$0xff] }
 0x125   : > { %3438 = vst.msk [vmem:[%s4936_s22 + $0x10] sm:$0xf] %vm3433_vm6, %v3997_v8  ;;  %v2280_v16 = vld [vmem:[#allocation2 + $0x30] sm:$0xff]  ;;  %v2086_v19 = vadd.f32 %v1791_v11, %v433_v5  ;;  %v2798_v23 = vsel %vm2542_vm15, %v2414_v3, %v2670_v14  ;;  %v2023_v31 = vadd.f32 %v1538_v27, %v370_v6  ;;  %v2087_v32 = vadd.f32 %v1794_v28, %v434_v7  ;;  %v1540_v33 = vpop.f32.mrb[19].mxu0  ;;  %v1796_v34 = vpop.f32.mrb[19].mxu1  ;;  %v437_v14 = vld [vmem:[#allocation2 + $0x260] sm:$0xff] }
 0x126   : > { %3502 = vst.msk [vmem:[%s4936_s22 + $0x110] sm:$0xf] %vm3433_vm6, %v4061_v9  ;;  %v2344_v17 = vld [vmem:[#allocation2 + $0x230] sm:$0xff]  ;;  %v2862_v24 = vsel %vm2606_vm0, %v2478_v4, %v2734_v15  ;;  %v2415_v25 = vadd.f32 %v4916_v20, %v2280_v16  ;;  %v3998_v29 = vpack.c.bf16 %v2798_v23, %v2798_v23 }
 0x127   : > { %v2479_v26 = vadd.f32 %v4916_v20, %v2344_v17  ;;  %v4062_v30 = vpack.c.bf16 %v2862_v24, %v2862_v24  ;;  %2151 = vst.msk [vmem:[#allocation2 + $0x40] sm:$0xff] %vm232_vm3, %v2022_v18  ;;  %2215 = vst.msk [vmem:[#allocation2 + $0x240] sm:$0xff] %vm232_vm3, %v2086_v19  ;;  %1750 = vmatmul.mubr.bf16.gmra.mrb[124].mxu0 %v4368_v12  ;;  %2006 = vmatmul.mubr.bf16.gmra.mrb[124].mxu1 %v4369_v13  ;;  %v2281_v37 = vld [vmem:[#allocation2 + $0x38] sm:$0xff]  ;;  %v373_v13 = vld [vmem:[#allocation2 + $0x60] sm:$0xff] }
 0x128   : > { %vm2543_vm1 = vcmp.ge.f32.partialorder %v2415_v25, 0.0  ;;  %v2671_v35 = vmul.f32 0.01, %v2415_v25  ;;  %3439 = vst.msk [vmem:[%s4936_s22 + $0x14] sm:$0xf] %vm3433_vm6, %v3998_v29  ;;  %v2345_v38 = vld [vmem:[#allocation2 + $0x238] sm:$0xff]  ;;  %v2416_v41 = vadd.f32 %v4916_v20, %v2281_v37 }
 0x129   : > { %vm2607_vm2 = vcmp.ge.f32.partialorder %v2479_v26, 0.0  ;;  %v2735_v36 = vmul.f32 0.01, %v2479_v26  ;;  %3503 = vst.msk [vmem:[%s4936_s22 + $0x114] sm:$0xf] %vm3433_vm6, %v4062_v30  ;;  %v2480_v42 = vadd.f32 %v4916_v20, %v2345_v38  ;;  %v374_v19 = vld [vmem:[#allocation2 + $0x68] sm:$0xff] }
 0x12a   : > { %2152 = vst.msk [vmem:[#allocation2 + $0x48] sm:$0xff] %vm232_vm3, %v2023_v31  ;;  %2216 = vst.msk [vmem:[#allocation2 + $0x248] sm:$0xff] %vm232_vm3, %v2087_v32  ;;  %v2799_v39 = vsel %vm2543_vm1, %v2415_v25, %v2671_v35  ;;  %v1543_v47 = vpop.f32.mrb[20].mxu0  ;;  %v1799_v48 = vpop.f32.mrb[20].mxu1  ;;  %vm2544_vm4 = vcmp.ge.f32.partialorder %v2416_v41, 0.0 }
 0x12b   : > { %v2863_v40 = vsel %vm2607_vm2, %v2479_v26, %v2735_v36  ;;  %v3999_v45 = vpack.c.bf16 %v2799_v39, %v2799_v39  ;;  %v2672_v49 = vmul.f32 0.01, %v2416_v41  ;;  %vm2608_vm5 = vcmp.ge.f32.partialorder %v2480_v42, 0.0  ;;  %v1545_v53 = vpop.f32.mrb[21].mxu0  ;;  %v1801_v54 = vpop.f32.mrb[21].mxu1 }
 0x12c   : > { %v4063_v46 = vpack.c.bf16 %v2863_v40, %v2863_v40  ;;  %v2736_v50 = vmul.f32 0.01, %v2480_v42  ;;  %v2024_v51 = vadd.f32 %v1543_v47, %v371_v43  ;;  %v2088_v52 = vadd.f32 %v1799_v48, %v435_v44  ;;  %v1546_v61 = vpop.f32.mrb[22].mxu0  ;;  %v1802_v62 = vpop.f32.mrb[22].mxu1  ;;  %v375_v44 = vld [vmem:[#allocation2 + $0x70] sm:$0xff] }
 0x12d   : > { %3440 = vst.msk [vmem:[%s4936_s22 + $0x18] sm:$0xf] %vm3433_vm6, %v3999_v45  ;;  %v2800_v57 = vsel %vm2544_vm4, %v2416_v41, %v2672_v49  ;;  %v1548_v3 = vpop.f32.mrb[23].mxu0  ;;  %v1804_v4 = vpop.f32.mrb[23].mxu1  ;;  %v2025_v7 = vadd.f32 %v1546_v61, %v372_v55  ;;  %v2089_v8 = vadd.f32 %v1802_v62, %v436_v56  ;;  %v439_v45 = vld [vmem:[#allocation2 + $0x270] sm:$0xff] }
 0x12e   : > { %3504 = vst.msk [vmem:[%s4936_s22 + $0x118] sm:$0xf] %vm3433_vm6, %v4063_v46  ;;  %v2864_v58 = vsel %vm2608_vm5, %v2480_v42, %v2736_v50  ;;  %v2282_v59 = vld [vmem:[#allocation2 + $0x40] sm:$0xff]  ;;  %v4000_v63 = vpack.c.bf16 %v2800_v57, %v2800_v57 }
 0x12f   : > { %v2346_v60 = vld [vmem:[#allocation2 + $0x240] sm:$0xff]  ;;  %v4064_v0 = vpack.c.bf16 %v2864_v58, %v2864_v58  ;;  %v2417_v1 = vadd.f32 %v4916_v20, %v2282_v59  ;;  %2153 = vst.msk [vmem:[#allocation2 + $0x50] sm:$0xff] %vm232_vm3, %v2024_v51  ;;  %2217 = vst.msk [vmem:[#allocation2 + $0x250] sm:$0xff] %vm232_vm3, %v2088_v52 }
 0x130   : > { %v2481_v2 = vadd.f32 %v4916_v20, %v2346_v60  ;;  %3441 = vst.msk [vmem:[%s4936_s22 + $0x1c] sm:$0xf] %vm3433_vm6, %v4000_v63 }
 0x131   : > { %v2283_v5 = vld [vmem:[#allocation2 + $0x48] sm:$0xff]  ;;  %3505 = vst.msk [vmem:[%s4936_s22 + $0x11c] sm:$0xf] %vm3433_vm6, %v4064_v0  ;;  %vm2545_vm7 = vcmp.ge.f32.partialorder %v2417_v1, 0.0  ;;  %v2673_v9 = vmul.f32 0.01, %v2417_v1 }
 0x132   : > { %v2347_v6 = vld [vmem:[#allocation2 + $0x248] sm:$0xff]  ;;  %vm2609_vm8 = vcmp.ge.f32.partialorder %v2481_v2, 0.0  ;;  %v2737_v10 = vmul.f32 0.01, %v2481_v2  ;;  %v2418_v11 = vadd.f32 %v4916_v20, %v2283_v5  ;;  %2154 = vst.msk [vmem:[#allocation2 + $0x58] sm:$0xff] %vm232_vm3, %v2025_v7  ;;  %2218 = vst.msk [vmem:[#allocation2 + $0x258] sm:$0xff] %vm232_vm3, %v2089_v8 }
 0x133   : > { %v2482_v12 = vadd.f32 %v4916_v20, %v2347_v6  ;;  %v2801_v15 = vsel %vm2545_vm7, %v2417_v1, %v2673_v9  ;;  %v1551_v17 = vpop.f32.mrb[24].mxu0  ;;  %v1807_v18 = vpop.f32.mrb[24].mxu1 }
 0x134   : > { %v2865_v16 = vsel %vm2609_vm8, %v2481_v2, %v2737_v10  ;;  %v4001_v22 = vpack.c.bf16 %v2801_v15, %v2801_v15  ;;  %vm2546_vm9 = vcmp.ge.f32.partialorder %v2418_v11, 0.0  ;;  %v2674_v24 = vmul.f32 0.01, %v2418_v11  ;;  %v1553_v25 = vpop.f32.mrb[25].mxu0  ;;  %v1809_v26 = vpop.f32.mrb[25].mxu1  ;;  %v376_v10 = vld [vmem:[#allocation2 + $0x78] sm:$0xff] }
 0x135   : > { %v4065_v23 = vpack.c.bf16 %v2865_v16, %v2865_v16  ;;  %vm2610_vm10 = vcmp.ge.f32.partialorder %v2482_v12, 0.0  ;;  %v2738_v27 = vmul.f32 0.01, %v2482_v12  ;;  %v2026_v28 = vadd.f32 %v1551_v17, %v373_v13  ;;  %v1554_v30 = vpop.f32.mrb[26].mxu0  ;;  %v1810_v31 = vpop.f32.mrb[26].mxu1  ;;  %v440_v17 = vld [vmem:[#allocation2 + $0x278] sm:$0xff] }
 0x136   : > { %v2090_v29 = vadd.f32 %v1807_v18, %v437_v14  ;;  %3442 = vst.msk [vmem:[%s4936_s22 + $0x20] sm:$0xf] %vm3433_vm6, %v4001_v22  ;;  %v2802_v32 = vsel %vm2546_vm9, %v2418_v11, %v2674_v24  ;;  %v2284_v33 = vld [vmem:[#allocation2 + $0x50] sm:$0xff]  ;;  %v2027_v35 = vadd.f32 %v1554_v30, %v374_v19  ;;  %v2091_v36 = vadd.f32 %v1810_v31, %v438_v21  ;;  %v1556_v37 = vpop.f32.mrb[27].mxu0  ;;  %v1812_v38 = vpop.f32.mrb[27].mxu1  ;;  %v377_v18 = vld [vmem:[#allocation2 + $0x80] sm:$0xff] }
 0x137   : > { %3506 = vst.msk [vmem:[%s4936_s22 + $0x120] sm:$0xf] %vm3433_vm6, %v4065_v23  ;;  %v2348_v34 = vld [vmem:[#allocation2 + $0x250] sm:$0xff]  ;;  %v4002_v39 = vpack.c.bf16 %v2802_v32, %v2802_v32  ;;  %v2866_v40 = vsel %vm2610_vm10, %v2482_v12, %v2738_v27  ;;  %v2419_v41 = vadd.f32 %v4916_v20, %v2284_v33  ;;  %v441_v19 = vld [vmem:[#allocation2 + $0x280] sm:$0xff]  ;;  %v378_v31 = vld [vmem:[#allocation2 + $0x88] sm:$0xff] }
 0x138   : > { %v2483_v42 = vadd.f32 %v4916_v20, %v2348_v34  ;;  %2155 = vst.msk [vmem:[#allocation2 + $0x60] sm:$0xff] %vm232_vm3, %v2026_v28  ;;  %2219 = vst.msk [vmem:[#allocation2 + $0x260] sm:$0xff] %vm232_vm3, %v2090_v29  ;;  %v4066_v43 = vpack.c.bf16 %v2866_v40, %v2866_v40  ;;  %v442_v32 = vld [vmem:[#allocation2 + $0x288] sm:$0xff] }
 0x139   : > { %2156 = vst.msk [vmem:[#allocation2 + $0x68] sm:$0xff] %vm232_vm3, %v2027_v35  ;;  %2220 = vst.msk [vmem:[#allocation2 + $0x268] sm:$0xff] %vm232_vm3, %v2091_v36  ;;  %vm2547_vm11 = vcmp.ge.f32.partialorder %v2419_v41, 0.0  ;;  %v2675_v46 = vmul.f32 0.01, %v2419_v41  ;;  %v2285_v48 = vld [vmem:[#allocation2 + $0x58] sm:$0xff] }
 0x13a   : > { %3443 = vst.msk [vmem:[%s4936_s22 + $0x24] sm:$0xf] %vm3433_vm6, %v4002_v39  ;;  %vm2611_vm12 = vcmp.ge.f32.partialorder %v2483_v42, 0.0  ;;  %v2739_v47 = vmul.f32 0.01, %v2483_v42  ;;  %v2349_v49 = vld [vmem:[#allocation2 + $0x258] sm:$0xff]  ;;  %v2420_v52 = vadd.f32 %v4916_v20, %v2285_v48 }
 0x13b   : > { %3507 = vst.msk [vmem:[%s4936_s22 + $0x124] sm:$0xf] %vm3433_vm6, %v4066_v43  ;;  %v2803_v50 = vsel %vm2547_vm11, %v2419_v41, %v2675_v46  ;;  %v2484_v53 = vadd.f32 %v4916_v20, %v2349_v49  ;;  %v1559_v54 = vpop.f32.mrb[28].mxu0  ;;  %v1815_v55 = vpop.f32.mrb[28].mxu1 }
 0x13c   : > { %v2867_v51 = vsel %vm2611_vm12, %v2483_v42, %v2739_v47  ;;  %v4003_v56 = vpack.c.bf16 %v2803_v50, %v2803_v50  ;;  %v2028_v58 = vadd.f32 %v1559_v54, %v375_v44  ;;  %v2092_v59 = vadd.f32 %v1815_v55, %v439_v45  ;;  %v1561_v60 = vpop.f32.mrb[29].mxu0  ;;  %v1817_v61 = vpop.f32.mrb[29].mxu1  ;;  %v379_v55 = vld [vmem:[#allocation2 + $0x90] sm:$0xff] }
 0x13d   : > { %v4067_v57 = vpack.c.bf16 %v2867_v51, %v2867_v51  ;;  %vm2548_vm13 = vcmp.ge.f32.partialorder %v2420_v52, 0.0  ;;  %v2676_v62 = vmul.f32 0.01, %v2420_v52  ;;  %vm2612_vm14 = vcmp.ge.f32.partialorder %v2484_v53, 0.0  ;;  %v1562_v2 = vpop.f32.mrb[30].mxu0  ;;  %v1818_v3 = vpop.f32.mrb[30].mxu1 }
 0x13e   : > { %v2740_v63 = vmul.f32 0.01, %v2484_v53  ;;  %3444 = vst.msk [vmem:[%s4936_s22 + $0x28] sm:$0xf] %vm3433_vm6, %v4003_v56  ;;  %v1564_v11 = vpop.f32.mrb[31].mxu0  ;;  %v1820_v12 = vpop.f32.mrb[31].mxu1  ;;  %v2029_v27 = vadd.f32 %v1562_v2, %v376_v10  ;;  %v2093_v28 = vadd.f32 %v1818_v3, %v440_v17 }
 0x13f   : > { %3508 = vst.msk [vmem:[%s4936_s22 + $0x128] sm:$0xf] %vm3433_vm6, %v4067_v57  ;;  %v2286_v0 = vld [vmem:[#allocation2 + $0x60] sm:$0xff]  ;;  %v2804_v4 = vsel %vm2548_vm13, %v2420_v52, %v2676_v62  ;;  %v443_v56 = vld [vmem:[#allocation2 + $0x290] sm:$0xff] }
 0x140   : > { %v2350_v1 = vld [vmem:[#allocation2 + $0x260] sm:$0xff]  ;;  %2157 = vst.msk [vmem:[#allocation2 + $0x70] sm:$0xff] %vm232_vm3, %v2028_v58  ;;  %2221 = vst.msk [vmem:[#allocation2 + $0x270] sm:$0xff] %vm232_vm3, %v2092_v59  ;;  %v2868_v5 = vsel %vm2612_vm14, %v2484_v53, %v2740_v63  ;;  %v2421_v6 = vadd.f32 %v4916_v20, %v2286_v0  ;;  %v2287_v8 = vld [vmem:[#allocation2 + $0x68] sm:$0xff]  ;;  %v4004_v13 = vpack.c.bf16 %v2804_v4, %v2804_v4 }
 0x141   : > { %v2485_v7 = vadd.f32 %v4916_v20, %v2350_v1  ;;  %v2351_v9 = vld [vmem:[#allocation2 + $0x268] sm:$0xff]  ;;  %v4068_v14 = vpack.c.bf16 %v2868_v5, %v2868_v5  ;;  %v2422_v15 = vadd.f32 %v4916_v20, %v2287_v8  ;;  %2158 = vst.msk [vmem:[#allocation2 + $0x78] sm:$0xff] %vm232_vm3, %v2029_v27  ;;  %2222 = vst.msk [vmem:[#allocation2 + $0x278] sm:$0xff] %vm232_vm3, %v2093_v28  ;;  %v380_v63 = vld [vmem:[#allocation2 + $0x98] sm:$0xff] }
 0x142   : > { %v2486_v16 = vadd.f32 %v4916_v20, %v2351_v9  ;;  %vm2549_vm15 = vcmp.ge.f32.partialorder %v2421_v6, 0.0  ;;  %v2677_v21 = vmul.f32 0.01, %v2421_v6  ;;  %3445 = vst.msk [vmem:[%s4936_s22 + $0x2c] sm:$0xf] %vm3433_vm6, %v4004_v13  ;;  %v1567_v29 = vpop.f32.mrb[32].mxu0 }
 0x143   : > { %vm2613_vm0 = vcmp.ge.f32.partialorder %v2485_v7, 0.0  ;;  %v2741_v22 = vmul.f32 0.01, %v2485_v7  ;;  %3509 = vst.msk [vmem:[%s4936_s22 + $0x12c] sm:$0xf] %vm3433_vm6, %v4068_v14  ;;  %vm2550_vm1 = vcmp.ge.f32.partialorder %v2422_v15, 0.0  ;;  %v2030_v43 = vadd.f32 %v1567_v29, %v377_v18 }
 0x144   : > { %v2678_v23 = vmul.f32 0.01, %v2422_v15  ;;  %vm2614_vm2 = vcmp.ge.f32.partialorder %v2486_v16, 0.0  ;;  %v2742_v24 = vmul.f32 0.01, %v2486_v16  ;;  %v2805_v25 = vsel %vm2549_vm15, %v2421_v6, %v2677_v21  ;;  %v1823_v30 = vpop.f32.mrb[32].mxu1 }
 0x145   : > { %v2869_v26 = vsel %vm2613_vm0, %v2485_v7, %v2741_v22  ;;  %v4005_v33 = vpack.c.bf16 %v2805_v25, %v2805_v25  ;;  %v1569_v37 = vpop.f32.mrb[33].mxu0  ;;  %v1825_v38 = vpop.f32.mrb[33].mxu1  ;;  %v2094_v44 = vadd.f32 %v1823_v30, %v441_v19  ;;  %2159 = vst.msk [vmem:[#allocation2 + $0x80] sm:$0xff] %vm232_vm3, %v2030_v43  ;;  %v444_v0 = vld [vmem:[#allocation2 + $0x298] sm:$0xff] }
 0x146   : > { %v4069_v34 = vpack.c.bf16 %v2869_v26, %v2869_v26  ;;  %v2806_v35 = vsel %vm2550_vm1, %v2422_v15, %v2678_v23  ;;  %v2870_v36 = vsel %vm2614_vm2, %v2486_v16, %v2742_v24  ;;  %v1570_v45 = vpop.f32.mrb[34].mxu0  ;;  %v1826_v46 = vpop.f32.mrb[34].mxu1 }
 0x147   : > { %v4006_v39 = vpack.c.bf16 %v2806_v35, %v2806_v35  ;;  %v4070_v40 = vpack.c.bf16 %v2870_v36, %v2870_v36  ;;  %v2288_v41 = vld [vmem:[#allocation2 + $0x70] sm:$0xff]  ;;  %3446 = vst.msk [vmem:[%s4936_s22 + $0x30] sm:$0xf] %vm3433_vm6, %v4005_v33  ;;  %v2031_v49 = vadd.f32 %v1570_v45, %v378_v31  ;;  %v2095_v50 = vadd.f32 %v1826_v46, %v442_v32  ;;  %v1572_v51 = vpop.f32.mrb[35].mxu0  ;;  %v1828_v52 = vpop.f32.mrb[35].mxu1  ;;  %v381_v31 = vld [vmem:[#allocation2 + $0xa0] sm:$0xff] }
 0x148   : > { %v2352_v42 = vld [vmem:[#allocation2 + $0x270] sm:$0xff]  ;;  %3510 = vst.msk [vmem:[%s4936_s22 + $0x130] sm:$0xf] %vm3433_vm6, %v4069_v34  ;;  %v2423_v47 = vadd.f32 %v4916_v20, %v2288_v41  ;;  %v2289_v1 = vld [vmem:[#allocation2 + $0x78] sm:$0xff]  ;;  %v445_v32 = vld [vmem:[#allocation2 + $0x2a0] sm:$0xff] }
 0x149   : > { %v2487_v48 = vadd.f32 %v4916_v20, %v2352_v42  ;;  %3447 = vst.msk [vmem:[%s4936_s22 + $0x34] sm:$0xf] %vm3433_vm6, %v4006_v39  ;;  %3511 = vst.msk [vmem:[%s4936_s22 + $0x134] sm:$0xf] %vm3433_vm6, %v4070_v40  ;;  %v2353_v2 = vld [vmem:[#allocation2 + $0x278] sm:$0xff]  ;;  %v2424_v7 = vadd.f32 %v4916_v20, %v2289_v1  ;;  %v382_v39 = vld [vmem:[#allocation2 + $0xa8] sm:$0xff] }
 0x14a   : > { %2223 = vst.msk [vmem:[#allocation2 + $0x280] sm:$0xff] %vm232_vm3, %v2094_v44  ;;  %vm2551_vm4 = vcmp.ge.f32.partialorder %v2423_v47, 0.0  ;;  %v2679_v53 = vmul.f32 0.01, %v2423_v47  ;;  %2160 = vst.msk [vmem:[#allocation2 + $0x88] sm:$0xff] %vm232_vm3, %v2031_v49  ;;  %v1575_v61 = vpop.f32.mrb[36].mxu0  ;;  %v2488_v8 = vadd.f32 %v4916_v20, %v2353_v2 }
 0x14b   : > { %vm2615_vm5 = vcmp.ge.f32.partialorder %v2487_v48, 0.0  ;;  %v2743_v54 = vmul.f32 0.01, %v2487_v48  ;;  %2224 = vst.msk [vmem:[#allocation2 + $0x288] sm:$0xff] %vm232_vm3, %v2095_v50  ;;  %v1831_v62 = vpop.f32.mrb[36].mxu1  ;;  %v2032_v3 = vadd.f32 %v1575_v61, %v379_v55  ;;  %v1577_v5 = vpop.f32.mrb[37].mxu0 }
 0x14c   : > { %v2807_v57 = vsel %vm2551_vm4, %v2423_v47, %v2679_v53  ;;  %v2096_v4 = vadd.f32 %v1831_v62, %v443_v56  ;;  %v1833_v6 = vpop.f32.mrb[37].mxu1  ;;  %v1578_v9 = vpop.f32.mrb[38].mxu0  ;;  %v2290_v11 = vld [vmem:[#allocation2 + $0x80] sm:$0xff]  ;;  %vm2552_vm7 = vcmp.ge.f32.partialorder %v2424_v7, 0.0  ;;  %v2680_v17 = vmul.f32 0.01, %v2424_v7 }
 0x14d   : > { %v2871_v58 = vsel %vm2615_vm5, %v2487_v48, %v2743_v54  ;;  %v4007_v59 = vpack.c.bf16 %v2807_v57, %v2807_v57  ;;  %v1834_v10 = vpop.f32.mrb[38].mxu1  ;;  %2161 = vst.msk [vmem:[#allocation2 + $0x90] sm:$0xff] %vm232_vm3, %v2032_v3  ;;  %v2033_v13 = vadd.f32 %v1578_v9, %v380_v63  ;;  %v1580_v15 = vpop.f32.mrb[39].mxu0  ;;  %vm2616_vm8 = vcmp.ge.f32.partialorder %v2488_v8, 0.0  ;;  %v446_v53 = vld [vmem:[#allocation2 + $0x2a8] sm:$0xff]  ;;  %v447_v5 = vld [vmem:[#allocation2 + $0x2b0] sm:$0xff] }
 0x14e   : > { %v4071_v60 = vpack.c.bf16 %v2871_v58, %v2871_v58  ;;  %2225 = vst.msk [vmem:[#allocation2 + $0x290] sm:$0xff] %vm232_vm3, %v2096_v4  ;;  %v2097_v14 = vadd.f32 %v1834_v10, %v444_v0  ;;  %v1836_v16 = vpop.f32.mrb[39].mxu1  ;;  %v2744_v18 = vmul.f32 0.01, %v2488_v8  ;;  %v2425_v19 = vadd.f32 %v4916_v20, %v2290_v11  ;;  %v383_v4 = vld [vmem:[#allocation2 + $0xb0] sm:$0xff] }
 0x14f   : > { %3448 = vst.msk [vmem:[%s4936_s22 + $0x38] sm:$0xf] %vm3433_vm6, %v4007_v59  ;;  %v2808_v24 = vsel %vm2552_vm7, %v2424_v7, %v2680_v17 }
 0x150   : > { %3512 = vst.msk [vmem:[%s4936_s22 + $0x138] sm:$0xf] %vm3433_vm6, %v4071_v60  ;;  %v2872_v25 = vsel %vm2616_vm8, %v2488_v8, %v2744_v18  ;;  %v4008_v28 = vpack.c.bf16 %v2808_v24, %v2808_v24  ;;  %vm2553_vm9 = vcmp.ge.f32.partialorder %v2425_v19, 0.0  ;;  %v2681_v30 = vmul.f32 0.01, %v2425_v19 }
 0x151   : > { %v2354_v12 = vld [vmem:[#allocation2 + $0x280] sm:$0xff]  ;;  %v2291_v22 = vld [vmem:[#allocation2 + $0x88] sm:$0xff]  ;;  %2162 = vst.msk [vmem:[#allocation2 + $0x98] sm:$0xff] %vm232_vm3, %v2033_v13  ;;  %2226 = vst.msk [vmem:[#allocation2 + $0x298] sm:$0xff] %vm232_vm3, %v2097_v14  ;;  %v4072_v29 = vpack.c.bf16 %v2872_v25, %v2872_v25 }
 0x152   : > { %v2489_v21 = vadd.f32 %v4916_v20, %v2354_v12  ;;  %v2355_v23 = vld [vmem:[#allocation2 + $0x288] sm:$0xff]  ;;  %v2426_v26 = vadd.f32 %v4916_v20, %v2291_v22  ;;  %3449 = vst.msk [vmem:[%s4936_s22 + $0x3c] sm:$0xf] %vm3433_vm6, %v4008_v28  ;;  %v2809_v35 = vsel %vm2553_vm9, %v2425_v19, %v2681_v30  ;;  %v1583_v37 = vpop.f32.mrb[40].mxu0  ;;  %v1839_v38 = vpop.f32.mrb[40].mxu1  ;;  %v384_v12 = vld [vmem:[#allocation2 + $0xb8] sm:$0xff] }
 0x153   : > { %v2490_v27 = vadd.f32 %v4916_v20, %v2355_v23  ;;  %3513 = vst.msk [vmem:[%s4936_s22 + $0x13c] sm:$0xf] %vm3433_vm6, %v4072_v29  ;;  %v4009_v40 = vpack.c.bf16 %v2809_v35, %v2809_v35  ;;  %v2034_v45 = vadd.f32 %v1583_v37, %v381_v31  ;;  %v1585_v46 = vpop.f32.mrb[41].mxu0  ;;  %v1841_v47 = vpop.f32.mrb[41].mxu1  ;;  %v2098_v59 = vadd.f32 %v1839_v38, %v445_v32  ;;  %v448_v13 = vld [vmem:[#allocation2 + $0x2b8] sm:$0xff]  ;;  %v385_v38 = vld [vmem:[#allocation2 + $0xc0] sm:$0xff] }
 0x154   : > { %vm2617_vm10 = vcmp.ge.f32.partialorder %v2489_v21, 0.0  ;;  %v2745_v33 = vmul.f32 0.01, %v2489_v21  ;;  %vm2554_vm11 = vcmp.ge.f32.partialorder %v2426_v26, 0.0  ;;  %v2682_v34 = vmul.f32 0.01, %v2426_v26 }
 0x155   : > { %vm2618_vm12 = vcmp.ge.f32.partialorder %v2490_v27, 0.0  ;;  %v2746_v36 = vmul.f32 0.01, %v2490_v27  ;;  %v2292_v43 = vld [vmem:[#allocation2 + $0x90] sm:$0xff]  ;;  %v1586_v52 = vpop.f32.mrb[42].mxu0  ;;  %v1842_v54 = vpop.f32.mrb[42].mxu1 }
 0x156   : > { %v2873_v41 = vsel %vm2617_vm10, %v2489_v21, %v2745_v33  ;;  %v2810_v42 = vsel %vm2554_vm11, %v2426_v26, %v2682_v34  ;;  %v2356_v44 = vld [vmem:[#allocation2 + $0x290] sm:$0xff]  ;;  %v2427_v51 = vadd.f32 %v4916_v20, %v2292_v43  ;;  %3450 = vst.msk [vmem:[%s4936_s22 + $0x40] sm:$0xf] %vm3433_vm6, %v4009_v40  ;;  %v2035_v60 = vadd.f32 %v1586_v52, %v382_v39  ;;  %v1588_v61 = vpop.f32.mrb[43].mxu0  ;;  %v1844_v62 = vpop.f32.mrb[43].mxu1  ;;  %v449_v40 = vld [vmem:[#allocation2 + $0x2c0] sm:$0xff] }
 0x157   : > { %v4073_v48 = vpack.c.bf16 %v2873_v41, %v2873_v41  ;;  %v4010_v49 = vpack.c.bf16 %v2810_v42, %v2810_v42  ;;  %v2874_v50 = vsel %vm2618_vm12, %v2490_v27, %v2746_v36  ;;  %v2491_v56 = vadd.f32 %v4916_v20, %v2356_v44  ;;  %2163 = vst.msk [vmem:[#allocation2 + $0xa0] sm:$0xff] %vm232_vm3, %v2034_v45  ;;  %v5111_v31 = vld [vmem:[%s5487_s2] ss:$0 sm:$0xff] }
 0x158   : > { %v4074_v55 = vpack.c.bf16 %v2874_v50, %v2874_v50  ;;  %v2293_v57 = vld [vmem:[#allocation2 + $0x98] sm:$0xff]  ;;  %vm2555_vm13 = vcmp.ge.f32.partialorder %v2427_v51, 0.0  ;;  %v2683_v63 = vmul.f32 0.01, %v2427_v51  ;;  %2227 = vst.msk [vmem:[#allocation2 + $0x2a0] sm:$0xff] %vm232_vm3, %v2098_v59  ;;  %2164 = vst.msk [vmem:[#allocation2 + $0xa8] sm:$0xff] %vm232_vm3, %v2035_v60  ;;  %v2099_v3 = vadd.f32 %v1842_v54, %v446_v53 }
 0x159   : > { %v2357_v58 = vld [vmem:[#allocation2 + $0x298] sm:$0xff]  ;;  %3514 = vst.msk [vmem:[%s4936_s22 + $0x140] sm:$0xf] %vm3433_vm6, %v4073_v48  ;;  %3451 = vst.msk [vmem:[%s4936_s22 + $0x44] sm:$0xf] %vm3433_vm6, %v4010_v49  ;;  %v2428_v0 = vadd.f32 %v4916_v20, %v2293_v57  ;;  %vm2619_vm14 = vcmp.ge.f32.partialorder %v2491_v56, 0.0 }
 0x15a   : > { %v2492_v1 = vadd.f32 %v4916_v20, %v2357_v58  ;;  %3515 = vst.msk [vmem:[%s4936_s22 + $0x144] sm:$0xf] %vm3433_vm6, %v4074_v55  ;;  %v2747_v2 = vmul.f32 0.01, %v2491_v56  ;;  %v2811_v6 = vsel %vm2555_vm13, %v2427_v51, %v2683_v63  ;;  %v1591_v20 = vpop.f32.mrb[44].mxu0  ;;  %v1847_v11 = vpop.f32.mrb[44].mxu1 }
 0x15b   : > { %vm2556_vm15 = vcmp.ge.f32.partialorder %v2428_v0, 0.0  ;;  %v2684_v7 = vmul.f32 0.01, %v2428_v0  ;;  %v4011_v8 = vpack.c.bf16 %v2811_v6, %v2811_v6  ;;  %2228 = vst.msk [vmem:[#allocation2 + $0x2a8] sm:$0xff] %vm232_vm3, %v2099_v3  ;;  %v2036_v16 = vadd.f32 %v1591_v20, %v383_v4  ;;  %v1593_v18 = vpop.f32.mrb[45].mxu0  ;;  %v1849_v19 = vpop.f32.mrb[45].mxu1 }
 0x15c   : > { %vm2620_vm0 = vcmp.ge.f32.partialorder %v2492_v1, 0.0  ;;  %v2875_v9 = vsel %vm2619_vm14, %v2491_v56, %v2747_v2  ;;  %v2748_v10 = vmul.f32 0.01, %v2492_v1  ;;  %v2100_v17 = vadd.f32 %v1847_v11, %v447_v5  ;;  %v1594_v23 = vpop.f32.mrb[46].mxu0  ;;  %v1850_v24 = vpop.f32.mrb[46].mxu1  ;;  %v386_v51 = vld [vmem:[#allocation2 + $0xc8] sm:$0xff] }
 0x15d   : > { %v4075_v14 = vpack.c.bf16 %v2875_v9, %v2875_v9  ;;  %v2812_v15 = vsel %vm2556_vm15, %v2428_v0, %v2684_v7  ;;  %3452 = vst.msk [vmem:[%s4936_s22 + $0x48] sm:$0xf] %vm3433_vm6, %v4011_v8  ;;  %v2037_v27 = vadd.f32 %v1594_v23, %v384_v12  ;;  %v2101_v28 = vadd.f32 %v1850_v24, %v448_v13  ;;  %v1596_v29 = vpop.f32.mrb[47].mxu0  ;;  %v1852_v30 = vpop.f32.mrb[47].mxu1  ;;  %v450_v57 = vld [vmem:[#allocation2 + $0x2c8] sm:$0xff]  ;;  %v387_v11 = vld [vmem:[#allocation2 + $0xd0] sm:$0xff] }
 0x15e   : > { %v4012_v21 = vpack.c.bf16 %v2812_v15, %v2812_v15  ;;  %v2876_v22 = vsel %vm2620_vm0, %v2492_v1, %v2748_v10  ;;  %v2294_v26 = vld [vmem:[#allocation2 + $0xa0] sm:$0xff]  ;;  %2165 = vst.msk [vmem:[#allocation2 + $0xb0] sm:$0xff] %vm232_vm3, %v2036_v16  ;;  %2229 = vst.msk [vmem:[#allocation2 + $0x2b0] sm:$0xff] %vm232_vm3, %v2100_v17  ;;  %v451_v12 = vld [vmem:[#allocation2 + $0x2d0] sm:$0xff] }
 0x15f   : > { %3516 = vst.msk [vmem:[%s4936_s22 + $0x148] sm:$0xf] %vm3433_vm6, %v4075_v14  ;;  %v4076_v25 = vpack.c.bf16 %v2876_v22, %v2876_v22  ;;  %v2429_v32 = vadd.f32 %v5111_v31, %v2294_v26  ;;  %v2358_v33 = vld [vmem:[#allocation2 + $0x2a0] sm:$0xff]  ;;  %v2295_v34 = vld [vmem:[#allocation2 + $0xa8] sm:$0xff]  ;;  %v388_v19 = vld [vmem:[#allocation2 + $0xd8] sm:$0xff] }
 0x160   : > { %3453 = vst.msk [vmem:[%s4936_s22 + $0x4c] sm:$0xf] %vm3433_vm6, %v4012_v21  ;;  %v2493_v36 = vadd.f32 %v5111_v31, %v2358_v33  ;;  %v2430_v37 = vadd.f32 %v5111_v31, %v2295_v34  ;;  %v452_v21 = vld [vmem:[#allocation2 + $0x2d8] sm:$0xff] }
 0x161   : > { %3517 = vst.msk [vmem:[%s4936_s22 + $0x14c] sm:$0xf] %vm3433_vm6, %v4076_v25  ;;  %vm2557_vm1 = vcmp.ge.f32.partialorder %v2429_v32, 0.0  ;;  %v2685_v35 = vmul.f32 0.01, %v2429_v32 }
 0x162   : > { %2166 = vst.msk [vmem:[#allocation2 + $0xb8] sm:$0xff] %vm232_vm3, %v2037_v27  ;;  %2230 = vst.msk [vmem:[#allocation2 + $0x2b8] sm:$0xff] %vm232_vm3, %v2101_v28  ;;  %v2359_v39 = vld [vmem:[#allocation2 + $0x2a8] sm:$0xff]  ;;  %vm2621_vm2 = vcmp.ge.f32.partialorder %v2493_v36, 0.0  ;;  %v2749_v42 = vmul.f32 0.01, %v2493_v36 }
 0x163   : > { %v2813_v41 = vsel %vm2557_vm1, %v2429_v32, %v2685_v35  ;;  %vm2558_vm4 = vcmp.ge.f32.partialorder %v2430_v37, 0.0  ;;  %v1599_v43 = vpop.f32.mrb[48].mxu0  ;;  %v1855_v44 = vpop.f32.mrb[48].mxu1  ;;  %v2686_v46 = vmul.f32 0.01, %v2430_v37  ;;  %v2494_v47 = vadd.f32 %v5111_v31, %v2359_v39 }
 0x164   : > { %v4013_v45 = vpack.c.bf16 %v2813_v41, %v2813_v41  ;;  %v2038_v48 = vadd.f32 %v1599_v43, %v385_v38  ;;  %v1601_v49 = vpop.f32.mrb[49].mxu0  ;;  %v1857_v50 = vpop.f32.mrb[49].mxu1  ;;  %v2877_v52 = vsel %vm2621_vm2, %v2493_v36, %v2749_v42  ;;  %v2102_v55 = vadd.f32 %v1855_v44, %v449_v40 }
 0x165   : > { %v2296_v53 = vld [vmem:[#allocation2 + $0xb0] sm:$0xff]  ;;  %v1602_v56 = vpop.f32.mrb[50].mxu0  ;;  %v1858_v58 = vpop.f32.mrb[50].mxu1  ;;  %v4077_v59 = vpack.c.bf16 %v2877_v52, %v2877_v52  ;;  %v2814_v60 = vsel %vm2558_vm4, %v2430_v37, %v2686_v46  ;;  %vm2622_vm5 = vcmp.ge.f32.partialorder %v2494_v47, 0.0  ;;  %v2750_v61 = vmul.f32 0.01, %v2494_v47 }
 0x166   : > { %v2360_v54 = vld [vmem:[#allocation2 + $0x2b0] sm:$0xff]  ;;  %3454 = vst.msk [vmem:[%s4936_s22 + $0x50] sm:$0xf] %vm3433_vm6, %v4013_v45  ;;  %v1604_v62 = vpop.f32.mrb[51].mxu0  ;;  %v1860_v63 = vpop.f32.mrb[51].mxu1  ;;  %v4014_v0 = vpack.c.bf16 %v2814_v60, %v2814_v60  ;;  %v2431_v1 = vadd.f32 %v5111_v31, %v2296_v53  ;;  %v2039_v5 = vadd.f32 %v1602_v56, %v386_v51  ;;  %v2103_v9 = vadd.f32 %v1858_v58, %v450_v57  ;;  %v389_v49 = vld [vmem:[#allocation2 + $0xe0] sm:$0xff] }
 0x167   : > { %2167 = vst.msk [vmem:[#allocation2 + $0xc0] sm:$0xff] %vm232_vm3, %v2038_v48  ;;  %v2495_v2 = vadd.f32 %v5111_v31, %v2360_v54  ;;  %2231 = vst.msk [vmem:[#allocation2 + $0x2c0] sm:$0xff] %vm232_vm3, %v2102_v55  ;;  %v2878_v6 = vsel %vm2622_vm5, %v2494_v47, %v2750_v61  ;;  %v453_v52 = vld [vmem:[#allocation2 + $0x2e0] sm:$0xff]  ;;  %v390_v58 = vld [vmem:[#allocation2 + $0xe8] sm:$0xff] }
 0x168   : > { %3518 = vst.msk [vmem:[%s4936_s22 + $0x150] sm:$0xf] %vm3433_vm6, %v4077_v59  ;;  %3455 = vst.msk [vmem:[%s4936_s22 + $0x54] sm:$0xf] %vm3433_vm6, %v4014_v0  ;;  %v4078_v10 = vpack.c.bf16 %v2878_v6, %v2878_v6  ;;  %vm2559_vm7 = vcmp.ge.f32.partialorder %v2431_v1, 0.0  ;;  %v454_v0 = vld [vmem:[#allocation2 + $0x2e8] sm:$0xff] }
 0x169   : > { %v2297_v3 = vld [vmem:[#allocation2 + $0xb8] sm:$0xff]  ;;  %v2687_v20 = vmul.f32 0.01, %v2431_v1  ;;  %vm2623_vm8 = vcmp.ge.f32.partialorder %v2495_v2, 0.0  ;;  %2168 = vst.msk [vmem:[#allocation2 + $0xc8] sm:$0xff] %vm232_vm3, %v2039_v5  ;;  %2232 = vst.msk [vmem:[#allocation2 + $0x2c8] sm:$0xff] %vm232_vm3, %v2103_v9 }
 0x16a   : > { %v2361_v4 = vld [vmem:[#allocation2 + $0x2b8] sm:$0xff]  ;;  %v2432_v7 = vadd.f32 %v5111_v31, %v2297_v3  ;;  %v2751_v13 = vmul.f32 0.01, %v2495_v2  ;;  %3519 = vst.msk [vmem:[%s4936_s22 + $0x154] sm:$0xf] %vm3433_vm6, %v4078_v10  ;;  %v1607_v17 = vpop.f32.mrb[52].mxu0 }
 0x16b   : > { %v2496_v8 = vadd.f32 %v5111_v31, %v2361_v4  ;;  %v2815_v15 = vsel %vm2559_vm7, %v2431_v1, %v2687_v20  ;;  %v1863_v18 = vpop.f32.mrb[52].mxu1  ;;  %v2040_v25 = vadd.f32 %v1607_v17, %v387_v11  ;;  %v1609_v26 = vpop.f32.mrb[53].mxu0 }
 0x16c   : > { %vm2560_vm9 = vcmp.ge.f32.partialorder %v2432_v7, 0.0  ;;  %v2688_v14 = vmul.f32 0.01, %v2432_v7  ;;  %v4015_v22 = vpack.c.bf16 %v2815_v15, %v2815_v15  ;;  %v2879_v23 = vsel %vm2623_vm8, %v2495_v2, %v2751_v13  ;;  %v1865_v27 = vpop.f32.mrb[53].mxu1  ;;  %v1610_v34 = vpop.f32.mrb[54].mxu0 }
 0x16d   : > { %vm2624_vm10 = vcmp.ge.f32.partialorder %v2496_v8, 0.0  ;;  %v2752_v16 = vmul.f32 0.01, %v2496_v8  ;;  %v4079_v28 = vpack.c.bf16 %v2879_v23, %v2879_v23  ;;  %v2104_v33 = vadd.f32 %v1863_v18, %v451_v12  ;;  %v1866_v35 = vpop.f32.mrb[54].mxu1  ;;  %2169 = vst.msk [vmem:[#allocation2 + $0xd0] sm:$0xff] %vm232_vm3, %v2040_v25  ;;  %v1612_v41 = vpop.f32.mrb[55].mxu0 }
 0x16e   : > { %v2816_v24 = vsel %vm2560_vm9, %v2432_v7, %v2688_v14  ;;  %v2298_v32 = vld [vmem:[#allocation2 + $0xc0] sm:$0xff]  ;;  %3456 = vst.msk [vmem:[%s4936_s22 + $0x58] sm:$0xf] %vm3433_vm6, %v4015_v22  ;;  %v2041_v39 = vadd.f32 %v1610_v34, %v388_v19  ;;  %v2105_v40 = vadd.f32 %v1866_v35, %v452_v21  ;;  %v1868_v42 = vpop.f32.mrb[55].mxu1  ;;  %v391_v22 = vld [vmem:[#allocation2 + $0xf0] sm:$0xff] }
 0x16f   : > { %v4016_v29 = vpack.c.bf16 %v2816_v24, %v2816_v24  ;;  %v2880_v30 = vsel %vm2624_vm10, %v2496_v8, %v2752_v16  ;;  %v2433_v37 = vadd.f32 %v5111_v31, %v2298_v32  ;;  %v2362_v38 = vld [vmem:[#allocation2 + $0x2c0] sm:$0xff]  ;;  %3520 = vst.msk [vmem:[%s4936_s22 + $0x158] sm:$0xf] %vm3433_vm6, %v4079_v28  ;;  %v455_v23 = vld [vmem:[#allocation2 + $0x2f0] sm:$0xff]  ;;  %v392_v32 = vld [vmem:[#allocation2 + $0xf8] sm:$0xff] }
 0x170   : > { %v4080_v36 = vpack.c.bf16 %v2880_v30, %v2880_v30  ;;  %v2497_v43 = vadd.f32 %v5111_v31, %v2362_v38  ;;  %2233 = vst.msk [vmem:[#allocation2 + $0x2d0] sm:$0xff] %vm232_vm3, %v2104_v33  ;;  %v2299_v45 = vld [vmem:[#allocation2 + $0xc8] sm:$0xff]  ;;  %2170 = vst.msk [vmem:[#allocation2 + $0xd8] sm:$0xff] %vm232_vm3, %v2041_v39  ;;  %v456_v33 = vld [vmem:[#allocation2 + $0x2f8] sm:$0xff] }
 0x171   : > { %3457 = vst.msk [vmem:[%s4936_s22 + $0x5c] sm:$0xf] %vm3433_vm6, %v4016_v29  ;;  %vm2561_vm11 = vcmp.ge.f32.partialorder %v2433_v37, 0.0  ;;  %v2689_v44 = vmul.f32 0.01, %v2433_v37  ;;  %v2434_v47 = vadd.f32 %v5111_v31, %v2299_v45  ;;  %v2363_v48 = vld [vmem:[#allocation2 + $0x2c8] sm:$0xff] }
 0x172   : > { %3521 = vst.msk [vmem:[%s4936_s22 + $0x15c] sm:$0xf] %vm3433_vm6, %v4080_v36  ;;  %vm2625_vm12 = vcmp.ge.f32.partialorder %v2497_v43, 0.0  ;;  %v2753_v46 = vmul.f32 0.01, %v2497_v43  ;;  %v2498_v51 = vadd.f32 %v5111_v31, %v2363_v48  ;;  %v1615_v56 = vpop.f32.mrb[56].mxu0 }
 0x173   : > { %2234 = vst.msk [vmem:[#allocation2 + $0x2d8] sm:$0xff] %vm232_vm3, %v2105_v40  ;;  %v2817_v50 = vsel %vm2561_vm11, %v2433_v37, %v2689_v44  ;;  %vm2562_vm13 = vcmp.ge.f32.partialorder %v2434_v47, 0.0  ;;  %v2690_v55 = vmul.f32 0.01, %v2434_v47  ;;  %v1871_v57 = vpop.f32.mrb[56].mxu1  ;;  %v2042_v61 = vadd.f32 %v1615_v56, %v389_v49  ;;  %v1617_v62 = vpop.f32.mrb[57].mxu0 }
 0x174   : > { %v4017_v53 = vpack.c.bf16 %v2817_v50, %v2817_v50  ;;  %v2881_v54 = vsel %vm2625_vm12, %v2497_v43, %v2753_v46  ;;  %vm2626_vm14 = vcmp.ge.f32.partialorder %v2498_v51, 0.0  ;;  %v2754_v60 = vmul.f32 0.01, %v2498_v51  ;;  %v1873_v63 = vpop.f32.mrb[57].mxu1  ;;  %v2300_v2 = vld [vmem:[#allocation2 + $0xd0] sm:$0xff]  ;;  %v1618_v4 = vpop.f32.mrb[58].mxu0 }
 0x175   : > { %v4081_v59 = vpack.c.bf16 %v2881_v54, %v2881_v54  ;;  %v2818_v1 = vsel %vm2562_vm13, %v2434_v47, %v2690_v55  ;;  %v2106_v3 = vadd.f32 %v1871_v57, %v453_v52  ;;  %v1874_v5 = vpop.f32.mrb[58].mxu1  ;;  %v2435_v8 = vadd.f32 %v5111_v31, %v2300_v2  ;;  %2171 = vst.msk [vmem:[#allocation2 + $0xe0] sm:$0xff] %vm232_vm3, %v2042_v61  ;;  %v1620_v20 = vpop.f32.mrb[59].mxu0 }
 0x176   : > { %3458 = vst.msk [vmem:[%s4936_s22 + $0x60] sm:$0xf] %vm3433_vm6, %v4017_v53  ;;  %v4018_v6 = vpack.c.bf16 %v2818_v1, %v2818_v1  ;;  %v2882_v7 = vsel %vm2626_vm14, %v2498_v51, %v2754_v60  ;;  %v2043_v10 = vadd.f32 %v1618_v4, %v390_v58  ;;  %v1876_v11 = vpop.f32.mrb[59].mxu1  ;;  %v2107_v16 = vadd.f32 %v1874_v5, %v454_v0  ;;  %v457_v60 = vld [vmem:[#allocation2 + $0x300] sm:$0xff]  ;;  %v394_v4 = vld [vmem:[#allocation2 + $0x108] sm:$0xff] }
 0x177   : > { %3522 = vst.msk [vmem:[%s4936_s22 + $0x160] sm:$0xf] %vm3433_vm6, %v4081_v59  ;;  %v2364_v9 = vld [vmem:[#allocation2 + $0x2d0] sm:$0xff]  ;;  %v4082_v12 = vpack.c.bf16 %v2882_v7, %v2882_v7  ;;  %v2301_v14 = vld [vmem:[#allocation2 + $0xd8] sm:$0xff]  ;;  %vm2563_vm15 = vcmp.ge.f32.partialorder %v2435_v8, 0.0  ;;  %v393_v59 = vld [vmem:[#allocation2 + $0x100] sm:$0xff] }
 0x178   : > { %v2499_v13 = vadd.f32 %v5111_v31, %v2364_v9  ;;  %2235 = vst.msk [vmem:[#allocation2 + $0x2e0] sm:$0xff] %vm232_vm3, %v2106_v3  ;;  %v2691_v17 = vmul.f32 0.01, %v2435_v8  ;;  %v2436_v18 = vadd.f32 %v5111_v31, %v2301_v14  ;;  %2172 = vst.msk [vmem:[#allocation2 + $0xe8] sm:$0xff] %vm232_vm3, %v2043_v10  ;;  %v458_v20 = vld [vmem:[#allocation2 + $0x308] sm:$0xff] }
 0x179   : > { %3459 = vst.msk [vmem:[%s4936_s22 + $0x64] sm:$0xf] %vm3433_vm6, %v4018_v6  ;;  %3523 = vst.msk [vmem:[%s4936_s22 + $0x164] sm:$0xf] %vm3433_vm6, %v4082_v12 }
 0x17a   : > { %v2365_v15 = vld [vmem:[#allocation2 + $0x2d8] sm:$0xff]  ;;  %vm2627_vm0 = vcmp.ge.f32.partialorder %v2499_v13, 0.0  ;;  %v2755_v21 = vmul.f32 0.01, %v2499_v13  ;;  %2236 = vst.msk [vmem:[#allocation2 + $0x2e8] sm:$0xff] %vm232_vm3, %v2107_v16  ;;  %v2819_v24 = vsel %vm2563_vm15, %v2435_v8, %v2691_v17  ;;  %vm2564_vm1 = vcmp.ge.f32.partialorder %v2436_v18, 0.0 }
 0x17b   : > { %v2500_v19 = vadd.f32 %v5111_v31, %v2365_v15  ;;  %v2692_v25 = vmul.f32 0.01, %v2436_v18  ;;  %v4019_v26 = vpack.c.bf16 %v2819_v24, %v2819_v24  ;;  %v1623_v29 = vpop.f32.mrb[60].mxu0  ;;  %v1879_v30 = vpop.f32.mrb[60].mxu1 }
 0x17c   : > { %v2883_v27 = vsel %vm2627_vm0, %v2499_v13, %v2755_v21  ;;  %v2044_v36 = vadd.f32 %v1623_v29, %v391_v22  ;;  %v2108_v37 = vadd.f32 %v1879_v30, %v455_v23  ;;  %v1625_v38 = vpop.f32.mrb[61].mxu0  ;;  %v1881_v39 = vpop.f32.mrb[61].mxu1  ;;  %v2302_v42 = vld [vmem:[#allocation2 + $0xe0] sm:$0xff] }
 0x17d   : > { %vm2628_vm2 = vcmp.ge.f32.partialorder %v2500_v19, 0.0  ;;  %v2756_v28 = vmul.f32 0.01, %v2500_v19  ;;  %v4083_v34 = vpack.c.bf16 %v2883_v27, %v2883_v27  ;;  %v2820_v35 = vsel %vm2564_vm1, %v2436_v18, %v2692_v25  ;;  %3460 = vst.msk [vmem:[%s4936_s22 + $0x68] sm:$0xf] %vm3433_vm6, %v4019_v26  ;;  %v1626_v43 = vpop.f32.mrb[62].mxu0 }
 0x17e   : > { %v4020_v40 = vpack.c.bf16 %v2820_v35, %v2820_v35  ;;  %v1882_v44 = vpop.f32.mrb[62].mxu1  ;;  %v2437_v46 = vadd.f32 %v5111_v31, %v2302_v42  ;;  %2173 = vst.msk [vmem:[#allocation2 + $0xf0] sm:$0xff] %vm232_vm3, %v2044_v36  ;;  %2237 = vst.msk [vmem:[#allocation2 + $0x2f0] sm:$0xff] %vm232_vm3, %v2108_v37  ;;  %v2045_v48 = vadd.f32 %v1626_v43, %v392_v32  ;;  %v1628_v50 = vpop.f32.mrb[63].mxu0  ;;  %v395_v32 = vld [vmem:[#allocation2 + $0x110] sm:$0xff] }
 0x17f   : > { %v2884_v41 = vsel %vm2628_vm2, %v2500_v19, %v2756_v28  ;;  %3524 = vst.msk [vmem:[%s4936_s22 + $0x168] sm:$0xf] %vm3433_vm6, %v4083_v34  ;;  %v2366_v47 = vld [vmem:[#allocation2 + $0x2e0] sm:$0xff]  ;;  %v2109_v49 = vadd.f32 %v1882_v44, %v456_v33  ;;  %v1884_v51 = vpop.f32.mrb[63].mxu1  ;;  %v2303_v53 = vld [vmem:[#allocation2 + $0xe8] sm:$0xff]  ;;  %v459_v33 = vld [vmem:[#allocation2 + $0x310] sm:$0xff] }
 0x180   : > { %v4084_v45 = vpack.c.bf16 %v2884_v41, %v2884_v41  ;;  %3461 = vst.msk [vmem:[%s4936_s22 + $0x6c] sm:$0xf] %vm3433_vm6, %v4020_v40  ;;  %v2501_v52 = vadd.f32 %v5111_v31, %v2366_v47  ;;  %vm2565_vm4 = vcmp.ge.f32.partialorder %v2437_v46, 0.0  ;;  %v2693_v54 = vmul.f32 0.01, %v2437_v46  ;;  %v396_v41 = vld [vmem:[#allocation2 + $0x118] sm:$0xff] }
 0x181   : > { %v2438_v55 = vadd.f32 %v5111_v31, %v2303_v53  ;;  %v2367_v56 = vld [vmem:[#allocation2 + $0x2e8] sm:$0xff]  ;;  %2174 = vst.msk [vmem:[#allocation2 + $0xf8] sm:$0xff] %vm232_vm3, %v2045_v48  ;;  %2238 = vst.msk [vmem:[#allocation2 + $0x2f8] sm:$0xff] %vm232_vm3, %v2109_v49  ;;  %v460_v47 = vld [vmem:[#allocation2 + $0x318] sm:$0xff] }
 0x182   : > { %3525 = vst.msk [vmem:[%s4936_s22 + $0x16c] sm:$0xf] %vm3433_vm6, %v4084_v45  ;;  %vm2629_vm5 = vcmp.ge.f32.partialorder %v2501_v52, 0.0  ;;  %v2757_v57 = vmul.f32 0.01, %v2501_v52  ;;  %v2502_v58 = vadd.f32 %v5111_v31, %v2367_v56  ;;  %v2821_v61 = vsel %vm2565_vm4, %v2437_v46, %v2693_v54  ;;  %v1631_v2 = vpop.f32.mrb[64].mxu0 }
 0x183   : > { %vm2566_vm7 = vcmp.ge.f32.partialorder %v2438_v55, 0.0  ;;  %v2694_v62 = vmul.f32 0.01, %v2438_v55  ;;  %v4021_v63 = vpack.c.bf16 %v2821_v61, %v2821_v61  ;;  %v1887_v3 = vpop.f32.mrb[64].mxu1  ;;  %v2046_v7 = vadd.f32 %v1631_v2, %v393_v59  ;;  %v1633_v9 = vpop.f32.mrb[65].mxu0 }
 0x184   : > { %v2885_v0 = vsel %vm2629_vm5, %v2501_v52, %v2757_v57  ;;  %vm2630_vm8 = vcmp.ge.f32.partialorder %v2502_v58, 0.0  ;;  %v2758_v1 = vmul.f32 0.01, %v2502_v58  ;;  %v2110_v8 = vadd.f32 %v1887_v3, %v457_v60  ;;  %v1889_v10 = vpop.f32.mrb[65].mxu1  ;;  %v1634_v15 = vpop.f32.mrb[66].mxu0  ;;  %v397_v3 = vld [vmem:[#allocation2 + $0x120] sm:$0xff] }
 0x185   : > { %v4085_v5 = vpack.c.bf16 %v2885_v0, %v2885_v0  ;;  %v2822_v6 = vsel %vm2566_vm7, %v2438_v55, %v2694_v62  ;;  %3462 = vst.msk [vmem:[%s4936_s22 + $0x70] sm:$0xf] %vm3433_vm6, %v4021_v63  ;;  %v2304_v13 = vld [vmem:[#allocation2 + $0xf0] sm:$0xff]  ;;  %v1890_v16 = vpop.f32.mrb[66].mxu1  ;;  %v2047_v21 = vadd.f32 %v1634_v15, %v394_v4  ;;  %v1636_v22 = vpop.f32.mrb[67].mxu0  ;;  %v461_v4 = vld [vmem:[#allocation2 + $0x320] sm:$0xff] }
 0x186   : > { %v4022_v11 = vpack.c.bf16 %v2822_v6, %v2822_v6  ;;  %v2886_v12 = vsel %vm2630_vm8, %v2502_v58, %v2758_v1  ;;  %v2368_v14 = vld [vmem:[#allocation2 + $0x2f0] sm:$0xff]  ;;  %v2439_v18 = vadd.f32 %v5111_v31, %v2304_v13  ;;  %2175 = vst.msk [vmem:[#allocation2 + $0x100] sm:$0xff] %vm232_vm3, %v2046_v7  ;;  %2239 = vst.msk [vmem:[#allocation2 + $0x300] sm:$0xff] %vm232_vm3, %v2110_v8  ;;  %v1892_v23 = vpop.f32.mrb[67].mxu1 }
 0x187   : > { %3526 = vst.msk [vmem:[%s4936_s22 + $0x170] sm:$0xf] %vm3433_vm6, %v4085_v5  ;;  %v4086_v17 = vpack.c.bf16 %v2886_v12, %v2886_v12  ;;  %v2503_v19 = vadd.f32 %v5111_v31, %v2368_v14  ;;  %v2111_v26 = vadd.f32 %v1890_v16, %v458_v20  ;;  %v398_v12 = vld [vmem:[#allocation2 + $0x128] sm:$0xff] }
 0x188   : > { %3463 = vst.msk [vmem:[%s4936_s22 + $0x74] sm:$0xf] %vm3433_vm6, %v4022_v11  ;;  %v2305_v24 = vld [vmem:[#allocation2 + $0xf8] sm:$0xff]  ;;  %vm2567_vm9 = vcmp.ge.f32.partialorder %v2439_v18, 0.0  ;;  %v2695_v27 = vmul.f32 0.01, %v2439_v18 }
 0x189   : > { %v2369_v25 = vld [vmem:[#allocation2 + $0x2f8] sm:$0xff]  ;;  %3527 = vst.msk [vmem:[%s4936_s22 + $0x174] sm:$0xf] %vm3433_vm6, %v4086_v17  ;;  %vm2631_vm10 = vcmp.ge.f32.partialorder %v2503_v19, 0.0  ;;  %v2759_v28 = vmul.f32 0.01, %v2503_v19  ;;  %v2440_v29 = vadd.f32 %v5111_v31, %v2305_v24 }
 0x18a   : > { %2176 = vst.msk [vmem:[#allocation2 + $0x108] sm:$0xff] %vm232_vm3, %v2047_v21  ;;  %v2504_v30 = vadd.f32 %v5111_v31, %v2369_v25  ;;  %2240 = vst.msk [vmem:[#allocation2 + $0x308] sm:$0xff] %vm232_vm3, %v2111_v26  ;;  %v2823_v34 = vsel %vm2567_vm9, %v2439_v18, %v2695_v27  ;;  %v1639_v39 = vpop.f32.mrb[68].mxu0  ;;  %v1895_v40 = vpop.f32.mrb[68].mxu1  ;;  %v462_v18 = vld [vmem:[#allocation2 + $0x328] sm:$0xff] }
 0x18b   : > { %v2887_v35 = vsel %vm2631_vm10, %v2503_v19, %v2759_v28  ;;  %v4023_v36 = vpack.c.bf16 %v2823_v34, %v2823_v34  ;;  %vm2568_vm11 = vcmp.ge.f32.partialorder %v2440_v29, 0.0  ;;  %v2696_v38 = vmul.f32 0.01, %v2440_v29  ;;  %v1641_v45 = vpop.f32.mrb[69].mxu0  ;;  %v1897_v46 = vpop.f32.mrb[69].mxu1 }
 0x18c   : > { %v4087_v37 = vpack.c.bf16 %v2887_v35, %v2887_v35  ;;  %vm2632_vm12 = vcmp.ge.f32.partialorder %v2504_v30, 0.0  ;;  %v2760_v42 = vmul.f32 0.01, %v2504_v30  ;;  %v2048_v43 = vadd.f32 %v1639_v39, %v395_v32  ;;  %v1642_v51 = vpop.f32.mrb[70].mxu0  ;;  %v1898_v52 = vpop.f32.mrb[70].mxu1 }
 0x18d   : > { %v2112_v44 = vadd.f32 %v1895_v40, %v459_v33  ;;  %3464 = vst.msk [vmem:[%s4936_s22 + $0x78] sm:$0xf] %vm3433_vm6, %v4023_v36  ;;  %v2824_v48 = vsel %vm2568_vm11, %v2440_v29, %v2696_v38  ;;  %v2306_v49 = vld [vmem:[#allocation2 + $0x100] sm:$0xff]  ;;  %v1644_v57 = vpop.f32.mrb[71].mxu0  ;;  %v1900_v58 = vpop.f32.mrb[71].mxu1  ;;  %v2049_v61 = vadd.f32 %v1642_v51, %v396_v41  ;;  %v2113_v62 = vadd.f32 %v1898_v52, %v460_v47 }
 0x18e   : > { %3528 = vst.msk [vmem:[%s4936_s22 + $0x178] sm:$0xf] %vm3433_vm6, %v4087_v37  ;;  %v2370_v50 = vld [vmem:[#allocation2 + $0x300] sm:$0xff]  ;;  %v4024_v53 = vpack.c.bf16 %v2824_v48, %v2824_v48  ;;  %v2888_v54 = vsel %vm2632_vm12, %v2504_v30, %v2760_v42  ;;  %v2441_v55 = vadd.f32 %v5111_v31, %v2306_v49  ;;  %v400_v49 = vld [vmem:[#allocation2 + $0x138] sm:$0xff] }
 0x18f   : > { %v2505_v56 = vadd.f32 %v5111_v31, %v2370_v50  ;;  %2177 = vst.msk [vmem:[#allocation2 + $0x110] sm:$0xff] %vm232_vm3, %v2048_v43  ;;  %2241 = vst.msk [vmem:[#allocation2 + $0x310] sm:$0xff] %vm232_vm3, %v2112_v44  ;;  %v4088_v59 = vpack.c.bf16 %v2888_v54, %v2888_v54  ;;  %v399_v43 = vld [vmem:[#allocation2 + $0x130] sm:$0xff]  ;;  %v464_v50 = vld [vmem:[#allocation2 + $0x338] sm:$0xff] }
 0x190   : > { %3465 = vst.msk [vmem:[%s4936_s22 + $0x7c] sm:$0xf] %vm3433_vm6, %v4024_v53  ;;  %vm2569_vm13 = vcmp.ge.f32.partialorder %v2441_v55, 0.0  ;;  %v2697_v63 = vmul.f32 0.01, %v2441_v55  ;;  %v463_v44 = vld [vmem:[#allocation2 + $0x330] sm:$0xff] }
 0x191   : > { %v2307_v60 = vld [vmem:[#allocation2 + $0x108] sm:$0xff]  ;;  %vm2633_vm14 = vcmp.ge.f32.partialorder %v2505_v56, 0.0  ;;  %v2761_v0 = vmul.f32 0.01, %v2505_v56  ;;  %3529 = vst.msk [vmem:[%s4936_s22 + $0x17c] sm:$0xf] %vm3433_vm6, %v4088_v59 }
 0x192   : > { %v2442_v1 = vadd.f32 %v5111_v31, %v2307_v60  ;;  %v2371_v2 = vld [vmem:[#allocation2 + $0x308] sm:$0xff]  ;;  %2178 = vst.msk [vmem:[#allocation2 + $0x118] sm:$0xff] %vm232_vm3, %v2049_v61  ;;  %2242 = vst.msk [vmem:[#allocation2 + $0x318] sm:$0xff] %vm232_vm3, %v2113_v62  ;;  %v2825_v5 = vsel %vm2569_vm13, %v2441_v55, %v2697_v63  ;;  %v1647_v20 = vpop.f32.mrb[72].mxu0  ;;  %v1903_v11 = vpop.f32.mrb[72].mxu1 }
 0x193   : > { %v2889_v6 = vsel %vm2633_vm14, %v2505_v56, %v2761_v0  ;;  %v2506_v7 = vadd.f32 %v5111_v31, %v2371_v2  ;;  %v4025_v8 = vpack.c.bf16 %v2825_v5, %v2825_v5  ;;  %v2050_v14 = vadd.f32 %v1647_v20, %v397_v3  ;;  %v1649_v16 = vpop.f32.mrb[73].mxu0  ;;  %v1905_v17 = vpop.f32.mrb[73].mxu1 }
 0x194   : > { %v4089_v9 = vpack.c.bf16 %v2889_v6, %v2889_v6  ;;  %vm2570_vm15 = vcmp.ge.f32.partialorder %v2442_v1, 0.0  ;;  %v2698_v10 = vmul.f32 0.01, %v2442_v1  ;;  %v2114_v15 = vadd.f32 %v1903_v11, %v461_v4  ;;  %v1650_v23 = vpop.f32.mrb[74].mxu0  ;;  %v1906_v24 = vpop.f32.mrb[74].mxu1 }
 0x195   : > { %vm2634_vm0 = vcmp.ge.f32.partialorder %v2506_v7, 0.0  ;;  %v2762_v13 = vmul.f32 0.01, %v2506_v7  ;;  %3466 = vst.msk [vmem:[%s4936_s22 + $0x80] sm:$0xf] %vm3433_vm6, %v4025_v8  ;;  %v1652_v29 = vpop.f32.mrb[75].mxu0  ;;  %v2051_v33 = vadd.f32 %v1650_v23, %v398_v12  ;;  %v2115_v34 = vadd.f32 %v1906_v24, %v462_v18 }
 0x196   : > { %3530 = vst.msk [vmem:[%s4936_s22 + $0x180] sm:$0xf] %vm3433_vm6, %v4089_v9  ;;  %v2826_v19 = vsel %vm2570_vm15, %v2442_v1, %v2698_v10  ;;  %v2308_v21 = vld [vmem:[#allocation2 + $0x110] sm:$0xff]  ;;  %v1908_v30 = vpop.f32.mrb[75].mxu1 }
 0x197   : > { %v2372_v22 = vld [vmem:[#allocation2 + $0x310] sm:$0xff]  ;;  %v4026_v25 = vpack.c.bf16 %v2826_v19, %v2826_v19  ;;  %v2890_v26 = vsel %vm2634_vm0, %v2506_v7, %v2762_v13  ;;  %v2443_v27 = vadd.f32 %v5111_v31, %v2308_v21  ;;  %2179 = vst.msk [vmem:[#allocation2 + $0x120] sm:$0xff] %vm232_vm3, %v2050_v14  ;;  %2243 = vst.msk [vmem:[#allocation2 + $0x320] sm:$0xff] %vm232_vm3, %v2114_v15  ;;  %v401_v14 = vld [vmem:[#allocation2 + $0x140] sm:$0xff] }
 0x198   : > { %v2507_v28 = vadd.f32 %v5111_v31, %v2372_v22  ;;  %v4090_v32 = vpack.c.bf16 %v2890_v26, %v2890_v26  ;;  %2180 = vst.msk [vmem:[#allocation2 + $0x128] sm:$0xff] %vm232_vm3, %v2051_v33  ;;  %2244 = vst.msk [vmem:[#allocation2 + $0x328] sm:$0xff] %vm232_vm3, %v2115_v34  ;;  %v465_v15 = vld [vmem:[#allocation2 + $0x340] sm:$0xff] }
 0x199   : > { %3467 = vst.msk [vmem:[%s4936_s22 + $0x84] sm:$0xf] %vm3433_vm6, %v4026_v25  ;;  %vm2571_vm1 = vcmp.ge.f32.partialorder %v2443_v27, 0.0  ;;  %v2699_v35 = vmul.f32 0.01, %v2443_v27  ;;  %v2309_v37 = vld [vmem:[#allocation2 + $0x118] sm:$0xff] }
 0x19a   : > { %vm2635_vm2 = vcmp.ge.f32.partialorder %v2507_v28, 0.0  ;;  %v2763_v36 = vmul.f32 0.01, %v2507_v28  ;;  %3531 = vst.msk [vmem:[%s4936_s22 + $0x184] sm:$0xf] %vm3433_vm6, %v4090_v32  ;;  %v2373_v38 = vld [vmem:[#allocation2 + $0x318] sm:$0xff]  ;;  %v2444_v41 = vadd.f32 %v5111_v31, %v2309_v37 }
 0x19b   : > { %v2827_v39 = vsel %vm2571_vm1, %v2443_v27, %v2699_v35  ;;  %v2508_v42 = vadd.f32 %v5111_v31, %v2373_v38  ;;  %v1655_v47 = vpop.f32.mrb[76].mxu0  ;;  %v1911_v48 = vpop.f32.mrb[76].mxu1  ;;  %v402_v27 = vld [vmem:[#allocation2 + $0x148] sm:$0xff] }
 0x19c   : > { %v2891_v40 = vsel %vm2635_vm2, %v2507_v28, %v2763_v36  ;;  %v4027_v45 = vpack.c.bf16 %v2827_v39, %v2827_v39  ;;  %vm2572_vm4 = vcmp.ge.f32.partialorder %v2444_v41, 0.0  ;;  %v2700_v51 = vmul.f32 0.01, %v2444_v41  ;;  %v1657_v57 = vpop.f32.mrb[77].mxu0  ;;  %v1913_v58 = vpop.f32.mrb[77].mxu1  ;;  %v466_v28 = vld [vmem:[#allocation2 + $0x348] sm:$0xff] }
 0x19d   : > { %v4091_v46 = vpack.c.bf16 %v2891_v40, %v2891_v40  ;;  %vm2636_vm5 = vcmp.ge.f32.partialorder %v2508_v42, 0.0  ;;  %v2764_v52 = vmul.f32 0.01, %v2508_v42  ;;  %v2052_v55 = vadd.f32 %v1655_v47, %v399_v43  ;;  %v1658_v63 = vpop.f32.mrb[78].mxu0  ;;  %v1914_v0 = vpop.f32.mrb[78].mxu1  ;;  %v468_v57 = vld [vmem:[#allocation2 + $0x358] sm:$0xff] }
 0x19e   : > { %3468 = vst.msk [vmem:[%s4936_s22 + $0x88] sm:$0xf] %vm3433_vm6, %v4027_v45  ;;  %v2310_v53 = vld [vmem:[#allocation2 + $0x120] sm:$0xff]  ;;  %v2116_v56 = vadd.f32 %v1911_v48, %v463_v44  ;;  %v2828_v59 = vsel %vm2572_vm4, %v2444_v41, %v2700_v51  ;;  %v2053_v3 = vadd.f32 %v1658_v63, %v400_v49  ;;  %v2117_v4 = vadd.f32 %v1914_v0, %v464_v50  ;;  %v1660_v5 = vpop.f32.mrb[79].mxu0  ;;  %v1916_v6 = vpop.f32.mrb[79].mxu1  ;;  %v403_v50 = vld [vmem:[#allocation2 + $0x150] sm:$0xff] }
 0x19f   : > { %3532 = vst.msk [vmem:[%s4936_s22 + $0x188] sm:$0xf] %vm3433_vm6, %v4091_v46  ;;  %v2374_v54 = vld [vmem:[#allocation2 + $0x320] sm:$0xff]  ;;  %v2892_v60 = vsel %vm2636_vm5, %v2508_v42, %v2764_v52  ;;  %v2445_v61 = vadd.f32 %v5111_v31, %v2310_v53  ;;  %v4028_v1 = vpack.c.bf16 %v2828_v59, %v2828_v59  ;;  %v2311_v9 = vld [vmem:[#allocation2 + $0x128] sm:$0xff]  ;;  %v467_v51 = vld [vmem:[#allocation2 + $0x350] sm:$0xff] }
 0x1a0   : > { %v2509_v62 = vadd.f32 %v5111_v31, %v2374_v54  ;;  %v4092_v2 = vpack.c.bf16 %v2892_v60, %v2892_v60  ;;  %2181 = vst.msk [vmem:[#allocation2 + $0x130] sm:$0xff] %vm232_vm3, %v2052_v55  ;;  %2245 = vst.msk [vmem:[#allocation2 + $0x330] sm:$0xff] %vm232_vm3, %v2116_v56  ;;  %v2375_v10 = vld [vmem:[#allocation2 + $0x328] sm:$0xff]  ;;  %v2446_v12 = vadd.f32 %v5111_v31, %v2311_v9  ;;  %v404_v56 = vld [vmem:[#allocation2 + $0x158] sm:$0xff] }
 0x1a1   : > { %vm2573_vm7 = vcmp.ge.f32.partialorder %v2445_v61, 0.0  ;;  %v2701_v7 = vmul.f32 0.01, %v2445_v61  ;;  %3469 = vst.msk [vmem:[%s4936_s22 + $0x8c] sm:$0xf] %vm3433_vm6, %v4028_v1  ;;  %v2510_v13 = vadd.f32 %v5111_v31, %v2375_v10 }
 0x1a2   : > { %vm2637_vm8 = vcmp.ge.f32.partialorder %v2509_v62, 0.0  ;;  %v2765_v8 = vmul.f32 0.01, %v2509_v62  ;;  %3533 = vst.msk [vmem:[%s4936_s22 + $0x18c] sm:$0xf] %vm3433_vm6, %v4092_v2  ;;  %v1663_v18 = vpop.f32.mrb[80].mxu0 }
 0x1a3   : > { %2182 = vst.msk [vmem:[#allocation2 + $0x138] sm:$0xff] %vm232_vm3, %v2053_v3  ;;  %2246 = vst.msk [vmem:[#allocation2 + $0x338] sm:$0xff] %vm232_vm3, %v2117_v4  ;;  %v2829_v20 = vsel %vm2573_vm7, %v2445_v61, %v2701_v7  ;;  %v1919_v19 = vpop.f32.mrb[80].mxu1  ;;  %vm2574_vm9 = vcmp.ge.f32.partialorder %v2446_v12, 0.0  ;;  %v2702_v21 = vmul.f32 0.01, %v2446_v12  ;;  %v2054_v23 = vadd.f32 %v1663_v18, %v401_v14 }
 0x1a4   : > { %v2893_v11 = vsel %vm2637_vm8, %v2509_v62, %v2765_v8  ;;  %v4029_v16 = vpack.c.bf16 %v2829_v20, %v2829_v20  ;;  %vm2638_vm10 = vcmp.ge.f32.partialorder %v2510_v13, 0.0  ;;  %v2766_v22 = vmul.f32 0.01, %v2510_v13  ;;  %v1665_v25 = vpop.f32.mrb[81].mxu0  ;;  %v1921_v26 = vpop.f32.mrb[81].mxu1 }
 0x1a5   : > { %v4093_v17 = vpack.c.bf16 %v2893_v11, %v2893_v11  ;;  %v2118_v24 = vadd.f32 %v1919_v19, %v465_v15  ;;  %v2830_v29 = vsel %vm2574_vm9, %v2446_v12, %v2702_v21  ;;  %v1666_v34 = vpop.f32.mrb[82].mxu0  ;;  %v1922_v35 = vpop.f32.mrb[82].mxu1  ;;  %2183 = vst.msk [vmem:[#allocation2 + $0x140] sm:$0xff] %vm232_vm3, %v2054_v23  ;;  %v405_v15 = vld [vmem:[#allocation2 + $0x160] sm:$0xff] }
 0x1a6   : > { %3470 = vst.msk [vmem:[%s4936_s22 + $0x90] sm:$0xf] %vm3433_vm6, %v4029_v16  ;;  %v2894_v30 = vsel %vm2638_vm10, %v2510_v13, %v2766_v22  ;;  %v4030_v36 = vpack.c.bf16 %v2830_v29, %v2830_v29  ;;  %v1668_v40 = vpop.f32.mrb[83].mxu0  ;;  %v1924_v41 = vpop.f32.mrb[83].mxu1  ;;  %v2055_v44 = vadd.f32 %v1666_v34, %v402_v27  ;;  %v2119_v45 = vadd.f32 %v1922_v35, %v466_v28  ;;  %v469_v16 = vld [vmem:[#allocation2 + $0x360] sm:$0xff] }
 0x1a7   : > { %3534 = vst.msk [vmem:[%s4936_s22 + $0x190] sm:$0xf] %vm3433_vm6, %v4093_v17  ;;  %v2312_v32 = vld [vmem:[#allocation2 + $0x130] sm:$0xff]  ;;  %v4094_v37 = vpack.c.bf16 %v2894_v30, %v2894_v30 }
 0x1a8   : > { %v2376_v33 = vld [vmem:[#allocation2 + $0x330] sm:$0xff]  ;;  %v2447_v38 = vadd.f32 %v5111_v31, %v2312_v32  ;;  %2247 = vst.msk [vmem:[#allocation2 + $0x340] sm:$0xff] %vm232_vm3, %v2118_v24  ;;  %2184 = vst.msk [vmem:[#allocation2 + $0x148] sm:$0xff] %vm232_vm3, %v2055_v44 }
 0x1a9   : > { %v2511_v39 = vadd.f32 %v5111_v31, %v2376_v33  ;;  %3471 = vst.msk [vmem:[%s4936_s22 + $0x94] sm:$0xf] %vm3433_vm6, %v4030_v36  ;;  %3535 = vst.msk [vmem:[%s4936_s22 + $0x194] sm:$0xf] %vm3433_vm6, %v4094_v37 }
 0x1aa   : > { %v2313_v42 = vld [vmem:[#allocation2 + $0x138] sm:$0xff]  ;;  %vm2575_vm11 = vcmp.ge.f32.partialorder %v2447_v38, 0.0  ;;  %v2703_v46 = vmul.f32 0.01, %v2447_v38  ;;  %2248 = vst.msk [vmem:[#allocation2 + $0x348] sm:$0xff] %vm232_vm3, %v2119_v45  ;;  %v1671_v54 = vpop.f32.mrb[84].mxu0 }
 0x1ab   : > { %v2377_v43 = vld [vmem:[#allocation2 + $0x338] sm:$0xff]  ;;  %vm2639_vm12 = vcmp.ge.f32.partialorder %v2511_v39, 0.0  ;;  %v2767_v47 = vmul.f32 0.01, %v2511_v39  ;;  %v2448_v48 = vadd.f32 %v5111_v31, %v2313_v42  ;;  %v1927_v55 = vpop.f32.mrb[84].mxu1  ;;  %v1673_v61 = vpop.f32.mrb[85].mxu0  ;;  %v2056_v0 = vadd.f32 %v1671_v54, %v403_v50 }
 0x1ac   : > { %v2512_v49 = vadd.f32 %v5111_v31, %v2377_v43  ;;  %v2831_v52 = vsel %vm2575_vm11, %v2447_v38, %v2703_v46  ;;  %v1929_v62 = vpop.f32.mrb[85].mxu1  ;;  %v2120_v1 = vadd.f32 %v1927_v55, %v467_v51  ;;  %v1674_v2 = vpop.f32.mrb[86].mxu0  ;;  %v2314_v5 = vld [vmem:[#allocation2 + $0x140] sm:$0xff]  ;;  %v470_v54 = vld [vmem:[#allocation2 + $0x368] sm:$0xff]  ;;  %v407_v55 = vld [vmem:[#allocation2 + $0x170] sm:$0xff] }
 0x1ad   : > { %v2895_v53 = vsel %vm2639_vm12, %v2511_v39, %v2767_v47  ;;  %v4031_v58 = vpack.c.bf16 %v2831_v52, %v2831_v52  ;;  %vm2576_vm13 = vcmp.ge.f32.partialorder %v2448_v48, 0.0  ;;  %v2704_v60 = vmul.f32 0.01, %v2448_v48  ;;  %v1930_v3 = vpop.f32.mrb[86].mxu1  ;;  %v1676_v9 = vpop.f32.mrb[87].mxu0  ;;  %2185 = vst.msk [vmem:[#allocation2 + $0x150] sm:$0xff] %vm232_vm3, %v2056_v0 }
 0x1ae   : > { %v4095_v59 = vpack.c.bf16 %v2895_v53, %v2895_v53  ;;  %vm2640_vm14 = vcmp.ge.f32.partialorder %v2512_v49, 0.0  ;;  %v2768_v63 = vmul.f32 0.01, %v2512_v49  ;;  %v2057_v7 = vadd.f32 %v1674_v2, %v404_v56  ;;  %v1932_v10 = vpop.f32.mrb[87].mxu1  ;;  %2249 = vst.msk [vmem:[#allocation2 + $0x350] sm:$0xff] %vm232_vm3, %v2120_v1  ;;  %v406_v47 = vld [vmem:[#allocation2 + $0x168] sm:$0xff] }
 0x1af   : > { %3472 = vst.msk [vmem:[%s4936_s22 + $0x98] sm:$0xf] %vm3433_vm6, %v4031_v58  ;;  %v2832_v4 = vsel %vm2576_vm13, %v2448_v48, %v2704_v60  ;;  %v2378_v6 = vld [vmem:[#allocation2 + $0x340] sm:$0xff]  ;;  %v2121_v8 = vadd.f32 %v1930_v3, %v468_v57  ;;  %v2449_v12 = vadd.f32 %v5111_v31, %v2314_v5  ;;  %v2315_v19 = vld [vmem:[#allocation2 + $0x148] sm:$0xff]  ;;  %v471_v56 = vld [vmem:[#allocation2 + $0x370] sm:$0xff] }
 0x1b0   : > { %3536 = vst.msk [vmem:[%s4936_s22 + $0x198] sm:$0xf] %vm3433_vm6, %v4095_v59  ;;  %v4032_v20 = vpack.c.bf16 %v2832_v4, %v2832_v4  ;;  %v2896_v11 = vsel %vm2640_vm14, %v2512_v49, %v2768_v63  ;;  %v2513_v13 = vadd.f32 %v5111_v31, %v2378_v6  ;;  %v2450_v24 = vadd.f32 %v5111_v31, %v2315_v19  ;;  %v5295_v42 = vld [vmem:[%s5487_s2] ss:$0 sm:$0xff]  ;;  %v408_v3 = vld [vmem:[#allocation2 + $0x178] sm:$0xff] }
 0x1b1   : > { %v4096_v14 = vpack.c.bf16 %v2896_v11, %v2896_v11  ;;  %2186 = vst.msk [vmem:[#allocation2 + $0x158] sm:$0xff] %vm232_vm3, %v2057_v7  ;;  %2250 = vst.msk [vmem:[#allocation2 + $0x358] sm:$0xff] %vm232_vm3, %v2121_v8  ;;  %vm2577_vm15 = vcmp.ge.f32.partialorder %v2449_v12, 0.0  ;;  %v2705_v17 = vmul.f32 0.01, %v2449_v12  ;;  %v2379_v21 = vld [vmem:[#allocation2 + $0x348] sm:$0xff] }
 0x1b2   : > { %3473 = vst.msk [vmem:[%s4936_s22 + $0x9c] sm:$0xf] %vm3433_vm6, %v4032_v20  ;;  %vm2641_vm0 = vcmp.ge.f32.partialorder %v2513_v13, 0.0  ;;  %v2769_v18 = vmul.f32 0.01, %v2513_v13  ;;  %v2514_v25 = vadd.f32 %v5111_v31, %v2379_v21  ;;  %v1679_v26 = vpop.f32.mrb[88].mxu0 }
 0x1b3   : > { %3537 = vst.msk [vmem:[%s4936_s22 + $0x19c] sm:$0xf] %vm3433_vm6, %v4096_v14  ;;  %v2833_v22 = vsel %vm2577_vm15, %v2449_v12, %v2705_v17  ;;  %v1935_v27 = vpop.f32.mrb[88].mxu1  ;;  %v2058_v30 = vadd.f32 %v1679_v26, %v405_v15  ;;  %v1681_v33 = vpop.f32.mrb[89].mxu0  ;;  %vm2578_vm1 = vcmp.ge.f32.partialorder %v2450_v24, 0.0  ;;  %v472_v4 = vld [vmem:[#allocation2 + $0x378] sm:$0xff] }
 0x1b4   : > { %v2897_v23 = vsel %vm2641_vm0, %v2513_v13, %v2769_v18  ;;  %v4033_v28 = vpack.c.bf16 %v2833_v22, %v2833_v22  ;;  %v2122_v32 = vadd.f32 %v1935_v27, %v469_v16  ;;  %v1937_v34 = vpop.f32.mrb[89].mxu1  ;;  %v2706_v35 = vmul.f32 0.01, %v2450_v24  ;;  %v2316_v37 = vld [vmem:[#allocation2 + $0x150] sm:$0xff]  ;;  %v1682_v31 = vpop.f32.mrb[90].mxu0  ;;  %v409_v27 = vld [vmem:[#allocation2 + $0x180] sm:$0xff] }
 0x1b5   : > { %v4097_v29 = vpack.c.bf16 %v2897_v23, %v2897_v23  ;;  %vm2642_vm2 = vcmp.ge.f32.partialorder %v2514_v25, 0.0  ;;  %v2770_v36 = vmul.f32 0.01, %v2514_v25  ;;  %v2380_v38 = vld [vmem:[#allocation2 + $0x350] sm:$0xff]  ;;  %2187 = vst.msk [vmem:[#allocation2 + $0x160] sm:$0xff] %vm232_vm3, %v2058_v30  ;;  %v1938_v39 = vpop.f32.mrb[90].mxu1  ;;  %v2451_v43 = vadd.f32 %v5295_v42, %v2316_v37 }
 0x1b6   : > { %3474 = vst.msk [vmem:[%s4936_s22 + $0xa0] sm:$0xf] %vm3433_vm6, %v4033_v28  ;;  %v2834_v40 = vsel %vm2578_vm1, %v2450_v24, %v2706_v35  ;;  %v2515_v44 = vadd.f32 %v5295_v42, %v2380_v38  ;;  %v1684_v48 = vpop.f32.mrb[91].mxu0  ;;  %v1940_v49 = vpop.f32.mrb[91].mxu1  ;;  %v2059_v63 = vadd.f32 %v1682_v31, %v406_v47  ;;  %v2123_v0 = vadd.f32 %v1938_v39, %v470_v54  ;;  %v473_v28 = vld [vmem:[#allocation2 + $0x380] sm:$0xff]  ;;  %v474_v37 = vld [vmem:[#allocation2 + $0x388] sm:$0xff] }
 0x1b7   : > { %3538 = vst.msk [vmem:[%s4936_s22 + $0x1a0] sm:$0xf] %vm3433_vm6, %v4097_v29  ;;  %v2898_v41 = vsel %vm2642_vm2, %v2514_v25, %v2770_v36  ;;  %v4034_v50 = vpack.c.bf16 %v2834_v40, %v2834_v40  ;;  %vm2579_vm4 = vcmp.ge.f32.partialorder %v2451_v43, 0.0  ;;  %v2707_v57 = vmul.f32 0.01, %v2451_v43  ;;  %v410_v36 = vld [vmem:[#allocation2 + $0x188] sm:$0xff] }
 0x1b8   : > { %2251 = vst.msk [vmem:[#allocation2 + $0x360] sm:$0xff] %vm232_vm3, %v2122_v32  ;;  %v2317_v45 = vld [vmem:[#allocation2 + $0x158] sm:$0xff]  ;;  %v4098_v51 = vpack.c.bf16 %v2898_v41, %v2898_v41  ;;  %vm2643_vm5 = vcmp.ge.f32.partialorder %v2515_v44, 0.0  ;;  %v2771_v58 = vmul.f32 0.01, %v2515_v44  ;;  %2188 = vst.msk [vmem:[#allocation2 + $0x168] sm:$0xff] %vm232_vm3, %v2059_v63 }
 0x1b9   : > { %v2381_v46 = vld [vmem:[#allocation2 + $0x358] sm:$0xff]  ;;  %v2452_v52 = vadd.f32 %v5295_v42, %v2317_v45  ;;  %3475 = vst.msk [vmem:[%s4936_s22 + $0xa4] sm:$0xf] %vm3433_vm6, %v4034_v50  ;;  %v2835_v61 = vsel %vm2579_vm4, %v2451_v43, %v2707_v57 }
 0x1ba   : > { %v2516_v53 = vadd.f32 %v5295_v42, %v2381_v46  ;;  %3539 = vst.msk [vmem:[%s4936_s22 + $0x1a4] sm:$0xf] %vm3433_vm6, %v4098_v51  ;;  %v2899_v62 = vsel %vm2643_vm5, %v2515_v44, %v2771_v58  ;;  %v1687_v1 = vpop.f32.mrb[92].mxu0  ;;  %v1943_v2 = vpop.f32.mrb[92].mxu1  ;;  %v4035_v5 = vpack.c.bf16 %v2835_v61, %v2835_v61 }
 0x1bb   : > { %vm2580_vm7 = vcmp.ge.f32.partialorder %v2452_v52, 0.0  ;;  %v2708_v59 = vmul.f32 0.01, %v2452_v52  ;;  %v4099_v6 = vpack.c.bf16 %v2899_v62, %v2899_v62  ;;  %v1689_v9 = vpop.f32.mrb[93].mxu0  ;;  %v1945_v10 = vpop.f32.mrb[93].mxu1  ;;  %2252 = vst.msk [vmem:[#allocation2 + $0x368] sm:$0xff] %vm232_vm3, %v2123_v0  ;;  %v2060_v14 = vadd.f32 %v1687_v1, %v407_v55 }
 0x1bc   : > { %vm2644_vm8 = vcmp.ge.f32.partialorder %v2516_v53, 0.0  ;;  %v2772_v60 = vmul.f32 0.01, %v2516_v53  ;;  %v2318_v12 = vld [vmem:[#allocation2 + $0x160] sm:$0xff]  ;;  %v2124_v15 = vadd.f32 %v1943_v2, %v471_v56  ;;  %v1690_v16 = vpop.f32.mrb[94].mxu0  ;;  %v1946_v17 = vpop.f32.mrb[94].mxu1 }
 0x1bd   : > { %v2836_v7 = vsel %vm2580_vm7, %v2452_v52, %v2708_v59  ;;  %3476 = vst.msk [vmem:[%s4936_s22 + $0xa8] sm:$0xf] %vm3433_vm6, %v4035_v5  ;;  %3540 = vst.msk [vmem:[%s4936_s22 + $0x1a8] sm:$0xf] %vm3433_vm6, %v4099_v6  ;;  %v2453_v18 = vadd.f32 %v5295_v42, %v2318_v12  ;;  %v2061_v21 = vadd.f32 %v1690_v16, %v408_v3  ;;  %v1692_v23 = vpop.f32.mrb[95].mxu0  ;;  %v1948_v24 = vpop.f32.mrb[95].mxu1 }
 0x1be   : > { %v2900_v8 = vsel %vm2644_vm8, %v2516_v53, %v2772_v60  ;;  %v4036_v20 = vpack.c.bf16 %v2836_v7, %v2836_v7  ;;  %v2125_v22 = vadd.f32 %v1946_v17, %v472_v4  ;;  %2189 = vst.msk [vmem:[#allocation2 + $0x170] sm:$0xff] %vm232_vm3, %v2060_v14  ;;  %2253 = vst.msk [vmem:[#allocation2 + $0x370] sm:$0xff] %vm232_vm3, %v2124_v15  ;;  %v411_v3 = vld [vmem:[#allocation2 + $0x190] sm:$0xff] }
 0x1bf   : > { %v4100_v11 = vpack.c.bf16 %v2900_v8, %v2900_v8  ;;  %v2382_v13 = vld [vmem:[#allocation2 + $0x360] sm:$0xff]  ;;  %vm2581_vm9 = vcmp.ge.f32.partialorder %v2453_v18, 0.0  ;;  %v2709_v25 = vmul.f32 0.01, %v2453_v18  ;;  %2190 = vst.msk [vmem:[#allocation2 + $0x178] sm:$0xff] %vm232_vm3, %v2061_v21  ;;  %v2319_v38 = vld [vmem:[#allocation2 + $0x168] sm:$0xff] }
 0x1c0   : > { %v2517_v19 = vadd.f32 %v5295_v42, %v2382_v13  ;;  %3477 = vst.msk [vmem:[%s4936_s22 + $0xac] sm:$0xf] %vm3433_vm6, %v4036_v20  ;;  %v2454_v44 = vadd.f32 %v5295_v42, %v2319_v38  ;;  %v475_v4 = vld [vmem:[#allocation2 + $0x390] sm:$0xff]  ;;  %v412_v20 = vld [vmem:[#allocation2 + $0x198] sm:$0xff] }
 0x1c1   : > { %3541 = vst.msk [vmem:[%s4936_s22 + $0x1ac] sm:$0xf] %vm3433_vm6, %v4100_v11  ;;  %v2837_v29 = vsel %vm2581_vm9, %v2453_v18, %v2709_v25  ;;  %v476_v25 = vld [vmem:[#allocation2 + $0x398] sm:$0xff] }
 0x1c2   : > { %vm2645_vm10 = vcmp.ge.f32.partialorder %v2517_v19, 0.0  ;;  %v2773_v26 = vmul.f32 0.01, %v2517_v19  ;;  %2254 = vst.msk [vmem:[#allocation2 + $0x378] sm:$0xff] %vm232_vm3, %v2125_v22  ;;  %v4037_v32 = vpack.c.bf16 %v2837_v29, %v2837_v29  ;;  %v1695_v34 = vpop.f32.mrb[96].mxu0  ;;  %v1951_v35 = vpop.f32.mrb[96].mxu1 }
 0x1c3   : > { %v2383_v31 = vld [vmem:[#allocation2 + $0x368] sm:$0xff]  ;;  %v2062_v39 = vadd.f32 %v1695_v34, %v409_v27  ;;  %v2126_v40 = vadd.f32 %v1951_v35, %v473_v28  ;;  %v1697_v41 = vpop.f32.mrb[97].mxu0  ;;  %v1953_v43 = vpop.f32.mrb[97].mxu1  ;;  %vm2582_vm11 = vcmp.ge.f32.partialorder %v2454_v44, 0.0  ;;  %v2710_v54 = vmul.f32 0.01, %v2454_v44 }
 0x1c4   : > { %v2901_v30 = vsel %vm2645_vm10, %v2517_v19, %v2773_v26  ;;  %3478 = vst.msk [vmem:[%s4936_s22 + $0xb0] sm:$0xf] %vm3433_vm6, %v4037_v32  ;;  %v2518_v45 = vadd.f32 %v5295_v42, %v2383_v31  ;;  %v1698_v46 = vpop.f32.mrb[98].mxu0  ;;  %v1954_v47 = vpop.f32.mrb[98].mxu1  ;;  %v477_v41 = vld [vmem:[#allocation2 + $0x3a0] sm:$0xff] }
 0x1c5   : > { %v4101_v33 = vpack.c.bf16 %v2901_v30, %v2901_v30  ;;  %v2320_v48 = vld [vmem:[#allocation2 + $0x170] sm:$0xff]  ;;  %2191 = vst.msk [vmem:[#allocation2 + $0x180] sm:$0xff] %vm232_vm3, %v2062_v39  ;;  %2255 = vst.msk [vmem:[#allocation2 + $0x380] sm:$0xff] %vm232_vm3, %v2126_v40  ;;  %v2063_v50 = vadd.f32 %v1698_v46, %v410_v36  ;;  %v2127_v51 = vadd.f32 %v1954_v47, %v474_v37  ;;  %v1700_v52 = vpop.f32.mrb[99].mxu0  ;;  %v1956_v53 = vpop.f32.mrb[99].mxu1  ;;  %v413_v40 = vld [vmem:[#allocation2 + $0x1a0] sm:$0xff] }
 0x1c6   : > { %v2384_v49 = vld [vmem:[#allocation2 + $0x370] sm:$0xff]  ;;  %vm2646_vm12 = vcmp.ge.f32.partialorder %v2518_v45, 0.0  ;;  %v2774_v55 = vmul.f32 0.01, %v2518_v45  ;;  %v2455_v56 = vadd.f32 %v5295_v42, %v2320_v48  ;;  %v2321_v58 = vld [vmem:[#allocation2 + $0x178] sm:$0xff]  ;;  %v2838_v60 = vsel %vm2582_vm11, %v2454_v44, %v2710_v54 }
 0x1c7   : > { %3542 = vst.msk [vmem:[%s4936_s22 + $0x1b0] sm:$0xf] %vm3433_vm6, %v4101_v33  ;;  %v2519_v57 = vadd.f32 %v5295_v42, %v2384_v49  ;;  %v2456_v62 = vadd.f32 %v5295_v42, %v2321_v58  ;;  %v4038_v0 = vpack.c.bf16 %v2838_v60, %v2838_v60 }
 0x1c8   : > { %2192 = vst.msk [vmem:[#allocation2 + $0x188] sm:$0xff] %vm232_vm3, %v2063_v50  ;;  %2256 = vst.msk [vmem:[#allocation2 + $0x388] sm:$0xff] %vm232_vm3, %v2127_v51  ;;  %v2902_v61 = vsel %vm2646_vm12, %v2518_v45, %v2774_v55  ;;  %vm2583_vm13 = vcmp.ge.f32.partialorder %v2455_v56, 0.0  ;;  %v2711_v2 = vmul.f32 0.01, %v2455_v56  ;;  %v414_v50 = vld [vmem:[#allocation2 + $0x1a8] sm:$0xff] }
 0x1c9   : > { %v2385_v59 = vld [vmem:[#allocation2 + $0x378] sm:$0xff]  ;;  %v4102_v1 = vpack.c.bf16 %v2902_v61, %v2902_v61  ;;  %vm2647_vm14 = vcmp.ge.f32.partialorder %v2519_v57, 0.0  ;;  %v2775_v5 = vmul.f32 0.01, %v2519_v57  ;;  %vm2584_vm15 = vcmp.ge.f32.partialorder %v2456_v62, 0.0  ;;  %v478_v51 = vld [vmem:[#allocation2 + $0x3a8] sm:$0xff] }
 0x1ca   : > { %v2520_v63 = vadd.f32 %v5295_v42, %v2385_v59  ;;  %v2712_v6 = vmul.f32 0.01, %v2456_v62  ;;  %3479 = vst.msk [vmem:[%s4936_s22 + $0xb4] sm:$0xf] %vm3433_vm6, %v4038_v0  ;;  %v2839_v7 = vsel %vm2583_vm13, %v2455_v56, %v2711_v2  ;;  %v1703_v9 = vpop.f32.mrb[100].mxu0  ;;  %v1959_v10 = vpop.f32.mrb[100].mxu1 }
 0x1cb   : > { %3543 = vst.msk [vmem:[%s4936_s22 + $0x1b4] sm:$0xf] %vm3433_vm6, %v4102_v1  ;;  %v4039_v11 = vpack.c.bf16 %v2839_v7, %v2839_v7  ;;  %v2903_v12 = vsel %vm2647_vm14, %v2519_v57, %v2775_v5  ;;  %v2064_v16 = vadd.f32 %v1703_v9, %v411_v3  ;;  %v1705_v17 = vpop.f32.mrb[101].mxu0  ;;  %v1961_v18 = vpop.f32.mrb[101].mxu1  ;;  %v2128_v32 = vadd.f32 %v1959_v10, %v475_v4  ;;  %v415_v10 = vld [vmem:[#allocation2 + $0x1b0] sm:$0xff] }
 0x1cc   : > { %vm2648_vm0 = vcmp.ge.f32.partialorder %v2520_v63, 0.0  ;;  %v2776_v8 = vmul.f32 0.01, %v2520_v63  ;;  %v2840_v13 = vsel %vm2584_vm15, %v2456_v62, %v2712_v6  ;;  %v2322_v14 = vld [vmem:[#allocation2 + $0x180] sm:$0xff]  ;;  %v4103_v19 = vpack.c.bf16 %v2903_v12, %v2903_v12  ;;  %v1706_v24 = vpop.f32.mrb[102].mxu0  ;;  %v1962_v26 = vpop.f32.mrb[102].mxu1 }
 0x1cd   : > { %v2386_v15 = vld [vmem:[#allocation2 + $0x380] sm:$0xff]  ;;  %v4040_v21 = vpack.c.bf16 %v2840_v13, %v2840_v13  ;;  %v2457_v23 = vadd.f32 %v5295_v42, %v2322_v14  ;;  %3480 = vst.msk [vmem:[%s4936_s22 + $0xb8] sm:$0xf] %vm3433_vm6, %v4039_v11  ;;  %v2065_v33 = vadd.f32 %v1706_v24, %v412_v20  ;;  %v1708_v34 = vpop.f32.mrb[103].mxu0  ;;  %v1964_v35 = vpop.f32.mrb[103].mxu1  ;;  %v2129_v39 = vadd.f32 %v1962_v26, %v476_v25  ;;  %v479_v11 = vld [vmem:[#allocation2 + $0x3b0] sm:$0xff] }
 0x1ce   : > { %v2904_v22 = vsel %vm2648_vm0, %v2520_v63, %v2776_v8  ;;  %v2521_v28 = vadd.f32 %v5295_v42, %v2386_v15  ;;  %2193 = vst.msk [vmem:[#allocation2 + $0x190] sm:$0xff] %vm232_vm3, %v2064_v16  ;;  %2257 = vst.msk [vmem:[#allocation2 + $0x390] sm:$0xff] %vm232_vm3, %v2128_v32 }
 0x1cf   : > { %v4104_v27 = vpack.c.bf16 %v2904_v22, %v2904_v22  ;;  %v2323_v29 = vld [vmem:[#allocation2 + $0x188] sm:$0xff]  ;;  %3544 = vst.msk [vmem:[%s4936_s22 + $0x1b8] sm:$0xf] %vm3433_vm6, %v4103_v19  ;;  %3481 = vst.msk [vmem:[%s4936_s22 + $0xbc] sm:$0xf] %vm3433_vm6, %v4040_v21  ;;  %vm2585_vm1 = vcmp.ge.f32.partialorder %v2457_v23, 0.0 }
 0x1d0   : > { %v2387_v30 = vld [vmem:[#allocation2 + $0x388] sm:$0xff]  ;;  %v2713_v36 = vmul.f32 0.01, %v2457_v23  ;;  %v2458_v37 = vadd.f32 %v5295_v42, %v2323_v29  ;;  %vm2649_vm2 = vcmp.ge.f32.partialorder %v2521_v28, 0.0  ;;  %v2777_v31 = vmul.f32 0.01, %v2521_v28 }
 0x1d1   : > { %v2522_v38 = vadd.f32 %v5295_v42, %v2387_v30  ;;  %3545 = vst.msk [vmem:[%s4936_s22 + $0x1bc] sm:$0xf] %vm3433_vm6, %v4104_v27  ;;  %v480_v29 = vld [vmem:[#allocation2 + $0x3b8] sm:$0xff] }
 0x1d2   : > { %2194 = vst.msk [vmem:[#allocation2 + $0x198] sm:$0xff] %vm232_vm3, %v2065_v33  ;;  %v2841_v43 = vsel %vm2585_vm1, %v2457_v23, %v2713_v36  ;;  %vm2586_vm4 = vcmp.ge.f32.partialorder %v2458_v37, 0.0  ;;  %v2714_v44 = vmul.f32 0.01, %v2458_v37  ;;  %v2905_v46 = vsel %vm2649_vm2, %v2521_v28, %v2777_v31  ;;  %2258 = vst.msk [vmem:[#allocation2 + $0x398] sm:$0xff] %vm232_vm3, %v2129_v39  ;;  %v1711_v48 = vpop.f32.mrb[104].mxu0 }
 0x1d3   : > { %vm2650_vm5 = vcmp.ge.f32.partialorder %v2522_v38, 0.0  ;;  %v4041_v45 = vpack.c.bf16 %v2841_v43, %v2841_v43  ;;  %v2778_v47 = vmul.f32 0.01, %v2522_v38  ;;  %v1967_v49 = vpop.f32.mrb[104].mxu1  ;;  %v4105_v52 = vpack.c.bf16 %v2905_v46, %v2905_v46  ;;  %v1713_v56 = vpop.f32.mrb[105].mxu0  ;;  %v416_v23 = vld [vmem:[#allocation2 + $0x1b8] sm:$0xff] }
 0x1d4   : > { %v2842_v53 = vsel %vm2586_vm4, %v2458_v37, %v2714_v44  ;;  %v2066_v54 = vadd.f32 %v1711_v48, %v413_v40  ;;  %v2130_v55 = vadd.f32 %v1967_v49, %v477_v41  ;;  %v1969_v57 = vpop.f32.mrb[105].mxu1  ;;  %v1714_v60 = vpop.f32.mrb[106].mxu0  ;;  %v417_v49 = vld [vmem:[#allocation2 + $0x1c0] sm:$0xff] }
 0x1d5   : > { %3482 = vst.msk [vmem:[%s4936_s22 + $0xc0] sm:$0xf] %vm3433_vm6, %v4041_v45  ;;  %v4042_v58 = vpack.c.bf16 %v2842_v53, %v2842_v53  ;;  %v2906_v59 = vsel %vm2650_vm5, %v2522_v38, %v2778_v47  ;;  %v1970_v61 = vpop.f32.mrb[106].mxu1  ;;  %3546 = vst.msk [vmem:[%s4936_s22 + $0x1c0] sm:$0xf] %vm3433_vm6, %v4105_v52  ;;  %v2324_v63 = vld [vmem:[#allocation2 + $0x190] sm:$0xff]  ;;  %v2067_v0 = vadd.f32 %v1714_v60, %v414_v50 }
 0x1d6   : > { %v4106_v62 = vpack.c.bf16 %v2906_v59, %v2906_v59  ;;  %2195 = vst.msk [vmem:[#allocation2 + $0x1a0] sm:$0xff] %vm232_vm3, %v2066_v54  ;;  %2259 = vst.msk [vmem:[#allocation2 + $0x3a0] sm:$0xff] %vm232_vm3, %v2130_v55  ;;  %v2131_v1 = vadd.f32 %v1970_v61, %v478_v51  ;;  %v1716_v2 = vpop.f32.mrb[107].mxu0  ;;  %v1972_v3 = vpop.f32.mrb[107].mxu1  ;;  %v2459_v4 = vadd.f32 %v5295_v42, %v2324_v63  ;;  %v2388_v5 = vld [vmem:[#allocation2 + $0x390] sm:$0xff]  ;;  %v481_v50 = vld [vmem:[#allocation2 + $0x3c0] sm:$0xff] }
 0x1d7   : > { %3483 = vst.msk [vmem:[%s4936_s22 + $0xc4] sm:$0xf] %vm3433_vm6, %v4042_v58  ;;  %v2523_v8 = vadd.f32 %v5295_v42, %v2388_v5  ;;  %v418_v57 = vld [vmem:[#allocation2 + $0x1c8] sm:$0xff] }
 0x1d8   : > { %3547 = vst.msk [vmem:[%s4936_s22 + $0x1c4] sm:$0xf] %vm3433_vm6, %v4106_v62  ;;  %vm2587_vm7 = vcmp.ge.f32.partialorder %v2459_v4, 0.0  ;;  %v2715_v7 = vmul.f32 0.01, %v2459_v4  ;;  %v482_v58 = vld [vmem:[#allocation2 + $0x3c8] sm:$0xff] }
 0x1d9   : > { %v2325_v6 = vld [vmem:[#allocation2 + $0x198] sm:$0xff]  ;;  %2196 = vst.msk [vmem:[#allocation2 + $0x1a8] sm:$0xff] %vm232_vm3, %v2067_v0  ;;  %2260 = vst.msk [vmem:[#allocation2 + $0x3a8] sm:$0xff] %vm232_vm3, %v2131_v1  ;;  %vm2651_vm8 = vcmp.ge.f32.partialorder %v2523_v8, 0.0  ;;  %v2779_v13 = vmul.f32 0.01, %v2523_v8 }
 0x1da   : > { %v2460_v9 = vadd.f32 %v5295_v42, %v2325_v6  ;;  %v2389_v20 = vld [vmem:[#allocation2 + $0x398] sm:$0xff]  ;;  %v2843_v12 = vsel %vm2587_vm7, %v2459_v4, %v2715_v7  ;;  %v1719_v14 = vpop.f32.mrb[108].mxu0  ;;  %v1975_v15 = vpop.f32.mrb[108].mxu1 }
 0x1db   : > { %v4043_v16 = vpack.c.bf16 %v2843_v12, %v2843_v12  ;;  %v2524_v18 = vadd.f32 %v5295_v42, %v2389_v20  ;;  %v2068_v19 = vadd.f32 %v1719_v14, %v415_v10  ;;  %v1721_v21 = vpop.f32.mrb[109].mxu0  ;;  %v1977_v22 = vpop.f32.mrb[109].mxu1  ;;  %v2907_v24 = vsel %vm2651_vm8, %v2523_v8, %v2779_v13 }
 0x1dc   : > { %vm2588_vm9 = vcmp.ge.f32.partialorder %v2460_v9, 0.0  ;;  %v2716_v17 = vmul.f32 0.01, %v2460_v9  ;;  %v2132_v27 = vadd.f32 %v1975_v15, %v479_v11  ;;  %v1722_v28 = vpop.f32.mrb[110].mxu0  ;;  %v1978_v30 = vpop.f32.mrb[110].mxu1  ;;  %v4107_v32 = vpack.c.bf16 %v2907_v24, %v2907_v24  ;;  %v419_v21 = vld [vmem:[#allocation2 + $0x1d0] sm:$0xff] }
 0x1dd   : > { %v2326_v25 = vld [vmem:[#allocation2 + $0x1a0] sm:$0xff]  ;;  %3484 = vst.msk [vmem:[%s4936_s22 + $0xc8] sm:$0xf] %vm3433_vm6, %v4043_v16  ;;  %vm2652_vm10 = vcmp.ge.f32.partialorder %v2524_v18, 0.0  ;;  %v2780_v34 = vmul.f32 0.01, %v2524_v18  ;;  %v2069_v41 = vadd.f32 %v1722_v28, %v416_v23  ;;  %v2133_v46 = vadd.f32 %v1978_v30, %v480_v29 }
 0x1de   : > { %v2390_v26 = vld [vmem:[#allocation2 + $0x3a0] sm:$0xff]  ;;  %v2844_v33 = vsel %vm2588_vm9, %v2460_v9, %v2716_v17  ;;  %2197 = vst.msk [vmem:[#allocation2 + $0x1b0] sm:$0xff] %vm232_vm3, %v2068_v19  ;;  %v1724_v35 = vpop.f32.mrb[111].mxu0  ;;  %v1980_v36 = vpop.f32.mrb[111].mxu1  ;;  %v2461_v38 = vadd.f32 %v5295_v42, %v2326_v25  ;;  %2261 = vst.msk [vmem:[#allocation2 + $0x3b0] sm:$0xff] %vm232_vm3, %v2132_v27  ;;  %v483_v24 = vld [vmem:[#allocation2 + $0x3d0] sm:$0xff] }
 0x1df   : > { %v4044_v37 = vpack.c.bf16 %v2844_v33, %v2844_v33  ;;  %v2525_v31 = vadd.f32 %v5295_v42, %v2390_v26  ;;  %3548 = vst.msk [vmem:[%s4936_s22 + $0x1c8] sm:$0xf] %vm3433_vm6, %v4107_v32  ;;  %v2908_v43 = vsel %vm2652_vm10, %v2524_v18, %v2780_v34  ;;  %v420_v30 = vld [vmem:[#allocation2 + $0x1d8] sm:$0xff] }
 0x1e0   : > { %v2327_v39 = vld [vmem:[#allocation2 + $0x1a8] sm:$0xff]  ;;  %v4108_v47 = vpack.c.bf16 %v2908_v43, %v2908_v43  ;;  %vm2589_vm11 = vcmp.ge.f32.partialorder %v2461_v38, 0.0  ;;  %v2717_v48 = vmul.f32 0.01, %v2461_v38  ;;  %2198 = vst.msk [vmem:[#allocation2 + $0x1b8] sm:$0xff] %vm232_vm3, %v2069_v41  ;;  %2262 = vst.msk [vmem:[#allocation2 + $0x3b8] sm:$0xff] %vm232_vm3, %v2133_v46 }
 0x1e1   : > { %v2391_v40 = vld [vmem:[#allocation2 + $0x3a8] sm:$0xff]  ;;  %v2462_v44 = vadd.f32 %v5295_v42, %v2327_v39  ;;  %3485 = vst.msk [vmem:[%s4936_s22 + $0xcc] sm:$0xf] %vm3433_vm6, %v4044_v37  ;;  %vm2653_vm12 = vcmp.ge.f32.partialorder %v2525_v31, 0.0  ;;  %v2781_v51 = vmul.f32 0.01, %v2525_v31 }
 0x1e2   : > { %v2526_v45 = vadd.f32 %v5295_v42, %v2391_v40  ;;  %3549 = vst.msk [vmem:[%s4936_s22 + $0x1cc] sm:$0xf] %vm3433_vm6, %v4108_v47  ;;  %v2845_v53 = vsel %vm2589_vm11, %v2461_v38, %v2717_v48  ;;  %v1727_v55 = vpop.f32.mrb[112].mxu0  ;;  %v1983_v56 = vpop.f32.mrb[112].mxu1  ;;  %v484_v37 = vld [vmem:[#allocation2 + $0x3d8] sm:$0xff] }
 0x1e3   : > { %vm2590_vm13 = vcmp.ge.f32.partialorder %v2462_v44, 0.0  ;;  %v2718_v52 = vmul.f32 0.01, %v2462_v44  ;;  %v4045_v59 = vpack.c.bf16 %v2845_v53, %v2845_v53  ;;  %v2909_v60 = vsel %vm2653_vm12, %v2525_v31, %v2781_v51  ;;  %v1729_v63 = vpop.f32.mrb[113].mxu0  ;;  %v1985_v0 = vpop.f32.mrb[113].mxu1 }
 0x1e4   : > { %vm2654_vm14 = vcmp.ge.f32.partialorder %v2526_v45, 0.0  ;;  %v2782_v54 = vmul.f32 0.01, %v2526_v45  ;;  %v2070_v62 = vadd.f32 %v1727_v55, %v417_v49  ;;  %v4109_v1 = vpack.c.bf16 %v2909_v60, %v2909_v60  ;;  %v1730_v6 = vpop.f32.mrb[114].mxu0  ;;  %v1986_v7 = vpop.f32.mrb[114].mxu1  ;;  %v485_v60 = vld [vmem:[#allocation2 + $0x3e0] sm:$0xff] }
 0x1e5   : > { %v2846_v61 = vsel %vm2590_vm13, %v2462_v44, %v2718_v52  ;;  %v2328_v4 = vld [vmem:[#allocation2 + $0x1b0] sm:$0xff]  ;;  %v2134_v5 = vadd.f32 %v1983_v56, %v481_v50  ;;  %3486 = vst.msk [vmem:[%s4936_s22 + $0xd0] sm:$0xf] %vm3433_vm6, %v4045_v59  ;;  %v2071_v20 = vadd.f32 %v1730_v6, %v418_v57  ;;  %v2135_v11 = vadd.f32 %v1986_v7, %v482_v58  ;;  %v1732_v12 = vpop.f32.mrb[115].mxu0  ;;  %v1988_v13 = vpop.f32.mrb[115].mxu1  ;;  %v421_v59 = vld [vmem:[#allocation2 + $0x1e0] sm:$0xff] }
 0x1e6   : > { %v4046_v2 = vpack.c.bf16 %v2846_v61, %v2846_v61  ;;  %v2910_v3 = vsel %vm2654_vm14, %v2526_v45, %v2782_v54  ;;  %v2463_v9 = vadd.f32 %v5295_v42, %v2328_v4  ;;  %v2392_v10 = vld [vmem:[#allocation2 + $0x3b0] sm:$0xff]  ;;  %2199 = vst.msk [vmem:[#allocation2 + $0x1c0] sm:$0xff] %vm232_vm3, %v2070_v62  ;;  %v422_v4 = vld [vmem:[#allocation2 + $0x1e8] sm:$0xff] }
 0x1e7   : > { %v4110_v8 = vpack.c.bf16 %v2910_v3, %v2910_v3  ;;  %3550 = vst.msk [vmem:[%s4936_s22 + $0x1d0] sm:$0xf] %vm3433_vm6, %v4109_v1  ;;  %v2527_v14 = vadd.f32 %v5295_v42, %v2392_v10  ;;  %v2329_v16 = vld [vmem:[#allocation2 + $0x1b8] sm:$0xff] }
 0x1e8   : > { %3487 = vst.msk [vmem:[%s4936_s22 + $0xd4] sm:$0xf] %vm3433_vm6, %v4046_v2  ;;  %vm2591_vm15 = vcmp.ge.f32.partialorder %v2463_v9, 0.0  ;;  %v2719_v15 = vmul.f32 0.01, %v2463_v9  ;;  %v2464_v18 = vadd.f32 %v5295_v42, %v2329_v16  ;;  %v2393_v19 = vld [vmem:[#allocation2 + $0x3b8] sm:$0xff] }
 0x1e9   : > { %2263 = vst.msk [vmem:[#allocation2 + $0x3c0] sm:$0xff] %vm232_vm3, %v2134_v5  ;;  %2200 = vst.msk [vmem:[#allocation2 + $0x1c8] sm:$0xff] %vm232_vm3, %v2071_v20  ;;  %vm2655_vm0 = vcmp.ge.f32.partialorder %v2527_v14, 0.0  ;;  %v2783_v17 = vmul.f32 0.01, %v2527_v14  ;;  %v2528_v23 = vadd.f32 %v5295_v42, %v2393_v19  ;;  %v486_v5 = vld [vmem:[#allocation2 + $0x3e8] sm:$0xff] }
 0x1ea   : > { %3551 = vst.msk [vmem:[%s4936_s22 + $0x1d4] sm:$0xf] %vm3433_vm6, %v4110_v8  ;;  %v2847_v22 = vsel %vm2591_vm15, %v2463_v9, %v2719_v15  ;;  %vm2592_vm1 = vcmp.ge.f32.partialorder %v2464_v18, 0.0  ;;  %v2720_v27 = vmul.f32 0.01, %v2464_v18  ;;  %v1735_v28 = vpop.f32.mrb[116].mxu0 }
 0x1eb   : > { %2264 = vst.msk [vmem:[#allocation2 + $0x3c8] sm:$0xff] %vm232_vm3, %v2135_v11  ;;  %v4047_v25 = vpack.c.bf16 %v2847_v22, %v2847_v22  ;;  %v2911_v26 = vsel %vm2655_vm0, %v2527_v14, %v2783_v17  ;;  %v1991_v29 = vpop.f32.mrb[116].mxu1  ;;  %vm2656_vm2 = vcmp.ge.f32.partialorder %v2528_v23, 0.0  ;;  %v2784_v33 = vmul.f32 0.01, %v2528_v23  ;;  %v1737_v35 = vpop.f32.mrb[117].mxu0 }
 0x1ec   : > { %v4111_v32 = vpack.c.bf16 %v2911_v26, %v2911_v26  ;;  %v2072_v34 = vadd.f32 %v1735_v28, %v419_v21  ;;  %v1993_v36 = vpop.f32.mrb[117].mxu1  ;;  %v2848_v38 = vsel %vm2592_vm1, %v2464_v18, %v2720_v27  ;;  %v2136_v39 = vadd.f32 %v1991_v29, %v483_v24  ;;  %v1738_v40 = vpop.f32.mrb[118].mxu0 }
 0x1ed   : > { %3488 = vst.msk [vmem:[%s4936_s22 + $0xd8] sm:$0xf] %vm3433_vm6, %v4047_v25  ;;  %v2330_v31 = vld [vmem:[#allocation2 + $0x1c0] sm:$0xff]  ;;  %v1994_v41 = vpop.f32.mrb[118].mxu1  ;;  %v4048_v43 = vpack.c.bf16 %v2848_v38, %v2848_v38  ;;  %v2912_v44 = vsel %vm2656_vm2, %v2528_v23, %v2784_v33  ;;  %v2073_v47 = vadd.f32 %v1738_v40, %v420_v30  ;;  %v1740_v48 = vpop.f32.mrb[119].mxu0  ;;  %v487_v33 = vld [vmem:[#allocation2 + $0x3f0] sm:$0xff] }
 0x1ee   : > { %3552 = vst.msk [vmem:[%s4936_s22 + $0x1d8] sm:$0xf] %vm3433_vm6, %v4111_v32  ;;  %v2465_v45 = vadd.f32 %v5295_v42, %v2330_v31  ;;  %v1996_v49 = vpop.f32.mrb[119].mxu1  ;;  %v4112_v50 = vpack.c.bf16 %v2912_v44, %v2912_v44  ;;  %v2137_v54 = vadd.f32 %v1994_v41, %v484_v37  ;;  %v423_v32 = vld [vmem:[#allocation2 + $0x1f0] sm:$0xff]  ;;  %v424_v40 = vld [vmem:[#allocation2 + $0x1f8] sm:$0xff] }
 0x1ef   : > { %2201 = vst.msk [vmem:[#allocation2 + $0x1d0] sm:$0xff] %vm232_vm3, %v2072_v34  ;;  %2265 = vst.msk [vmem:[#allocation2 + $0x3d0] sm:$0xff] %vm232_vm3, %v2136_v39  ;;  %v488_v48 = vld [vmem:[#allocation2 + $0x3f8] sm:$0xff] }
 0x1f0   : > { %v2394_v46 = vld [vmem:[#allocation2 + $0x3c0] sm:$0xff]  ;;  %v2331_v52 = vld [vmem:[#allocation2 + $0x1c8] sm:$0xff]  ;;  %3489 = vst.msk [vmem:[%s4936_s22 + $0xdc] sm:$0xf] %vm3433_vm6, %v4048_v43  ;;  %vm2593_vm4 = vcmp.ge.f32.partialorder %v2465_v45, 0.0 }
 0x1f1   : > { %v2529_v51 = vadd.f32 %v5295_v42, %v2394_v46  ;;  %v2721_v55 = vmul.f32 0.01, %v2465_v45  ;;  %v2466_v56 = vadd.f32 %v5295_v42, %v2331_v52  ;;  %2202 = vst.msk [vmem:[#allocation2 + $0x1d8] sm:$0xff] %vm232_vm3, %v2073_v47  ;;  %2266 = vst.msk [vmem:[#allocation2 + $0x3d8] sm:$0xff] %vm232_vm3, %v2137_v54 }
 0x1f2   : > { %v2395_v53 = vld [vmem:[#allocation2 + $0x3c8] sm:$0xff]  ;;  %3553 = vst.msk [vmem:[%s4936_s22 + $0x1dc] sm:$0xf] %vm3433_vm6, %v4112_v50  ;;  %v1743_v2 = vpop.f32.mrb[120].mxu0  ;;  %v1999_v3 = vpop.f32.mrb[120].mxu1 }
 0x1f3   : > { %v2530_v57 = vadd.f32 %v5295_v42, %v2395_v53  ;;  %vm2657_vm5 = vcmp.ge.f32.partialorder %v2529_v51, 0.0  ;;  %v2785_v58 = vmul.f32 0.01, %v2529_v51  ;;  %v2849_v61 = vsel %vm2593_vm4, %v2465_v45, %v2721_v55  ;;  %v1745_v10 = vpop.f32.mrb[121].mxu0  ;;  %v2001_v20 = vpop.f32.mrb[121].mxu1 }
 0x1f4   : > { %vm2594_vm7 = vcmp.ge.f32.partialorder %v2466_v56, 0.0  ;;  %v2722_v62 = vmul.f32 0.01, %v2466_v56  ;;  %v4049_v63 = vpack.c.bf16 %v2849_v61, %v2849_v61  ;;  %v2074_v8 = vadd.f32 %v1743_v2, %v421_v59  ;;  %v1746_v14 = vpop.f32.mrb[122].mxu0  ;;  %v2002_v15 = vpop.f32.mrb[122].mxu1 }
 0x1f5   : > { %vm2658_vm8 = vcmp.ge.f32.partialorder %v2530_v57, 0.0  ;;  %v2913_v0 = vsel %vm2657_vm5, %v2529_v51, %v2785_v58  ;;  %v2786_v1 = vmul.f32 0.01, %v2530_v57  ;;  %v2138_v9 = vadd.f32 %v1999_v3, %v485_v60  ;;  %v1748_v22 = vpop.f32.mrb[123].mxu0  ;;  %v2004_v23 = vpop.f32.mrb[123].mxu1 }
 0x1f6   : > { %v4113_v6 = vpack.c.bf16 %v2913_v0, %v2913_v0  ;;  %v2850_v7 = vsel %vm2594_vm7, %v2466_v56, %v2722_v62  ;;  %3490 = vst.msk [vmem:[%s4936_s22 + $0xe0] sm:$0xf] %vm3433_vm6, %v4049_v63  ;;  %v2332_v13 = vld [vmem:[#allocation2 + $0x1d0] sm:$0xff]  ;;  %v2075_v19 = vadd.f32 %v1746_v14, %v422_v4  ;;  %v2139_v21 = vadd.f32 %v2002_v15, %v486_v5 }
 0x1f7   : > { %v4050_v11 = vpack.c.bf16 %v2850_v7, %v2850_v7  ;;  %v2914_v12 = vsel %vm2658_vm8, %v2530_v57, %v2786_v1  ;;  %v2467_v17 = vadd.f32 %v5295_v42, %v2332_v13  ;;  %v2396_v18 = vld [vmem:[#allocation2 + $0x3d0] sm:$0xff]  ;;  %2203 = vst.msk [vmem:[#allocation2 + $0x1e0] sm:$0xff] %vm232_vm3, %v2074_v8  ;;  %2267 = vst.msk [vmem:[#allocation2 + $0x3e0] sm:$0xff] %vm232_vm3, %v2138_v9 }
 0x1f8   : > { %3554 = vst.msk [vmem:[%s4936_s22 + $0x1e0] sm:$0xf] %vm3433_vm6, %v4113_v6  ;;  %v4114_v16 = vpack.c.bf16 %v2914_v12, %v2914_v12  ;;  %v2531_v24 = vadd.f32 %v5295_v42, %v2396_v18  ;;  %v2333_v25 = vld [vmem:[#allocation2 + $0x1d8] sm:$0xff] }
 0x1f9   : > { %3491 = vst.msk [vmem:[%s4936_s22 + $0xe4] sm:$0xf] %vm3433_vm6, %v4050_v11  ;;  %vm2595_vm9 = vcmp.ge.f32.partialorder %v2467_v17, 0.0  ;;  %v2723_v26 = vmul.f32 0.01, %v2467_v17  ;;  %v2468_v27 = vadd.f32 %v5295_v42, %v2333_v25  ;;  %v2397_v28 = vld [vmem:[#allocation2 + $0x3d8] sm:$0xff] }
 0x1fa   : > { %3555 = vst.msk [vmem:[%s4936_s22 + $0x1e4] sm:$0xf] %vm3433_vm6, %v4114_v16  ;;  %vm2659_vm10 = vcmp.ge.f32.partialorder %v2531_v24, 0.0  ;;  %v2787_v29 = vmul.f32 0.01, %v2531_v24  ;;  %v2532_v30 = vadd.f32 %v5295_v42, %v2397_v28  ;;  %v1751_v31 = vpop.f32.mrb[124].mxu0 }
 0x1fb   : > { %2204 = vst.msk [vmem:[#allocation2 + $0x1e8] sm:$0xff] %vm232_vm3, %v2075_v19  ;;  %2268 = vst.msk [vmem:[#allocation2 + $0x3e8] sm:$0xff] %vm232_vm3, %v2139_v21  ;;  %v2851_v34 = vsel %vm2595_vm9, %v2467_v17, %v2723_v26  ;;  %vm2596_vm11 = vcmp.ge.f32.partialorder %v2468_v27, 0.0  ;;  %v2724_v35 = vmul.f32 0.01, %v2468_v27  ;;  %v2007_v39 = vpop.f32.mrb[124].mxu1  ;;  %v2076_v44 = vadd.f32 %v1751_v31, %v423_v32 }
 0x1fc   : > { %v4051_v36 = vpack.c.bf16 %v2851_v34, %v2851_v34  ;;  %v2915_v37 = vsel %vm2659_vm10, %v2531_v24, %v2787_v29  ;;  %vm2660_vm12 = vcmp.ge.f32.partialorder %v2532_v30, 0.0  ;;  %v2788_v38 = vmul.f32 0.01, %v2532_v30  ;;  %v1753_v46 = vpop.f32.mrb[125].mxu0  ;;  %v2009_v47 = vpop.f32.mrb[125].mxu1 }
 0x1fd   : > { %v4115_v41 = vpack.c.bf16 %v2915_v37, %v2915_v37  ;;  %v2852_v43 = vsel %vm2596_vm11, %v2468_v27, %v2724_v35  ;;  %v2140_v45 = vadd.f32 %v2007_v39, %v487_v33  ;;  %v1754_v53 = vpop.f32.mrb[126].mxu0  ;;  %v2010_v54 = vpop.f32.mrb[126].mxu1  ;;  %2205 = vst.msk [vmem:[#allocation2 + $0x1f0] sm:$0xff] %vm232_vm3, %v2076_v44 }
 0x1fe   : > { %3492 = vst.msk [vmem:[%s4936_s22 + $0xe8] sm:$0xf] %vm3433_vm6, %v4051_v36  ;;  %v4052_v49 = vpack.c.bf16 %v2852_v43, %v2852_v43  ;;  %v2916_v50 = vsel %vm2660_vm12, %v2532_v30, %v2788_v38  ;;  %v2334_v51 = vld [vmem:[#allocation2 + $0x1e0] sm:$0xff]  ;;  %v2077_v58 = vadd.f32 %v1754_v53, %v424_v40  ;;  %v1756_v59 = vpop.f32.mrb[127].mxu0  ;;  %v2012_v60 = vpop.f32.mrb[127].mxu1  ;;  %v2141_v63 = vadd.f32 %v2010_v54, %v488_v48 }
 0x1ff   : > { %v2398_v52 = vld [vmem:[#allocation2 + $0x3e0] sm:$0xff]  ;;  %3556 = vst.msk [vmem:[%s4936_s22 + $0x1e8] sm:$0xf] %vm3433_vm6, %v4115_v41  ;;  %v4116_v55 = vpack.c.bf16 %v2916_v50, %v2916_v50  ;;  %v2469_v56 = vadd.f32 %v5295_v42, %v2334_v51 }
 0x200   : > { %v2533_v57 = vadd.f32 %v5295_v42, %v2398_v52  ;;  %2269 = vst.msk [vmem:[#allocation2 + $0x3f0] sm:$0xff] %vm232_vm3, %v2140_v45  ;;  %2206 = vst.msk [vmem:[#allocation2 + $0x1f8] sm:$0xff] %vm232_vm3, %v2077_v58 }
 0x201   : > { %3493 = vst.msk [vmem:[%s4936_s22 + $0xec] sm:$0xf] %vm3433_vm6, %v4052_v49  ;;  %3557 = vst.msk [vmem:[%s4936_s22 + $0x1ec] sm:$0xf] %vm3433_vm6, %v4116_v55  ;;  %vm2597_vm13 = vcmp.ge.f32.partialorder %v2469_v56, 0.0 }
 0x202   : > { %v2335_v61 = vld [vmem:[#allocation2 + $0x1e8] sm:$0xff]  ;;  %v2725_v0 = vmul.f32 0.01, %v2469_v56  ;;  %vm2661_vm14 = vcmp.ge.f32.partialorder %v2533_v57, 0.0  ;;  %v2789_v1 = vmul.f32 0.01, %v2533_v57 }
 0x203   : > { %v2399_v62 = vld [vmem:[#allocation2 + $0x3e8] sm:$0xff]  ;;  %v2470_v2 = vadd.f32 %v5295_v42, %v2335_v61  ;;  %2270 = vst.msk [vmem:[#allocation2 + $0x3f8] sm:$0xff] %vm232_vm3, %v2141_v63 }
 0x204   : > { %v2534_v3 = vadd.f32 %v5295_v42, %v2399_v62  ;;  %v2853_v4 = vsel %vm2597_vm13, %v2469_v56, %v2725_v0  ;;  %v2917_v5 = vsel %vm2661_vm14, %v2533_v57, %v2789_v1  ;;  %v2336_v20 = vld [vmem:[#allocation2 + $0x1f0] sm:$0xff] }
 0x205   : > { %v4053_v6 = vpack.c.bf16 %v2853_v4, %v2853_v4  ;;  %v4117_v7 = vpack.c.bf16 %v2917_v5, %v2917_v5  ;;  %vm2598_vm15 = vcmp.ge.f32.partialorder %v2470_v2, 0.0  ;;  %v2726_v8 = vmul.f32 0.01, %v2470_v2 }
 0x206   : > { %vm2662_vm0 = vcmp.ge.f32.partialorder %v2534_v3, 0.0  ;;  %v2790_v9 = vmul.f32 0.01, %v2534_v3  ;;  %v2471_v14 = vadd.f32 %v5295_v42, %v2336_v20 }
 0x207   : > { %3494 = vst.msk [vmem:[%s4936_s22 + $0xf0] sm:$0xf] %vm3433_vm6, %v4053_v6  ;;  %3558 = vst.msk [vmem:[%s4936_s22 + $0x1f0] sm:$0xf] %vm3433_vm6, %v4117_v7  ;;  %v2854_v10 = vsel %vm2598_vm15, %v2470_v2, %v2726_v8  ;;  %v2400_v11 = vld [vmem:[#allocation2 + $0x3f0] sm:$0xff]  ;;  %v2337_v17 = vld [vmem:[#allocation2 + $0x1f8] sm:$0xff] }
 0x208   : > { %v4054_v12 = vpack.c.bf16 %v2854_v10, %v2854_v10  ;;  %v2918_v13 = vsel %vm2662_vm0, %v2534_v3, %v2790_v9  ;;  %v2535_v15 = vadd.f32 %v5295_v42, %v2400_v11  ;;  %vm2599_vm3 = vcmp.ge.f32.partialorder %v2471_v14, 0.0 }
 0x209   : > { %v4118_v16 = vpack.c.bf16 %v2918_v13, %v2918_v13  ;;  %v2727_v18 = vmul.f32 0.01, %v2471_v14  ;;  %v2472_v21 = vadd.f32 %v5295_v42, %v2337_v17 }
 0x20a   : > { %3495 = vst.msk [vmem:[%s4936_s22 + $0xf4] sm:$0xf] %vm3433_vm6, %v4054_v12  ;;  %vm2663_vm1 = vcmp.ge.f32.partialorder %v2535_v15, 0.0  ;;  %v2791_v19 = vmul.f32 0.01, %v2535_v15  ;;  %v2401_v22 = vld [vmem:[#allocation2 + $0x3f8] sm:$0xff] }
 0x20b   : > { %3559 = vst.msk [vmem:[%s4936_s22 + $0x1f4] sm:$0xf] %vm3433_vm6, %v4118_v16  ;;  %v2855_v23 = vsel %vm2599_vm3, %v2471_v14, %v2727_v18  ;;  %v2536_v25 = vadd.f32 %v5295_v42, %v2401_v22  ;;  %vm2600_vm2 = vcmp.ge.f32.partialorder %v2472_v21, 0.0  ;;  %v2728_v28 = vmul.f32 0.01, %v2472_v21 }
 0x20c   : > { %v2919_v24 = vsel %vm2663_vm1, %v2535_v15, %v2791_v19  ;;  %v4055_v26 = vpack.c.bf16 %v2855_v23, %v2855_v23 }
 0x20d   : > { %v4119_v27 = vpack.c.bf16 %v2919_v24, %v2919_v24  ;;  %vm2664_vm4 = vcmp.ge.f32.partialorder %v2536_v25, 0.0  ;;  %v2792_v29 = vmul.f32 0.01, %v2536_v25  ;;  %v2856_v30 = vsel %vm2600_vm2, %v2472_v21, %v2728_v28 }
 0x20e   : > { %3496 = vst.msk [vmem:[%s4936_s22 + $0xf8] sm:$0xf] %vm3433_vm6, %v4055_v26  ;;  %v4056_v32 = vpack.c.bf16 %v2856_v30, %v2856_v30 }
 0x20f   : > { %3560 = vst.msk [vmem:[%s4936_s22 + $0x1f8] sm:$0xf] %vm3433_vm6, %v4119_v27  ;;  %v2920_v33 = vsel %vm2664_vm4, %v2536_v25, %v2792_v29 }
 0x210   : > { %v4120_v34 = vpack.c.bf16 %v2920_v33, %v2920_v33  ;;  %3497 = vst.msk [vmem:[%s4936_s22 + $0xfc] sm:$0xf] %vm3433_vm6, %v4056_v32 }
 0x212   : > { %3561 = vst.msk [vmem:[%s4936_s22 + $0x1fc] sm:$0xf] %vm3433_vm6, %v4120_v34 }
 0x213 PF: > { %s13_s14 = sadd.s32 1, %s4394_s14   ;;  %s5489_s12 = smov %s4390_s13 }
 0x214   : > { %p10_p5 = scmp.ge.s32.totalorder %s13_s14, 18   ;;  %s5490_s13 = smov %s5492_s15 }
 0x216   :  { %12 = sbr.rel (!%p10_p5) target bundleno = 2 (0x2), region = 73 }

</bundles_post_ra>
